<compile_context>
chip_gen: v7x
topology: tpu7x:2x2x1
jax: 0.10.0
libtpu: 0.0.40
codegen_flags: <defaults>
</compile_context>

<pallas_src>
import functools

import jax
import jax.numpy as jnp
from jax.experimental import pallas as pl
from jax.experimental.pallas import tpu as pltpu


# ----------------------------------------------------------------------------
# The fused Sea_Attention kernel (one grid step per batch element).
# ----------------------------------------------------------------------------
def _sea_attention_kernel(
        x_ref, dwmask_ref, a_row_ref, a_col_ref, s_row_ref, s_col_ref,
        pe_rq_ref, pe_rk_ref, pe_cq_ref, pe_ck_ref,
        w_qkv_ref, b_qkv_ref, w_dw_ref, b_dw_ref, w_pw_ref, b_pw_ref,
        w_row_ref, b_row_ref, w_col_ref, b_col_ref, w_proj_ref, b_proj_ref,
        o_ref, *, H, W, num_heads, key_dim, d, scale):
    f32 = jnp.float32
    bf16 = jnp.bfloat16
    nh_kd = num_heads * key_dim
    dh = num_heads * d
    c2 = 2 * dh
    HW = H * W

    # ---- fused to_q|to_k|to_v 1x1 conv (+ folded BN), channel-major:
    #      (c2, C) @ (C, HW) -> (c2, HW);   lanes = HW (dense).
    x = x_ref[0].astype(bf16)                                   # (C, HW)
    qkv = (jnp.dot(w_qkv_ref[...], x, preferred_element_type=f32)
           + b_qkv_ref[...])                                    # (c2, HW) f32

    # ---- detail branch: depthwise 3x3 (+BN) -> ReLU -> pwconv 1x1 (+BN).
    # Spatial neighbours come from lane rolls + tiny per-lane validity masks
    # (zero padding); no misaligned slices, no materialized full-size copies.
    wdw = w_dw_ref[...]                                         # (c2, 9) f32
    acc = qkv * wdw[:, 4:5] + b_dw_ref[...]                     # center tap + bias
    for di in (-1, 0, 1):
        for dj in (-1, 0, 1):
            if di == 0 and dj == 0:
                continue
            t = (di + 1) * 3 + (dj + 1)
            off = di * W + dj                                   # neighbour offset
            rolled = pltpu.roll(qkv, (-off) % HW, axis=1)       # rolled[p]=qkv[p+off]
            valid = dwmask_ref[t:t + 1, :]                      # (1, HW) 0/1
            acc = acc + (rolled * valid) * wdw[:, t:t + 1]
    dqkv = jnp.maximum(acc, 0.0).astype(bf16)                   # (c2, HW)
    qkv_det = (jnp.dot(w_pw_ref[...], dqkv, preferred_element_type=f32)
               + b_pw_ref[...])                                 # (C, HW) f32

    # ---- axial squeezes (mean over W -> row branch, mean over H -> column),
    #      as matmuls against constant averaging selectors.
    qkv_bf = qkv.astype(bf16)
    mean_row = jnp.dot(qkv_bf, a_row_ref[...], preferred_element_type=f32)  # (c2, H)
    mean_col = jnp.dot(qkv_bf, a_col_ref[...], preferred_element_type=f32)  # (c2, W)

    q_row = mean_row[:nh_kd, :] + pe_rq_ref[...]
    k_row = mean_row[nh_kd:2 * nh_kd, :] + pe_rk_ref[...]
    v_row = mean_row[2 * nh_kd:, :]
    q_col = mean_col[:nh_kd, :] + pe_cq_ref[...]
    k_col = mean_col[nh_kd:2 * nh_kd, :] + pe_ck_ref[...]
    v_col = mean_col[2 * nh_kd:, :]

    def axial_branch(q_cm, k_cm, v_cm, w_t, b, L):
        # Channel-major; heads are 8-aligned sublane slices.  One softmax pass
        # and one projection matmul per branch.
        qb = q_cm.astype(bf16)
        kb = k_cm.astype(bf16)
        scores = []
        for h in range(num_heads):
            qh = qb[h * key_dim:(h + 1) * key_dim, :]           # (kd, L)
            kh = kb[h * key_dim:(h + 1) * key_dim, :]           # (kd, L)
            scores.append(jax.lax.dot_general(
                qh, kh, (((0,), (0,)), ((), ())),
                preferred_element_type=f32))                    # (L, L)
        s = jnp.concatenate(scores, axis=0) * scale             # (nh*L, L)
        s = s - jnp.max(s, axis=-1, keepdims=True)
        e = jnp.exp(s)
        p = (e / jnp.sum(e, axis=-1, keepdims=True)).astype(bf16)
        vb = v_cm.astype(bf16)
        outs = []
        for h in range(num_heads):
            ph = p[h * L:(h + 1) * L, :]                        # (L, L)
            vh = vb[h * d:(h + 1) * d, :]                       # (d, L)
            outs.append(jax.lax.dot_general(
                vh, ph, (((1,), (1,)), ((), ())),
                preferred_element_type=f32))                    # (d, L) chan-major
        xx = jnp.maximum(jnp.concatenate(outs, axis=0), 0.0)    # (dh, L)
        return jnp.dot(w_t, xx.astype(bf16),
                       preferred_element_type=f32) + b          # (dh, L)

    xx_row = axial_branch(q_row, k_row, v_row,
                          w_row_ref[...], b_row_ref[...], H)    # (dh, H)
    xx_col = axial_branch(q_col, k_col, v_col,
                          w_col_ref[...], b_col_ref[...], W)    # (dh, W)

    # ---- finale: relu(v + row + col) -> 1x1 proj (+BN) -> sigmoid gate * det.
    v3 = qkv[2 * nh_kd:, :]                                     # (dh, HW)
    row_b = jnp.dot(xx_row.astype(bf16), s_row_ref[...],
                    preferred_element_type=f32)                 # (dh, HW)
    col_b = jnp.dot(xx_col.astype(bf16), s_col_ref[...],
                    preferred_element_type=f32)                 # (dh, HW)
    pre = jnp.maximum(v3 + row_b + col_b, 0.0).astype(bf16)
    y = (jnp.dot(w_proj_ref[...], pre, preferred_element_type=f32)
         + b_proj_ref[...])                                     # (C, HW)
    o_ref[0] = jax.nn.sigmoid(y) * qkv_det                      # lane-dense store


# ----------------------------------------------------------------------------
# Positional-embedding interpolation (F.interpolate, linear, align_corners=F).
# Tiny data-dependent gather -> kept in plain JAX in the wrapper.
# ----------------------------------------------------------------------------
def interp_pos_embed(pe, n):
    _, L = pe.shape
    idx = (jnp.arange(n, dtype=jnp.float32) + 0.5) * (L / n) - 0.5
    idx = jnp.clip(idx, 0.0, L - 1)
    lo = jnp.floor(idx).astype(jnp.int32)
    hi = jnp.minimum(lo + 1, L - 1)
    w = idx - lo.astype(jnp.float32)
    return pe[:, lo] * (1.0 - w) + pe[:, hi] * w                # (C, n)


# ----------------------------------------------------------------------------
# Full forward (matches Sea_Attention.forward semantics, eval-mode BN).
# ----------------------------------------------------------------------------
def sea_attention_forward(x, p, *, num_heads, key_dim, attn_ratio=2,
                          compute_dtype=jnp.bfloat16):
    B, C, H, W = x.shape                       # NCHW (PyTorch convention)
    nh_kd = key_dim * num_heads
    d = int(attn_ratio * key_dim)
    dh = d * num_heads
    c2 = 2 * dh
    HW = H * W
    scale = key_dim ** (-0.5)
    cd = compute_dtype
    f32 = jnp.float32

    # Exact unpadded channel-major input block: no transpose, no over-read.
    x_cm = x.reshape(B, C, HW)

    # Fold BN scales into the conv weights (w' = w * gamma'); biases stay f32.
    w_qkv_t = jnp.concatenate(
        [(p['wq'] * p['sq'][None, :]).T,
         (p['wk'] * p['sk'][None, :]).T,
         (p['wv'] * p['sv'][None, :]).T], axis=0).astype(cd)          # (c2, C)
    b_qkv = jnp.concatenate([p['bq'], p['bk'], p['bv']]).reshape(c2, 1)
    w_dw_t = (p['wdw'] * p['sdw'][None, None, :]).reshape(9, c2).T    # (c2, 9) f32
    b_dw = p['bdw'].reshape(c2, 1)
    w_pw_t = (p['wpw'] * p['spw'][None, :]).T.astype(cd)              # (C, c2)
    b_pw = p['bpw'].reshape(C, 1)
    w_row_t = (p['wrow'] * p['srow'][None, :]).T.astype(cd)           # (dh, dh)
    b_row = p['brow'].reshape(dh, 1)
    w_col_t = (p['wcol'] * p['scol'][None, :]).T.astype(cd)           # (dh, dh)
    b_col = p['bcol'].reshape(dh, 1)
    w_proj_t = (p['wproj'] * p['sproj'][None, :]).T.astype(cd)        # (C, dh)
    b_proj = p['bproj'].reshape(C, 1)

    # Interpolated positional embeddings, channel-major (nh_kd, L), f32.
    pe_rq = interp_pos_embed(p['pe_rowq'], H)
    pe_rk = interp_pos_embed(p['pe_rowk'], H)
    pe_cq = interp_pos_embed(p['pe_colq'], W)
    pe_ck = interp_pos_embed(p['pe_colk'], W)

    # Per-lane spatial constants: dwconv zero-padding validity masks and the
    # 0/1 selectors used for the axial squeezes / broadcasts.
    ii = jnp.arange(HW) // W                   # pixel row index
    jj = jnp.arange(HW) % W                    # pixel column index
    dwmask = jnp.stack(
        [((ii + di >= 0) & (ii + di < H) & (jj + dj >= 0) & (jj + dj < W)
          ).astype(f32)
         for di in (-1, 0, 1) for dj in (-1, 0, 1)], axis=0)          # (9, HW)
    row_onehot = (ii[None, :] == jnp.arange(H)[:, None]).astype(f32)  # (H, HW)
    col_onehot = (jj[None, :] == jnp.arange(W)[:, None]).astype(f32)  # (W, HW)
    s_row = row_onehot.astype(cd)
    s_col = col_onehot.astype(cd)
    a_row = (row_onehot.T / W).astype(cd)                             # (HW, H)
    a_col = (col_onehot.T / H).astype(cd)                             # (HW, W)

    kernel = functools.partial(
        _sea_attention_kernel, H=H, W=W, num_heads=num_heads,
        key_dim=key_dim, d=d, scale=scale)

    rep = lambda b: (0, 0)     # replicated weights / constants (fetched once)

    out_cm = pl.pallas_call(
        kernel,
        out_shape=jax.ShapeDtypeStruct((B, C, HW), f32),
        grid=(B,),
        in_specs=[
            pl.BlockSpec((1, C, HW), lambda b: (b, 0, 0)),   # x (channel-major)
            pl.BlockSpec((9, HW), rep),                      # dwconv validity masks
            pl.BlockSpec((HW, H), rep),                      # row-mean selector
            pl.BlockSpec((HW, W), rep),                      # col-mean selector
            pl.BlockSpec((H, HW), rep),                      # row broadcast selector
            pl.BlockSpec((W, HW), rep),                      # col broadcast selector
            pl.BlockSpec((nh_kd, H), rep),                   # pos emb row q
            pl.BlockSpec((nh_kd, H), rep),                   # pos emb row k
            pl.BlockSpec((nh_kd, W), rep),                   # pos emb col q
            pl.BlockSpec((nh_kd, W), rep),                   # pos emb col k
            pl.BlockSpec((c2, C), rep),                      # w to_q|to_k|to_v
            pl.BlockSpec((c2, 1), rep),                      # b to_q|to_k|to_v
            pl.BlockSpec((c2, 9), rep),                      # w dwconv taps
            pl.BlockSpec((c2, 1), rep),                      # b dwconv
            pl.BlockSpec((C, c2), rep),                      # w pwconv
            pl.BlockSpec((C, 1), rep),                       # b pwconv
            pl.BlockSpec((dh, dh), rep),                     # w proj_encode_row
            pl.BlockSpec((dh, 1), rep),                      # b proj_encode_row
            pl.BlockSpec((dh, dh), rep),                     # w proj_encode_col
            pl.BlockSpec((dh, 1), rep),                      # b proj_encode_col
            pl.BlockSpec((C, dh), rep),                      # w proj
            pl.BlockSpec((C, 1), rep),                       # b proj
        ],
        out_specs=pl.BlockSpec((1, C, HW), lambda b: (b, 0, 0)),
        compiler_params=pltpu.CompilerParams(
            dimension_semantics=("parallel",),
            # Stays well inside v7x's 64 MiB/TC; plenty on v5e/v6e (128 MiB).
            vmem_limit_bytes=48 * 1024 * 1024),
    )(x_cm, dwmask, a_row, a_col, s_row, s_col, pe_rq, pe_rk, pe_cq, pe_ck,
      w_qkv_t, b_qkv, w_dw_t, b_dw, w_pw_t, b_pw,
      w_row_t, b_row, w_col_t, b_col, w_proj_t, b_proj)

    return out_cm.reshape(B, C, H, W)          # already NCHW: reshape only


# ----------------------------------------------------------------------------
# Pure-JAX (f32) reference implementation of the same forward, for checking.
# ----------------------------------------------------------------------------
def sea_attention_reference(x, p, *, num_heads, key_dim, attn_ratio=2):
    B, C, H, W = x.shape
    d = int(attn_ratio * key_dim)
    dh = d * num_heads
    scale = key_dim ** (-0.5)
    P = jax.lax.Precision.HIGHEST

    def conv1x1(inp, w, s, b):                 # inp (B,Cin,H,W); w (Cin,Cout)
        y = jnp.einsum('bchw,co->bohw', inp, w, precision=P)
        return y * s[None, :, None, None] + b[None, :, None, None]

    q = conv1x1(x, p['wq'], p['sq'], p['bq'])
    k = conv1x1(x, p['wk'], p['sk'], p['bk'])
    v = conv1x1(x, p['wv'], p['sv'], p['bv'])
    qkv = jnp.concatenate([q, k, v], axis=1)                    # (B, c2, H, W)

    wdw = p['wdw'] * p['sdw'][None, None, :]                    # (3, 3, c2)
    qkv_pad = jnp.pad(qkv, ((0, 0), (0, 0), (1, 1), (1, 1)))
    dw = jnp.zeros_like(qkv)
    for ki in range(3):
        for kj in range(3):
            dw = dw + (qkv_pad[:, :, ki:ki + H, kj:kj + W]
                       * wdw[ki, kj, :][None, :, None, None])
    dw = jnp.maximum(dw + p['bdw'][None, :, None, None], 0.0)
    qkv_det = conv1x1(dw, p['wpw'], p['spw'], p['bpw'])         # (B, C, H, W)

    q_row = q.mean(-1) + interp_pos_embed(p['pe_rowq'], H)[None]
    k_row = k.mean(-1) + interp_pos_embed(p['pe_rowk'], H)[None]
    v_row = v.mean(-1)
    q_col = q.mean(-2) + interp_pos_embed(p['pe_colq'], W)[None]
    k_col = k.mean(-2) + interp_pos_embed(p['pe_colk'], W)[None]
    v_col = v.mean(-2)

    def branch(qm, km, vm, w, s, b, L):
        qh = qm.reshape(B, num_heads, key_dim, L).transpose(0, 1, 3, 2)
        kh = km.reshape(B, num_heads, key_dim, L)
        vh = vm.reshape(B, num_heads, d, L).transpose(0, 1, 3, 2)
        attn = jnp.einsum('bhlk,bhkm->bhlm', qh, kh, precision=P) * scale
        attn = jax.nn.softmax(attn, axis=-1)
        o = jnp.einsum('bhlm,bhmd->bhld', attn, vh, precision=P)
        o = o.transpose(0, 1, 3, 2).reshape(B, dh, L)
        o = jnp.maximum(o, 0.0)
        o = jnp.einsum('bcl,co->bol', o, w, precision=P)
        return o * s[None, :, None] + b[None, :, None]          # (B, dh, L)

    xx_row = branch(q_row, k_row, v_row, p['wrow'], p['srow'], p['brow'], H)
    xx_col = branch(q_col, k_col, v_col, p['wcol'], p['scol'], p['bcol'], W)

    xx = jnp.maximum(v + xx_row[:, :, :, None] + xx_col[:, :, None, :], 0.0)
    y = conv1x1(xx, p['wproj'], p['sproj'], p['bproj'])
    return jax.nn.sigmoid(y) * qkv_det


# ----------------------------------------------------------------------------
# Deterministic synthetic parameters (shapes follow the module's __init__).
# TODO(synk): bn_weight_init=0 of proj / proj_encode_* is intentionally NOT
# honored (it would zero those branches); BN gammas are random near 1 instead.
# ----------------------------------------------------------------------------
def init_params(key, dim, key_dim, num_heads, attn_ratio=2):
    nh_kd = key_dim * num_heads
    d = int(attn_ratio * key_dim)
    dh = d * num_heads
    keys = iter(jax.random.split(key, 32))

    def wgt(shape, s=0.1):
        return jax.random.normal(next(keys), shape, jnp.float32) * s

    def affine(c):
        g = 1.0 + 0.05 * jax.random.normal(next(keys), (c,), jnp.float32)
        b = 0.05 * jax.random.normal(next(keys), (c,), jnp.float32)
        return g, b

    p = {}
    p['wq'] = wgt((dim, nh_kd));      p['sq'], p['bq'] = affine(nh_kd)
    p['wk'] = wgt((dim, nh_kd));      p['sk'], p['bk'] = affine(nh_kd)
    p['wv'] = wgt((dim, dh));         p['sv'], p['bv'] = affine(dh)
    p['wdw'] = wgt((3, 3, 2 * dh));   p['sdw'], p['bdw'] = affine(2 * dh)
    p['wpw'] = wgt((2 * dh, dim));    p['spw'], p['bpw'] = affine(dim)
    p['wrow'] = wgt((dh, dh));        p['srow'], p['brow'] = affine(dh)
    p['wcol'] = wgt((dh, dh));        p['scol'], p['bcol'] = affine(dh)
    p['wproj'] = wgt((dh, dim));      p['sproj'], p['bproj'] = affine(dim)
    p['pe_rowq'] = wgt((nh_kd, 16), 1.0)
    p['pe_rowk'] = wgt((nh_kd, 16), 1.0)
    p['pe_colq'] = wgt((nh_kd, 16), 1.0)
    p['pe_colk'] = wgt((nh_kd, 16), 1.0)
    return p


if __name__ == "__main__":
    B, C, H, W = 2, 32, 16, 16
    key_dim, num_heads, attn_ratio = 8, 2, 2

    key = jax.random.PRNGKey(0)
    kx, kp = jax.random.split(key)
    x = jax.random.normal(kx, (B, C, H, W), jnp.float32)
    params = init_params(kp, C, key_dim, num_heads, attn_ratio)

    fwd = jax.jit(functools.partial(sea_attention_forward,
                                    num_heads=num_heads,
                                    key_dim=key_dim,
                                    attn_ratio=attn_ratio))
    out = fwd(x, params)
    jax.block_until_ready(out)
    assert out.shape == (B, C, H, W) and out.dtype == jnp.float32
    assert bool(jnp.all(jnp.isfinite(out)))

    # Sanity check against the pure-JAX f32 reference.  Kernel uses bf16 MXU
    # operands, so tolerances are generous (~1e-2-level expected differences).
    ref = sea_attention_reference(x, params, num_heads=num_heads,
                                  key_dim=key_dim, attn_ratio=attn_ratio)
    max_err = float(jnp.max(jnp.abs(out - ref)))
    mean_err = float(jnp.mean(jnp.abs(out - ref)))
    assert max_err < 1e-1 and mean_err < 1.5e-2, (
        f"kernel vs reference mismatch: max {max_err}, mean {mean_err}")

    print("KERNEL_OK")
</pallas_src>

<mosaic_0001>
module attributes {stable_mosaic.version = 11 : i64} {
  func.func @_sea_attention_kernel(%arg0: i32, %arg1: memref<1x32x256xf32, #tpu.memory_space<vmem>>, %arg2: memref<9x256xf32, #tpu.memory_space<vmem>>, %arg3: memref<256x16xbf16, #tpu.memory_space<vmem>>, %arg4: memref<256x16xbf16, #tpu.memory_space<vmem>>, %arg5: memref<16x256xbf16, #tpu.memory_space<vmem>>, %arg6: memref<16x256xbf16, #tpu.memory_space<vmem>>, %arg7: memref<16x16xf32, #tpu.memory_space<vmem>>, %arg8: memref<16x16xf32, #tpu.memory_space<vmem>>, %arg9: memref<16x16xf32, #tpu.memory_space<vmem>>, %arg10: memref<16x16xf32, #tpu.memory_space<vmem>>, %arg11: memref<64x32xbf16, #tpu.memory_space<vmem>>, %arg12: memref<64x1xf32, #tpu.memory_space<vmem>>, %arg13: memref<64x9xf32, #tpu.memory_space<vmem>>, %arg14: memref<64x1xf32, #tpu.memory_space<vmem>>, %arg15: memref<32x64xbf16, #tpu.memory_space<vmem>>, %arg16: memref<32x1xf32, #tpu.memory_space<vmem>>, %arg17: memref<32x32xbf16, #tpu.memory_space<vmem>>, %arg18: memref<32x1xf32, #tpu.memory_space<vmem>>, %arg19: memref<32x32xbf16, #tpu.memory_space<vmem>>, %arg20: memref<32x1xf32, #tpu.memory_space<vmem>>, %arg21: memref<32x32xbf16, #tpu.memory_space<vmem>>, %arg22: memref<32x1xf32, #tpu.memory_space<vmem>>, %arg23: memref<1x32x256xf32, #tpu.memory_space<vmem>>) attributes {dimension_semantics = [#tpu.dimension_semantics<parallel>], iteration_bounds = array<i64: 2>, scalar_prefetch = 0 : i64, scratch_operands = 0 : i64, tpu.core_type = #tpu.core_type<tc>, window_params = [{transform_indices = @transform_0, window_bounds = array<i64: 1, 32, 256>}, {pipeline_mode = #tpu.pipeline_mode<synchronous>, transform_indices = @transform_1, window_bounds = array<i64: 9, 256>}, {pipeline_mode = #tpu.pipeline_mode<synchronous>, transform_indices = @transform_2, window_bounds = array<i64: 256, 16>}, {pipeline_mode = #tpu.pipeline_mode<synchronous>, transform_indices = @transform_3, window_bounds = array<i64: 256, 16>}, {pipeline_mode = #tpu.pipeline_mode<synchronous>, transform_indices = @transform_4, window_bounds = array<i64: 16, 256>}, {pipeline_mode = #tpu.pipeline_mode<synchronous>, transform_indices = @transform_5, window_bounds = array<i64: 16, 256>}, {pipeline_mode = #tpu.pipeline_mode<synchronous>, transform_indices = @transform_6, window_bounds = array<i64: 16, 16>}, {pipeline_mode = #tpu.pipeline_mode<synchronous>, transform_indices = @transform_7, window_bounds = array<i64: 16, 16>}, {pipeline_mode = #tpu.pipeline_mode<synchronous>, transform_indices = @transform_8, window_bounds = array<i64: 16, 16>}, {pipeline_mode = #tpu.pipeline_mode<synchronous>, transform_indices = @transform_9, window_bounds = array<i64: 16, 16>}, {pipeline_mode = #tpu.pipeline_mode<synchronous>, transform_indices = @transform_10, window_bounds = array<i64: 64, 32>}, {pipeline_mode = #tpu.pipeline_mode<synchronous>, transform_indices = @transform_11, window_bounds = array<i64: 64, 1>}, {pipeline_mode = #tpu.pipeline_mode<synchronous>, transform_indices = @transform_12, window_bounds = array<i64: 64, 9>}, {pipeline_mode = #tpu.pipeline_mode<synchronous>, transform_indices = @transform_13, window_bounds = array<i64: 64, 1>}, {pipeline_mode = #tpu.pipeline_mode<synchronous>, transform_indices = @transform_14, window_bounds = array<i64: 32, 64>}, {pipeline_mode = #tpu.pipeline_mode<synchronous>, transform_indices = @transform_15, window_bounds = array<i64: 32, 1>}, {pipeline_mode = #tpu.pipeline_mode<synchronous>, transform_indices = @transform_16, window_bounds = array<i64: 32, 32>}, {pipeline_mode = #tpu.pipeline_mode<synchronous>, transform_indices = @transform_17, window_bounds = array<i64: 32, 1>}, {pipeline_mode = #tpu.pipeline_mode<synchronous>, transform_indices = @transform_18, window_bounds = array<i64: 32, 32>}, {pipeline_mode = #tpu.pipeline_mode<synchronous>, transform_indices = @transform_19, window_bounds = array<i64: 32, 1>}, {pipeline_mode = #tpu.pipeline_mode<synchronous>, transform_indices = @transform_20, window_bounds = array<i64: 32, 32>}, {pipeline_mode = #tpu.pipeline_mode<synchronous>, transform_indices = @transform_21, window_bounds = array<i64: 32, 1>}, {transform_indices = @transform_22, window_bounds = array<i64: 1, 32, 256>}]} {
    %c0 = arith.constant 0 : index
    %c0_0 = arith.constant 0 : index
    %c0_1 = arith.constant 0 : index
    %0 = vector.load %arg1[%c0, %c0_0, %c0_1] : memref<1x32x256xf32, #tpu.memory_space<vmem>>, vector<1x32x256xf32>
    %1 = vector.shape_cast %0 : vector<1x32x256xf32> to vector<32x256xf32>
    %2 = arith.truncf %1 : vector<32x256xf32> to vector<32x256xbf16>
    %c0_2 = arith.constant 0 : index
    %c0_3 = arith.constant 0 : index
    %3 = vector.load %arg11[%c0_2, %c0_3] : memref<64x32xbf16, #tpu.memory_space<vmem>>, vector<64x32xbf16>
    %cst = arith.constant dense<0.000000e+00> : vector<64x256xf32>
    %4 = tpu.matmul %3, %2, %cst {dimension_numbers = #tpu.dot_dimension_numbers<[1], [0], [0], [1], [0, 0, 1, 1], [], []>} : vector<64x32xbf16>, vector<32x256xbf16>, vector<64x256xf32> -> vector<64x256xf32>
    %c0_4 = arith.constant 0 : index
    %c0_5 = arith.constant 0 : index
    %5 = vector.load %arg12[%c0_4, %c0_5] : memref<64x1xf32, #tpu.memory_space<vmem>>, vector<64x1xf32>
    %6 = vector.broadcast %5 : vector<64x1xf32> to vector<64x256xf32>
    %7 = arith.addf %4, %6 : vector<64x256xf32>
    %c0_6 = arith.constant 0 : index
    %c0_7 = arith.constant 0 : index
    %8 = vector.load %arg13[%c0_6, %c0_7] : memref<64x9xf32, #tpu.memory_space<vmem>>, vector<64x9xf32>
    %9 = vector.extract_strided_slice %8 {offsets = [0, 4], sizes = [64, 1], strides = [1, 1]} : vector<64x9xf32> to vector<64x1xf32>
    %10 = vector.broadcast %9 : vector<64x1xf32> to vector<64x256xf32>
    %11 = arith.mulf %7, %10 : vector<64x256xf32>
    %c0_8 = arith.constant 0 : index
    %c0_9 = arith.constant 0 : index
    %12 = vector.load %arg14[%c0_8, %c0_9] : memref<64x1xf32, #tpu.memory_space<vmem>>, vector<64x1xf32>
    %13 = vector.broadcast %12 : vector<64x1xf32> to vector<64x256xf32>
    %14 = arith.addf %11, %13 : vector<64x256xf32>
    %c17_i32 = arith.constant 17 : i32
    %15 = tpu.dynamic_rotate %7 by %c17_i32 dim 1 : vector<64x256xf32>, i32 -> vector<64x256xf32>
    %c0_10 = arith.constant 0 : index
    %c0_11 = arith.constant 0 : index
    %16 = vector.load %arg2[%c0_10, %c0_11] : memref<9x256xf32, #tpu.memory_space<vmem>>, vector<1x256xf32>
    %17 = vector.broadcast %16 : vector<1x256xf32> to vector<64x256xf32>
    %18 = arith.mulf %15, %17 : vector<64x256xf32>
    %19 = vector.extract_strided_slice %8 {offsets = [0, 0], sizes = [64, 1], strides = [1, 1]} : vector<64x9xf32> to vector<64x1xf32>
    %20 = vector.broadcast %19 : vector<64x1xf32> to vector<64x256xf32>
    %21 = arith.mulf %18, %20 : vector<64x256xf32>
    %22 = arith.addf %14, %21 : vector<64x256xf32>
    %c16_i32 = arith.constant 16 : i32
    %23 = tpu.dynamic_rotate %7 by %c16_i32 dim 1 : vector<64x256xf32>, i32 -> vector<64x256xf32>
    %c1 = arith.constant 1 : index
    %c0_12 = arith.constant 0 : index
    %24 = vector.load %arg2[%c1, %c0_12] : memref<9x256xf32, #tpu.memory_space<vmem>>, vector<1x256xf32>
    %25 = vector.broadcast %24 : vector<1x256xf32> to vector<64x256xf32>
    %26 = arith.mulf %23, %25 : vector<64x256xf32>
    %27 = vector.extract_strided_slice %8 {offsets = [0, 1], sizes = [64, 1], strides = [1, 1]} : vector<64x9xf32> to vector<64x1xf32>
    %28 = vector.broadcast %27 : vector<64x1xf32> to vector<64x256xf32>
    %29 = arith.mulf %26, %28 : vector<64x256xf32>
    %30 = arith.addf %22, %29 : vector<64x256xf32>
    %c15_i32 = arith.constant 15 : i32
    %31 = tpu.dynamic_rotate %7 by %c15_i32 dim 1 : vector<64x256xf32>, i32 -> vector<64x256xf32>
    %c2 = arith.constant 2 : index
    %c0_13 = arith.constant 0 : index
    %32 = vector.load %arg2[%c2, %c0_13] : memref<9x256xf32, #tpu.memory_space<vmem>>, vector<1x256xf32>
    %33 = vector.broadcast %32 : vector<1x256xf32> to vector<64x256xf32>
    %34 = arith.mulf %31, %33 : vector<64x256xf32>
    %35 = vector.extract_strided_slice %8 {offsets = [0, 2], sizes = [64, 1], strides = [1, 1]} : vector<64x9xf32> to vector<64x1xf32>
    %36 = vector.broadcast %35 : vector<64x1xf32> to vector<64x256xf32>
    %37 = arith.mulf %34, %36 : vector<64x256xf32>
    %38 = arith.addf %30, %37 : vector<64x256xf32>
    %c1_i32 = arith.constant 1 : i32
    %39 = tpu.dynamic_rotate %7 by %c1_i32 dim 1 : vector<64x256xf32>, i32 -> vector<64x256xf32>
    %c3 = arith.constant 3 : index
    %c0_14 = arith.constant 0 : index
    %40 = vector.load %arg2[%c3, %c0_14] : memref<9x256xf32, #tpu.memory_space<vmem>>, vector<1x256xf32>
    %41 = vector.broadcast %40 : vector<1x256xf32> to vector<64x256xf32>
    %42 = arith.mulf %39, %41 : vector<64x256xf32>
    %43 = vector.extract_strided_slice %8 {offsets = [0, 3], sizes = [64, 1], strides = [1, 1]} : vector<64x9xf32> to vector<64x1xf32>
    %44 = vector.broadcast %43 : vector<64x1xf32> to vector<64x256xf32>
    %45 = arith.mulf %42, %44 : vector<64x256xf32>
    %46 = arith.addf %38, %45 : vector<64x256xf32>
    %c255_i32 = arith.constant 255 : i32
    %47 = tpu.dynamic_rotate %7 by %c255_i32 dim 1 : vector<64x256xf32>, i32 -> vector<64x256xf32>
    %c5 = arith.constant 5 : index
    %c0_15 = arith.constant 0 : index
    %48 = vector.load %arg2[%c5, %c0_15] : memref<9x256xf32, #tpu.memory_space<vmem>>, vector<1x256xf32>
    %49 = vector.broadcast %48 : vector<1x256xf32> to vector<64x256xf32>
    %50 = arith.mulf %47, %49 : vector<64x256xf32>
    %51 = vector.extract_strided_slice %8 {offsets = [0, 5], sizes = [64, 1], strides = [1, 1]} : vector<64x9xf32> to vector<64x1xf32>
    %52 = vector.broadcast %51 : vector<64x1xf32> to vector<64x256xf32>
    %53 = arith.mulf %50, %52 : vector<64x256xf32>
    %54 = arith.addf %46, %53 : vector<64x256xf32>
    %c241_i32 = arith.constant 241 : i32
    %55 = tpu.dynamic_rotate %7 by %c241_i32 dim 1 : vector<64x256xf32>, i32 -> vector<64x256xf32>
    %c6 = arith.constant 6 : index
    %c0_16 = arith.constant 0 : index
    %56 = vector.load %arg2[%c6, %c0_16] : memref<9x256xf32, #tpu.memory_space<vmem>>, vector<1x256xf32>
    %57 = vector.broadcast %56 : vector<1x256xf32> to vector<64x256xf32>
    %58 = arith.mulf %55, %57 : vector<64x256xf32>
    %59 = vector.extract_strided_slice %8 {offsets = [0, 6], sizes = [64, 1], strides = [1, 1]} : vector<64x9xf32> to vector<64x1xf32>
    %60 = vector.broadcast %59 : vector<64x1xf32> to vector<64x256xf32>
    %61 = arith.mulf %58, %60 : vector<64x256xf32>
    %62 = arith.addf %54, %61 : vector<64x256xf32>
    %c240_i32 = arith.constant 240 : i32
    %63 = tpu.dynamic_rotate %7 by %c240_i32 dim 1 : vector<64x256xf32>, i32 -> vector<64x256xf32>
    %c7 = arith.constant 7 : index
    %c0_17 = arith.constant 0 : index
    %64 = vector.load %arg2[%c7, %c0_17] : memref<9x256xf32, #tpu.memory_space<vmem>>, vector<1x256xf32>
    %65 = vector.broadcast %64 : vector<1x256xf32> to vector<64x256xf32>
    %66 = arith.mulf %63, %65 : vector<64x256xf32>
    %67 = vector.extract_strided_slice %8 {offsets = [0, 7], sizes = [64, 1], strides = [1, 1]} : vector<64x9xf32> to vector<64x1xf32>
    %68 = vector.broadcast %67 : vector<64x1xf32> to vector<64x256xf32>
    %69 = arith.mulf %66, %68 : vector<64x256xf32>
    %70 = arith.addf %62, %69 : vector<64x256xf32>
    %c239_i32 = arith.constant 239 : i32
    %71 = tpu.dynamic_rotate %7 by %c239_i32 dim 1 : vector<64x256xf32>, i32 -> vector<64x256xf32>
    %c8 = arith.constant 8 : index
    %c0_18 = arith.constant 0 : index
    %72 = vector.load %arg2[%c8, %c0_18] : memref<9x256xf32, #tpu.memory_space<vmem>>, vector<1x256xf32>
    %73 = vector.broadcast %72 : vector<1x256xf32> to vector<64x256xf32>
    %74 = arith.mulf %71, %73 : vector<64x256xf32>
    %75 = vector.extract_strided_slice %8 {offsets = [0, 8], sizes = [64, 1], strides = [1, 1]} : vector<64x9xf32> to vector<64x1xf32>
    %76 = vector.broadcast %75 : vector<64x1xf32> to vector<64x256xf32>
    %77 = arith.mulf %74, %76 : vector<64x256xf32>
    %78 = arith.addf %70, %77 : vector<64x256xf32>
    %cst_19 = arith.constant 0.000000e+00 : f32
    %79 = vector.broadcast %cst_19 : f32 to vector<64x256xf32>
    %80 = arith.maximumf %78, %79 : vector<64x256xf32>
    %81 = arith.truncf %80 : vector<64x256xf32> to vector<64x256xbf16>
    %c0_20 = arith.constant 0 : index
    %c0_21 = arith.constant 0 : index
    %82 = vector.load %arg15[%c0_20, %c0_21] : memref<32x64xbf16, #tpu.memory_space<vmem>>, vector<32x64xbf16>
    %cst_22 = arith.constant dense<0.000000e+00> : vector<32x256xf32>
    %83 = tpu.matmul %82, %81, %cst_22 {dimension_numbers = #tpu.dot_dimension_numbers<[1], [0], [0], [1], [0, 0, 1, 1], [], []>} : vector<32x64xbf16>, vector<64x256xbf16>, vector<32x256xf32> -> vector<32x256xf32>
    %c0_23 = arith.constant 0 : index
    %c0_24 = arith.constant 0 : index
    %84 = vector.load %arg16[%c0_23, %c0_24] : memref<32x1xf32, #tpu.memory_space<vmem>>, vector<32x1xf32>
    %85 = vector.broadcast %84 : vector<32x1xf32> to vector<32x256xf32>
    %86 = arith.addf %83, %85 : vector<32x256xf32>
    %87 = arith.truncf %7 : vector<64x256xf32> to vector<64x256xbf16>
    %c0_25 = arith.constant 0 : index
    %c0_26 = arith.constant 0 : index
    %88 = vector.load %arg3[%c0_25, %c0_26] : memref<256x16xbf16, #tpu.memory_space<vmem>>, vector<256x16xbf16>
    %cst_27 = arith.constant dense<0.000000e+00> : vector<64x16xf32>
    %89 = tpu.matmul %87, %88, %cst_27 {dimension_numbers = #tpu.dot_dimension_numbers<[1], [0], [0], [1], [0, 0, 1, 1], [], []>} : vector<64x256xbf16>, vector<256x16xbf16>, vector<64x16xf32> -> vector<64x16xf32>
    %c0_28 = arith.constant 0 : index
    %c0_29 = arith.constant 0 : index
    %90 = vector.load %arg4[%c0_28, %c0_29] : memref<256x16xbf16, #tpu.memory_space<vmem>>, vector<256x16xbf16>
    %cst_30 = arith.constant dense<0.000000e+00> : vector<64x16xf32>
    %91 = tpu.matmul %87, %90, %cst_30 {dimension_numbers = #tpu.dot_dimension_numbers<[1], [0], [0], [1], [0, 0, 1, 1], [], []>} : vector<64x256xbf16>, vector<256x16xbf16>, vector<64x16xf32> -> vector<64x16xf32>
    %92 = vector.extract_strided_slice %89 {offsets = [0, 0], sizes = [16, 16], strides = [1, 1]} : vector<64x16xf32> to vector<16x16xf32>
    %c0_31 = arith.constant 0 : index
    %c0_32 = arith.constant 0 : index
    %93 = vector.load %arg7[%c0_31, %c0_32] : memref<16x16xf32, #tpu.memory_space<vmem>>, vector<16x16xf32>
    %94 = arith.addf %92, %93 : vector<16x16xf32>
    %95 = vector.extract_strided_slice %89 {offsets = [16, 0], sizes = [16, 16], strides = [1, 1]} : vector<64x16xf32> to vector<16x16xf32>
    %c0_33 = arith.constant 0 : index
    %c0_34 = arith.constant 0 : index
    %96 = vector.load %arg8[%c0_33, %c0_34] : memref<16x16xf32, #tpu.memory_space<vmem>>, vector<16x16xf32>
    %97 = arith.addf %95, %96 : vector<16x16xf32>
    %98 = vector.extract_strided_slice %89 {offsets = [32, 0], sizes = [32, 16], strides = [1, 1]} : vector<64x16xf32> to vector<32x16xf32>
    %99 = vector.extract_strided_slice %91 {offsets = [0, 0], sizes = [16, 16], strides = [1, 1]} : vector<64x16xf32> to vector<16x16xf32>
    %c0_35 = arith.constant 0 : index
    %c0_36 = arith.constant 0 : index
    %100 = vector.load %arg9[%c0_35, %c0_36] : memref<16x16xf32, #tpu.memory_space<vmem>>, vector<16x16xf32>
    %101 = arith.addf %99, %100 : vector<16x16xf32>
    %102 = vector.extract_strided_slice %91 {offsets = [16, 0], sizes = [16, 16], strides = [1, 1]} : vector<64x16xf32> to vector<16x16xf32>
    %c0_37 = arith.constant 0 : index
    %c0_38 = arith.constant 0 : index
    %103 = vector.load %arg10[%c0_37, %c0_38] : memref<16x16xf32, #tpu.memory_space<vmem>>, vector<16x16xf32>
    %104 = arith.addf %102, %103 : vector<16x16xf32>
    %105 = vector.extract_strided_slice %91 {offsets = [32, 0], sizes = [32, 16], strides = [1, 1]} : vector<64x16xf32> to vector<32x16xf32>
    %c0_39 = arith.constant 0 : index
    %c0_40 = arith.constant 0 : index
    %106 = vector.load %arg17[%c0_39, %c0_40] : memref<32x32xbf16, #tpu.memory_space<vmem>>, vector<32x32xbf16>
    %c0_41 = arith.constant 0 : index
    %c0_42 = arith.constant 0 : index
    %107 = vector.load %arg18[%c0_41, %c0_42] : memref<32x1xf32, #tpu.memory_space<vmem>>, vector<32x1xf32>
    %108 = arith.truncf %94 : vector<16x16xf32> to vector<16x16xbf16>
    %109 = arith.truncf %97 : vector<16x16xf32> to vector<16x16xbf16>
    %110 = vector.extract_strided_slice %108 {offsets = [0, 0], sizes = [8, 16], strides = [1, 1]} : vector<16x16xbf16> to vector<8x16xbf16>
    %111 = vector.extract_strided_slice %109 {offsets = [0, 0], sizes = [8, 16], strides = [1, 1]} : vector<16x16xbf16> to vector<8x16xbf16>
    %cst_43 = arith.constant dense<0.000000e+00> : vector<16x16xf32>
    %112 = tpu.matmul %110, %111, %cst_43 {dimension_numbers = #tpu.dot_dimension_numbers<[0], [0], [1], [1], [0, 1, 1, 1], [], []>} : vector<8x16xbf16>, vector<8x16xbf16>, vector<16x16xf32> -> vector<16x16xf32>
    %113 = vector.extract_strided_slice %108 {offsets = [8, 0], sizes = [8, 16], strides = [1, 1]} : vector<16x16xbf16> to vector<8x16xbf16>
    %114 = vector.extract_strided_slice %109 {offsets = [8, 0], sizes = [8, 16], strides = [1, 1]} : vector<16x16xbf16> to vector<8x16xbf16>
    %cst_44 = arith.constant dense<0.000000e+00> : vector<16x16xf32>
    %115 = tpu.matmul %113, %114, %cst_44 {dimension_numbers = #tpu.dot_dimension_numbers<[0], [0], [1], [1], [0, 1, 1, 1], [], []>} : vector<8x16xbf16>, vector<8x16xbf16>, vector<16x16xf32> -> vector<16x16xf32>
    %116 = tpu.concatenate %112, %115 in 0 : vector<16x16xf32>, vector<16x16xf32> -> vector<32x16xf32>
    %cst_45 = arith.constant 0.353553385 : f32
    %117 = vector.broadcast %cst_45 : f32 to vector<32x16xf32>
    %118 = arith.mulf %116, %117 : vector<32x16xf32>
    %cst_46 = arith.constant dense<0xFF800000> : vector<32xf32>
    %119 = vector.multi_reduction <maximumf>, %118, %cst_46 [1] : vector<32x16xf32> to vector<32xf32>
    %120 = vector.shape_cast %119 : vector<32xf32> to vector<32x1xf32>
    %121 = vector.broadcast %120 : vector<32x1xf32> to vector<32x16xf32>
    %122 = arith.subf %118, %121 : vector<32x16xf32>
    %123 = math.exp %122 : vector<32x16xf32>
    %cst_47 = arith.constant dense<0.000000e+00> : vector<32xf32>
    %124 = vector.multi_reduction <add>, %123, %cst_47 [1] : vector<32x16xf32> to vector<32xf32>
    %125 = vector.shape_cast %124 : vector<32xf32> to vector<32x1xf32>
    %126 = vector.broadcast %125 : vector<32x1xf32> to vector<32x16xf32>
    %127 = arith.divf %123, %126 : vector<32x16xf32>
    %128 = arith.truncf %127 : vector<32x16xf32> to vector<32x16xbf16>
    %129 = arith.truncf %98 : vector<32x16xf32> to vector<32x16xbf16>
    %130 = vector.extract_strided_slice %128 {offsets = [0, 0], sizes = [16, 16], strides = [1, 1]} : vector<32x16xbf16> to vector<16x16xbf16>
    %131 = vector.extract_strided_slice %129 {offsets = [0, 0], sizes = [16, 16], strides = [1, 1]} : vector<32x16xbf16> to vector<16x16xbf16>
    %cst_48 = arith.constant dense<0.000000e+00> : vector<16x16xf32>
    %132 = tpu.matmul %131, %130, %cst_48 {dimension_numbers = #tpu.dot_dimension_numbers<[1], [1], [0], [0], [0, 0, 1, 0], [], []>} : vector<16x16xbf16>, vector<16x16xbf16>, vector<16x16xf32> -> vector<16x16xf32>
    %133 = vector.extract_strided_slice %128 {offsets = [16, 0], sizes = [16, 16], strides = [1, 1]} : vector<32x16xbf16> to vector<16x16xbf16>
    %134 = vector.extract_strided_slice %129 {offsets = [16, 0], sizes = [16, 16], strides = [1, 1]} : vector<32x16xbf16> to vector<16x16xbf16>
    %cst_49 = arith.constant dense<0.000000e+00> : vector<16x16xf32>
    %135 = tpu.matmul %134, %133, %cst_49 {dimension_numbers = #tpu.dot_dimension_numbers<[1], [1], [0], [0], [0, 0, 1, 0], [], []>} : vector<16x16xbf16>, vector<16x16xbf16>, vector<16x16xf32> -> vector<16x16xf32>
    %136 = tpu.concatenate %132, %135 in 0 : vector<16x16xf32>, vector<16x16xf32> -> vector<32x16xf32>
    %cst_50 = arith.constant 0.000000e+00 : f32
    %137 = vector.broadcast %cst_50 : f32 to vector<32x16xf32>
    %138 = arith.maximumf %136, %137 : vector<32x16xf32>
    %139 = arith.truncf %138 : vector<32x16xf32> to vector<32x16xbf16>
    %cst_51 = arith.constant dense<0.000000e+00> : vector<32x16xf32>
    %140 = tpu.matmul %106, %139, %cst_51 {dimension_numbers = #tpu.dot_dimension_numbers<[1], [0], [0], [1], [0, 0, 1, 1], [], []>} : vector<32x32xbf16>, vector<32x16xbf16>, vector<32x16xf32> -> vector<32x16xf32>
    %141 = vector.broadcast %107 : vector<32x1xf32> to vector<32x16xf32>
    %142 = arith.addf %140, %141 : vector<32x16xf32>
    %c0_52 = arith.constant 0 : index
    %c0_53 = arith.constant 0 : index
    %143 = vector.load %arg19[%c0_52, %c0_53] : memref<32x32xbf16, #tpu.memory_space<vmem>>, vector<32x32xbf16>
    %c0_54 = arith.constant 0 : index
    %c0_55 = arith.constant 0 : index
    %144 = vector.load %arg20[%c0_54, %c0_55] : memref<32x1xf32, #tpu.memory_space<vmem>>, vector<32x1xf32>
    %145 = arith.truncf %101 : vector<16x16xf32> to vector<16x16xbf16>
    %146 = arith.truncf %104 : vector<16x16xf32> to vector<16x16xbf16>
    %147 = vector.extract_strided_slice %145 {offsets = [0, 0], sizes = [8, 16], strides = [1, 1]} : vector<16x16xbf16> to vector<8x16xbf16>
    %148 = vector.extract_strided_slice %146 {offsets = [0, 0], sizes = [8, 16], strides = [1, 1]} : vector<16x16xbf16> to vector<8x16xbf16>
    %cst_56 = arith.constant dense<0.000000e+00> : vector<16x16xf32>
    %149 = tpu.matmul %147, %148, %cst_56 {dimension_numbers = #tpu.dot_dimension_numbers<[0], [0], [1], [1], [0, 1, 1, 1], [], []>} : vector<8x16xbf16>, vector<8x16xbf16>, vector<16x16xf32> -> vector<16x16xf32>
    %150 = vector.extract_strided_slice %145 {offsets = [8, 0], sizes = [8, 16], strides = [1, 1]} : vector<16x16xbf16> to vector<8x16xbf16>
    %151 = vector.extract_strided_slice %146 {offsets = [8, 0], sizes = [8, 16], strides = [1, 1]} : vector<16x16xbf16> to vector<8x16xbf16>
    %cst_57 = arith.constant dense<0.000000e+00> : vector<16x16xf32>
    %152 = tpu.matmul %150, %151, %cst_57 {dimension_numbers = #tpu.dot_dimension_numbers<[0], [0], [1], [1], [0, 1, 1, 1], [], []>} : vector<8x16xbf16>, vector<8x16xbf16>, vector<16x16xf32> -> vector<16x16xf32>
    %153 = tpu.concatenate %149, %152 in 0 : vector<16x16xf32>, vector<16x16xf32> -> vector<32x16xf32>
    %cst_58 = arith.constant 0.353553385 : f32
    %154 = vector.broadcast %cst_58 : f32 to vector<32x16xf32>
    %155 = arith.mulf %153, %154 : vector<32x16xf32>
    %cst_59 = arith.constant dense<0xFF800000> : vector<32xf32>
    %156 = vector.multi_reduction <maximumf>, %155, %cst_59 [1] : vector<32x16xf32> to vector<32xf32>
    %157 = vector.shape_cast %156 : vector<32xf32> to vector<32x1xf32>
    %158 = vector.broadcast %157 : vector<32x1xf32> to vector<32x16xf32>
    %159 = arith.subf %155, %158 : vector<32x16xf32>
    %160 = math.exp %159 : vector<32x16xf32>
    %cst_60 = arith.constant dense<0.000000e+00> : vector<32xf32>
    %161 = vector.multi_reduction <add>, %160, %cst_60 [1] : vector<32x16xf32> to vector<32xf32>
    %162 = vector.shape_cast %161 : vector<32xf32> to vector<32x1xf32>
    %163 = vector.broadcast %162 : vector<32x1xf32> to vector<32x16xf32>
    %164 = arith.divf %160, %163 : vector<32x16xf32>
    %165 = arith.truncf %164 : vector<32x16xf32> to vector<32x16xbf16>
    %166 = arith.truncf %105 : vector<32x16xf32> to vector<32x16xbf16>
    %167 = vector.extract_strided_slice %165 {offsets = [0, 0], sizes = [16, 16], strides = [1, 1]} : vector<32x16xbf16> to vector<16x16xbf16>
    %168 = vector.extract_strided_slice %166 {offsets = [0, 0], sizes = [16, 16], strides = [1, 1]} : vector<32x16xbf16> to vector<16x16xbf16>
    %cst_61 = arith.constant dense<0.000000e+00> : vector<16x16xf32>
    %169 = tpu.matmul %168, %167, %cst_61 {dimension_numbers = #tpu.dot_dimension_numbers<[1], [1], [0], [0], [0, 0, 1, 0], [], []>} : vector<16x16xbf16>, vector<16x16xbf16>, vector<16x16xf32> -> vector<16x16xf32>
    %170 = vector.extract_strided_slice %165 {offsets = [16, 0], sizes = [16, 16], strides = [1, 1]} : vector<32x16xbf16> to vector<16x16xbf16>
    %171 = vector.extract_strided_slice %166 {offsets = [16, 0], sizes = [16, 16], strides = [1, 1]} : vector<32x16xbf16> to vector<16x16xbf16>
    %cst_62 = arith.constant dense<0.000000e+00> : vector<16x16xf32>
    %172 = tpu.matmul %171, %170, %cst_62 {dimension_numbers = #tpu.dot_dimension_numbers<[1], [1], [0], [0], [0, 0, 1, 0], [], []>} : vector<16x16xbf16>, vector<16x16xbf16>, vector<16x16xf32> -> vector<16x16xf32>
    %173 = tpu.concatenate %169, %172 in 0 : vector<16x16xf32>, vector<16x16xf32> -> vector<32x16xf32>
    %cst_63 = arith.constant 0.000000e+00 : f32
    %174 = vector.broadcast %cst_63 : f32 to vector<32x16xf32>
    %175 = arith.maximumf %173, %174 : vector<32x16xf32>
    %176 = arith.truncf %175 : vector<32x16xf32> to vector<32x16xbf16>
    %cst_64 = arith.constant dense<0.000000e+00> : vector<32x16xf32>
    %177 = tpu.matmul %143, %176, %cst_64 {dimension_numbers = #tpu.dot_dimension_numbers<[1], [0], [0], [1], [0, 0, 1, 1], [], []>} : vector<32x32xbf16>, vector<32x16xbf16>, vector<32x16xf32> -> vector<32x16xf32>
    %178 = vector.broadcast %144 : vector<32x1xf32> to vector<32x16xf32>
    %179 = arith.addf %177, %178 : vector<32x16xf32>
    %180 = vector.extract_strided_slice %7 {offsets = [32, 0], sizes = [32, 256], strides = [1, 1]} : vector<64x256xf32> to vector<32x256xf32>
    %181 = arith.truncf %142 : vector<32x16xf32> to vector<32x16xbf16>
    %c0_65 = arith.constant 0 : index
    %c0_66 = arith.constant 0 : index
    %182 = vector.load %arg5[%c0_65, %c0_66] : memref<16x256xbf16, #tpu.memory_space<vmem>>, vector<16x256xbf16>
    %cst_67 = arith.constant dense<0.000000e+00> : vector<32x256xf32>
    %183 = tpu.matmul %181, %182, %cst_67 {dimension_numbers = #tpu.dot_dimension_numbers<[1], [0], [0], [1], [0, 0, 1, 1], [], []>} : vector<32x16xbf16>, vector<16x256xbf16>, vector<32x256xf32> -> vector<32x256xf32>
    %184 = arith.truncf %179 : vector<32x16xf32> to vector<32x16xbf16>
    %c0_68 = arith.constant 0 : index
    %c0_69 = arith.constant 0 : index
    %185 = vector.load %arg6[%c0_68, %c0_69] : memref<16x256xbf16, #tpu.memory_space<vmem>>, vector<16x256xbf16>
    %cst_70 = arith.constant dense<0.000000e+00> : vector<32x256xf32>
    %186 = tpu.matmul %184, %185, %cst_70 {dimension_numbers = #tpu.dot_dimension_numbers<[1], [0], [0], [1], [0, 0, 1, 1], [], []>} : vector<32x16xbf16>, vector<16x256xbf16>, vector<32x256xf32> -> vector<32x256xf32>
    %187 = arith.addf %180, %183 : vector<32x256xf32>
    %188 = arith.addf %187, %186 : vector<32x256xf32>
    %cst_71 = arith.constant 0.000000e+00 : f32
    %189 = vector.broadcast %cst_71 : f32 to vector<32x256xf32>
    %190 = arith.maximumf %188, %189 : vector<32x256xf32>
    %191 = arith.truncf %190 : vector<32x256xf32> to vector<32x256xbf16>
    %c0_72 = arith.constant 0 : index
    %c0_73 = arith.constant 0 : index
    %192 = vector.load %arg21[%c0_72, %c0_73] : memref<32x32xbf16, #tpu.memory_space<vmem>>, vector<32x32xbf16>
    %cst_74 = arith.constant dense<0.000000e+00> : vector<32x256xf32>
    %193 = tpu.matmul %192, %191, %cst_74 {dimension_numbers = #tpu.dot_dimension_numbers<[1], [0], [0], [1], [0, 0, 1, 1], [], []>} : vector<32x32xbf16>, vector<32x256xbf16>, vector<32x256xf32> -> vector<32x256xf32>
    %c0_75 = arith.constant 0 : index
    %c0_76 = arith.constant 0 : index
    %194 = vector.load %arg22[%c0_75, %c0_76] : memref<32x1xf32, #tpu.memory_space<vmem>>, vector<32x1xf32>
    %195 = vector.broadcast %194 : vector<32x1xf32> to vector<32x256xf32>
    %196 = arith.addf %193, %195 : vector<32x256xf32>
    %197 = arith.negf %196 : vector<32x256xf32>
    %198 = math.exp %197 : vector<32x256xf32>
    %cst_77 = arith.constant 1.000000e+00 : f32
    %199 = vector.broadcast %cst_77 : f32 to vector<32x256xf32>
    %200 = arith.addf %199, %198 : vector<32x256xf32>
    %201 = arith.divf %199, %200 : vector<32x256xf32>
    %202 = arith.mulf %201, %86 : vector<32x256xf32>
    %c0_78 = arith.constant 0 : index
    %c0_79 = arith.constant 0 : index
    %c0_80 = arith.constant 0 : index
    %203 = vector.load %arg23[%c0_78, %c0_79, %c0_80] : memref<1x32x256xf32, #tpu.memory_space<vmem>>, vector<1x32x256xf32>
    %204 = vector.shape_cast %203 : vector<1x32x256xf32> to vector<32x256xf32>
    %205 = vector.shape_cast %202 : vector<32x256xf32> to vector<1x32x256xf32>
    tpu.vector_store %arg23[%c0_78, %c0_79, %c0_80], %205 {strides = array<i32>} : memref<1x32x256xf32, #tpu.memory_space<vmem>>, vector<1x32x256xf32>,
    return
  }
  func.func @transform_0(%arg0: i32) -> (i32, i32, i32) {
    %c0_i32 = arith.constant 0 : i32
    %c0_i32_0 = arith.constant 0 : i32
    %c0_i32_1 = arith.constant 0 : i32
    return %arg0, %c0_i32, %c0_i32_0 : i32, i32, i32
  }
  func.func @transform_1(%arg0: i32) -> (i32, i32) {
    %c0_i32 = arith.constant 0 : i32
    %c0_i32_0 = arith.constant 0 : i32
    %c0_i32_1 = arith.constant 0 : i32
    return %c0_i32, %c0_i32_0 : i32, i32
  }
  func.func @transform_2(%arg0: i32) -> (i32, i32) {
    %c0_i32 = arith.constant 0 : i32
    %c0_i32_0 = arith.constant 0 : i32
    %c0_i32_1 = arith.constant 0 : i32
    return %c0_i32, %c0_i32_0 : i32, i32
  }
  func.func @transform_3(%arg0: i32) -> (i32, i32) {
    %c0_i32 = arith.constant 0 : i32
    %c0_i32_0 = arith.constant 0 : i32
    %c0_i32_1 = arith.constant 0 : i32
    return %c0_i32, %c0_i32_0 : i32, i32
  }
  func.func @transform_4(%arg0: i32) -> (i32, i32) {
    %c0_i32 = arith.constant 0 : i32
    %c0_i32_0 = arith.constant 0 : i32
    %c0_i32_1 = arith.constant 0 : i32
    return %c0_i32, %c0_i32_0 : i32, i32
  }
  func.func @transform_5(%arg0: i32) -> (i32, i32) {
    %c0_i32 = arith.constant 0 : i32
    %c0_i32_0 = arith.constant 0 : i32
    %c0_i32_1 = arith.constant 0 : i32
    return %c0_i32, %c0_i32_0 : i32, i32
  }
  func.func @transform_6(%arg0: i32) -> (i32, i32) {
    %c0_i32 = arith.constant 0 : i32
    %c0_i32_0 = arith.constant 0 : i32
    %c0_i32_1 = arith.constant 0 : i32
    return %c0_i32, %c0_i32_0 : i32, i32
  }
  func.func @transform_7(%arg0: i32) -> (i32, i32) {
    %c0_i32 = arith.constant 0 : i32
    %c0_i32_0 = arith.constant 0 : i32
    %c0_i32_1 = arith.constant 0 : i32
    return %c0_i32, %c0_i32_0 : i32, i32
  }
  func.func @transform_8(%arg0: i32) -> (i32, i32) {
    %c0_i32 = arith.constant 0 : i32
    %c0_i32_0 = arith.constant 0 : i32
    %c0_i32_1 = arith.constant 0 : i32
    return %c0_i32, %c0_i32_0 : i32, i32
  }
  func.func @transform_9(%arg0: i32) -> (i32, i32) {
    %c0_i32 = arith.constant 0 : i32
    %c0_i32_0 = arith.constant 0 : i32
    %c0_i32_1 = arith.constant 0 : i32
    return %c0_i32, %c0_i32_0 : i32, i32
  }
  func.func @transform_10(%arg0: i32) -> (i32, i32) {
    %c0_i32 = arith.constant 0 : i32
    %c0_i32_0 = arith.constant 0 : i32
    %c0_i32_1 = arith.constant 0 : i32
    return %c0_i32, %c0_i32_0 : i32, i32
  }
  func.func @transform_11(%arg0: i32) -> (i32, i32) {
    %c0_i32 = arith.constant 0 : i32
    %c0_i32_0 = arith.constant 0 : i32
    %c0_i32_1 = arith.constant 0 : i32
    return %c0_i32, %c0_i32_0 : i32, i32
  }
  func.func @transform_12(%arg0: i32) -> (i32, i32) {
    %c0_i32 = arith.constant 0 : i32
    %c0_i32_0 = arith.constant 0 : i32
    %c0_i32_1 = arith.constant 0 : i32
    return %c0_i32, %c0_i32_0 : i32, i32
  }
  func.func @transform_13(%arg0: i32) -> (i32, i32) {
    %c0_i32 = arith.constant 0 : i32
    %c0_i32_0 = arith.constant 0 : i32
    %c0_i32_1 = arith.constant 0 : i32
    return %c0_i32, %c0_i32_0 : i32, i32
  }
  func.func @transform_14(%arg0: i32) -> (i32, i32) {
    %c0_i32 = arith.constant 0 : i32
    %c0_i32_0 = arith.constant 0 : i32
    %c0_i32_1 = arith.constant 0 : i32
    return %c0_i32, %c0_i32_0 : i32, i32
  }
  func.func @transform_15(%arg0: i32) -> (i32, i32) {
    %c0_i32 = arith.constant 0 : i32
    %c0_i32_0 = arith.constant 0 : i32
    %c0_i32_1 = arith.constant 0 : i32
    return %c0_i32, %c0_i32_0 : i32, i32
  }
  func.func @transform_16(%arg0: i32) -> (i32, i32) {
    %c0_i32 = arith.constant 0 : i32
    %c0_i32_0 = arith.constant 0 : i32
    %c0_i32_1 = arith.constant 0 : i32
    return %c0_i32, %c0_i32_0 : i32, i32
  }
  func.func @transform_17(%arg0: i32) -> (i32, i32) {
    %c0_i32 = arith.constant 0 : i32
    %c0_i32_0 = arith.constant 0 : i32
    %c0_i32_1 = arith.constant 0 : i32
    return %c0_i32, %c0_i32_0 : i32, i32
  }
  func.func @transform_18(%arg0: i32) -> (i32, i32) {
    %c0_i32 = arith.constant 0 : i32
    %c0_i32_0 = arith.constant 0 : i32
    %c0_i32_1 = arith.constant 0 : i32
    return %c0_i32, %c0_i32_0 : i32, i32
  }
  func.func @transform_19(%arg0: i32) -> (i32, i32) {
    %c0_i32 = arith.constant 0 : i32
    %c0_i32_0 = arith.constant 0 : i32
    %c0_i32_1 = arith.constant 0 : i32
    return %c0_i32, %c0_i32_0 : i32, i32
  }
  func.func @transform_20(%arg0: i32) -> (i32, i32) {
    %c0_i32 = arith.constant 0 : i32
    %c0_i32_0 = arith.constant 0 : i32
    %c0_i32_1 = arith.constant 0 : i32
    return %c0_i32, %c0_i32_0 : i32, i32
  }
  func.func @transform_21(%arg0: i32) -> (i32, i32) {
    %c0_i32 = arith.constant 0 : i32
    %c0_i32_0 = arith.constant 0 : i32
    %c0_i32_1 = arith.constant 0 : i32
    return %c0_i32, %c0_i32_0 : i32, i32
  }
  func.func @transform_22(%arg0: i32) -> (i32, i32, i32) {
    %c0_i32 = arith.constant 0 : i32
    %c0_i32_0 = arith.constant 0 : i32
    %c0_i32_1 = arith.constant 0 : i32
    return %arg0, %c0_i32, %c0_i32_0 : i32, i32, i32
  }
}

</mosaic_0001>

<bundles_post_ra>
// kernel: sea_attention_forward.1
= control target key start
LH: loop header
LB: loop body
LE: loop exit
PB: predicated region body
PF: predicated region fallthrough
CT: control target
= control target key end

     0   :  { %s6846_s0 = inlined_call_operand.vmem [shape: f32[2,32,256], index: 0, kind: input, shape index: {}]   ;;  %s6847_s1 = inlined_call_operand.vmem [shape: f32[9,256], index: 1, kind: input, shape index: {}]   ;;  %s6848_s2 = inlined_call_operand.vmem [shape: bf16[256,16], index: 2, kind: input, shape index: {}]   ;;  %s6849_s3 = inlined_call_operand.vmem [shape: bf16[256,16], index: 3, kind: input, shape index: {}]   ;;  %s6850_s4 = inlined_call_operand.vmem [shape: bf16[16,256], index: 4, kind: input, shape index: {}]   ;;  %s6851_s5 = inlined_call_operand.vmem [shape: bf16[16,256], index: 5, kind: input, shape index: {}]   ;;  %s6852_s6 = inlined_call_operand.vmem [shape: f32[16,16], index: 6, kind: input, shape index: {}]   ;;  %s6853_s7 = inlined_call_operand.vmem [shape: f32[16,16], index: 7, kind: input, shape index: {}]   ;;  %s6854_s8 = inlined_call_operand.vmem [shape: f32[16,16], index: 8, kind: input, shape index: {}]   ;;  %s6855_s9 = inlined_call_operand.vmem [shape: f32[16,16], index: 9, kind: input, shape index: {}]   ;;  %s6856_s10 = inlined_call_operand.vmem [shape: bf16[64,32], index: 10, kind: input, shape index: {}]   ;;  %s6857_s11 = inlined_call_operand.vmem [shape: f32[64,1], index: 11, kind: input, shape index: {}]   ;;  %s6858_s12 = inlined_call_operand.vmem [shape: f32[64,9], index: 12, kind: input, shape index: {}]   ;;  %s6859_s13 = inlined_call_operand.vmem [shape: f32[64,1], index: 13, kind: input, shape index: {}]   ;;  %s6860_s14 = inlined_call_operand.vmem [shape: bf16[32,64], index: 14, kind: input, shape index: {}]   ;;  %s6861_s15 = inlined_call_operand.vmem [shape: f32[32,1], index: 15, kind: input, shape index: {}]   ;;  %s6862_s16 = inlined_call_operand.vmem [shape: bf16[32,32], index: 16, kind: input, shape index: {}]   ;;  %s6863_s17 = inlined_call_operand.vmem [shape: f32[32,1], index: 17, kind: input, shape index: {}]   ;;  %s6864_s18 = inlined_call_operand.vmem [shape: bf16[32,32], index: 18, kind: input, shape index: {}]   ;;  %s6865_s19 = inlined_call_operand.vmem [shape: f32[32,1], index: 19, kind: input, shape index: {}]   ;;  %s6866_s20 = inlined_call_operand.vmem [shape: bf16[32,32], index: 20, kind: input, shape index: {}]   ;;  %s6867_s21 = inlined_call_operand.vmem [shape: f32[32,1], index: 21, kind: input, shape index: {}]   ;;  %s6868_s22 = inlined_call_operand.vmem [shape: f32[2,32,256], index: 22, kind: output, shape index: {}]  }
   0x1   :  { %7050 = sst [smem:[#allocation131_spill]] %s6846_s0 }
   0x2   :  { %7051 = sst [smem:[#allocation132_spill]] %s6847_s1 }
   0x3   :  { %7052 = sst [smem:[#allocation133_spill]] %s6848_s2 }
   0x4   :  { %7053 = sst [smem:[#allocation134_spill]] %s6849_s3  ;;  %s4425_s3 = smov 0  }
   0x5   :  { %7054 = sst [smem:[#allocation135_spill]] %s6850_s4 }
   0x6   :  { %7055 = sst [smem:[#allocation136_spill]] %s6851_s5 }
   0x7   :  { %7056 = sst [smem:[#allocation137_spill]] %s6852_s6 }
   0x8 LB: > { %s3805_s28 = sadd.s32 4294967295, %s4289_s3   ;;  %p3809_p0 = scmp.ge.s32.totalorder %s4289_s3, 1  ;;  %s4289_s3 = sphi %s4425_s3, %s32_s3  }
   0x9   : > { %p612_p1 = scmp.lt.s32.totalorder %s4289_s3, 3 }
   0xb   : > { %p613_p2 = pnand %p3809_p0, %p612_p1 }
   0xd   : > { %616 = sbr.rel (%p613_p2) target bundleno = 2830 (0xb0e), region = 108 }
  0x14   : > { %p674_p3 = scmp.lt.s32.totalorder %s3805_s28, 1  ;;  %v6875_v0 = vmov 0   ;;  %v707_v1 = vld [vmem:[%s6857_s11 + $0x10] sm:$0xff]  ;;  %v708_v2 = vld [vmem:[%s6857_s11 + $0x18] sm:$0xff]  ;;  %s7057_s24 = sld [smem:[#allocation131_spill]]  ;;  %v710_v3 = vld [vmem:[%s6857_s11 + $0x28] sm:$0xff] }
  0x15   : > { %818 = vmatprep.mubr.bf16.mxu0 %v6875_v0  ;;  %4117 = vset.pattern.permute.xlu1 %v6875_v0  ;;  %v705_v16 = vld [vmem:[%s6857_s11] sm:$0xff]  ;;  %v712_v17 = vld [vmem:[%s6857_s11 + $0x38] sm:$0xff]  ;;  %v706_v18 = vld [vmem:[%s6857_s11 + $0x8] sm:$0xff]  ;;  %vm773_vm0 = vcmask 261120   ;;  %v4292_v22 = vmov 4   ;;  %s7058_s4 = sld [smem:[#allocation133_spill]] }
  0x16   : > { %s7406_s28 = smov (!%p674_p3, %s3805_s28), 1  ;;  %725 = vperm.xlu1 %4117, %v707_v1   ;;  %4116 = vset.pattern.permute.xlu0 %v6875_v0  ;;  %v4165_v19 = vld [vmem:[%s6856_s10] sm:$0xff]   ;;  %v4475_v21 = vld [vmem:[%s6858_s12 + $0x8] sm:$0xff]  ;;  %v4490_v25 = vld [vmem:[%s6858_s12 + $0x30] sm:$0xff]  ;;  %v4293_v45 = vmov 1   ;;  %v6883_v50 = vmov 2  }
  0x17   : > { %2225 = vmatprep.mubr.bf16.mxu1 %v6875_v0  ;;  %s6925_s23 = sshll.u32 %s7406_s28, 6  ;;  %715 = vperm.xlu0 %4116, %v705_v16   ;;  %v4469_v20 = vld [vmem:[%s6858_s12] sm:$0xff]  ;;  %v4166_v23 = vld [vmem:[%s6856_s10 + $0x8] sm:$0xff]   ;;  %v4167_v28 = vld [vmem:[%s6856_s10 + $0x10] sm:$0xff]   ;;  %v6881_v51 = vmov 3   ;;  %v6879_v58 = vmov 5  }
  0x18   : > { %v923_v24 = vld [vmem:[%s6859_s13] sm:$0xff]  ;;  %v924_v26 = vld [vmem:[%s6859_s13 + $0x8] sm:$0xff]  ;;  %v711_v29 = vld [vmem:[%s6857_s11 + $0x30] sm:$0xff]  ;;  %v6884_v60 = vmov 6   ;;  %v6877_v63 = vmov 7   ;;  %s6926_s30 = smov 16  }
  0x19   : > { %v709_v27 = vld [vmem:[%s6857_s11 + $0x20] sm:$0xff]  ;;  %v925_v32 = vld [vmem:[%s6859_s13 + $0x10] sm:$0xff]  ;;  %v4168_v35 = vld [vmem:[%s6856_s10 + $0x18] sm:$0xff]   ;;  %s4300_s0 = smov 17   ;;  %s4301_s1 = smov 15   ;;  %vm4306_vm1 = vmmov 0  }
  0x1a   : > { %s678_s6 = scalar_lea.vmem %s7057_s24, %s6925_s23  ;;  %730 = vperm.xlu1 %4117, %v708_v2   ;;  %v4535_v36 = vld [vmem:[%s6858_s12 + $0x10] sm:$0xff]  ;;  %v4543_v38 = vld [vmem:[%s6858_s12 + $0x18] sm:$0xff]  ;;  %v4561_v42 = vld [vmem:[%s6858_s12 + $0x20] sm:$0xff]  ;;  %s4302_s5 = smov 1   ;;  %vm2686_vm2 = vcmask 1043456   ;;  %vm2682_vm3 = vcmask 64512  }
  0x1b   : > { %v686_v4 = vld [vmem:[%s678_s6 + $0x8] sm:$0xff]  ;;  %v688_v5 = vld [vmem:[%s678_s6 + $0x18] sm:$0xff]  ;;  %v685_v6 = vld [vmem:[%s678_s6] sm:$0xff]  ;;  %720 = vperm.xlu0 %4116, %v706_v18   ;;  %s4303_s24 = smov 127   ;;  %s7109_s2 = sld [smem:[#allocation137_spill]]  ;;  %vm2803_vm12 = vcmask 130048  }
  0x1c   : > { %v694_v7 = vpack.c.bf16 %v688_v5, %v686_v4  ;;  %v687_v8 = vld [vmem:[%s678_s6 + $0x10] sm:$0xff]  ;;  %v690_v9 = vld [vmem:[%s678_s6 + $0x28] sm:$0xff]  ;;  %v692_v10 = vld [vmem:[%s678_s6 + $0x38] sm:$0xff]  ;;  %s4308_s23 = smov 112   ;;  %s7184_s29 = sld [smem:[#allocation132_spill]]  ;;  %vm2186_vm13 = vcmask 523264  }
  0x1d   : > { %v693_v11 = vpack.c.bf16 %v687_v8, %v685_v6  ;;  %v696_v12 = vpack.c.bf16 %v692_v10, %v690_v9  ;;  %v689_v13 = vld [vmem:[%s678_s6 + $0x20] sm:$0xff]  ;;  %v691_v14 = vld [vmem:[%s678_s6 + $0x30] sm:$0xff]  ;;  %v4171_v33 = vld [vmem:[%s7058_s4 + $0x48] sm:$0xff]   ;;  %s4304_s6 = smov 113   ;;  %s7399_s26 = sld [smem:[#allocation136_spill]] }
  0x1e   : > { %786 = vmatprep.subr.bf16.mxu0 %v694_v7  ;;  %v695_v15 = vpack.c.bf16 %v691_v14, %v689_v13  ;;  %740 = vperm.xlu1 %4117, %v710_v3   ;;  %v4169_v30 = vld [vmem:[%s7058_s4 + $0x40] sm:$0xff]   ;;  %v4172_v34 = vld [vmem:[%s7058_s4 + $0x8] sm:$0xff]   ;;  %v4173_v37 = vld [vmem:[%s7058_s4 + $0x50] sm:$0xff]  }
  0x1f   : > { %787 = vmatpush1.bf16.msra.mxu0 %v693_v11  ;;  %4119 = vset.pattern.permute.xlu0 %v4292_v22  ;;  %v4170_v31 = vld [vmem:[%s7058_s4] sm:$0xff]   ;;  %v4174_v39 = vld [vmem:[%s7058_s4 + $0x10] sm:$0xff]   ;;  %v4175_v40 = vld [vmem:[%s7058_s4 + $0x58] sm:$0xff]  }
  0x20   : > { %788 = vmatprep.subr.bf16.mxu0 %v696_v12  ;;  %874 = vperm.xlu0 %4119, %v4475_v21   ;;  %v4176_v41 = vld [vmem:[%s7058_s4 + $0x18] sm:$0xff]   ;;  %v4177_v43 = vld [vmem:[%s7058_s4 + $0x60] sm:$0xff]   ;;  %v4179_v46 = vld [vmem:[%s7058_s4 + $0x68] sm:$0xff]  }
  0x21   : > { %v4178_v44 = vld [vmem:[%s7058_s4 + $0x20] sm:$0xff]   ;;  %v4180_v47 = vld [vmem:[%s7058_s4 + $0x28] sm:$0xff]   ;;  %v926_v48 = vld [vmem:[%s6859_s13 + $0x18] sm:$0xff] }
  0x22   : > { %750 = vperm.xlu1 %4117, %v712_v17   ;;  %v4590_v49 = vld [vmem:[%s6858_s12 + $0x28] sm:$0xff]  ;;  %v927_v52 = vld [vmem:[%s6859_s13 + $0x20] sm:$0xff]  ;;  %v4181_v54 = vld [vmem:[%s7058_s4 + $0x70] sm:$0xff]  }
  0x23   : > { %789 = vmatpush1.bf16.msra.mxu0 %v695_v15  ;;  %v928_v53 = vld [vmem:[%s6859_s13 + $0x28] sm:$0xff]  ;;  %v4182_v55 = vld [vmem:[%s7058_s4 + $0x30] sm:$0xff]   ;;  %v4183_v56 = vld [vmem:[%s7058_s4 + $0x78] sm:$0xff]  }
  0x24   : > { %899 = vperm.xlu0 %4119, %v4490_v25   ;;  %3905 = vmatprep.subr.bf16.mxu0 %v4169_v30  ;;  %v4184_v57 = vld [vmem:[%s7058_s4 + $0x38] sm:$0xff]   ;;  %v929_v61 = vld [vmem:[%s6859_s13 + $0x30] sm:$0xff] }
  0x25   : > { %v4636_v59 = vld [vmem:[%s6858_s12 + $0x38] sm:$0xff] }
  0x26   : > { %3818 = vmatmul.mubr.msk.bf16.vlgmr.msra.gmra.mrb[0].mxu0 %vm773_vm0, %v4165_v19  ;;  %4118 = vset.pattern.permute.xlu1 %v4292_v22  ;;  %v930_v62 = vld [vmem:[%s6859_s13 + $0x38] sm:$0xff] }
  0x27   : > { %828 = vmatprep.mubr.bf16.mxu0 %v6875_v0  ;;  %869 = vperm.xlu1 %4118, %v4469_v20  }
  0x28   : > { %4131 = vset.pattern.permute.xlu0 %v6875_v0  ;;  %3906 = vmatpush3.bf16.msra.mxu0 %v4170_v31 }
  0x29   : > { %735 = vperm.xlu0 %4131, %v709_v27   ;;  %3907 = vmatprep.subr.bf16.mxu0 %v4171_v33 }
  0x2b   : > { %4120 = vset.pattern.permute.xlu1 %v6875_v0 }
  0x2c   : > { %933 = vperm.xlu1 %4120, %v923_v24   ;;  %3908 = vmatpush3.bf16.msra.mxu0 %v4172_v34 }
  0x2d   : > { %745 = vperm.xlu0 %4131, %v711_v29   ;;  %3909 = vmatprep.subr.bf16.mxu0 %v4173_v37 }
  0x2e   : > { %3819 = vmatmul.mubr.msk.bf16.gmra.mrb[4].mxu0 %vm773_vm0, %v4166_v23 }
  0x2f   : > { %838 = vmatprep.mubr.bf16.mxu0 %v6875_v0 }
  0x30   : > { %938 = vperm.xlu1 %4120, %v924_v26   ;;  %3910 = vmatpush3.bf16.msra.mxu0 %v4174_v39 }
  0x31   : > { %943 = vperm.xlu0 %4131, %v925_v32   ;;  %3911 = vmatprep.subr.bf16.mxu0 %v4175_v40 }
  0x34   : > { %1067 = vperm.xlu1 %4120, %v4469_v20   ;;  %3912 = vmatpush3.bf16.msra.mxu0 %v4176_v41 }
  0x35   : > { %1079 = vperm.xlu0 %4131, %v4543_v38   ;;  %3913 = vmatprep.subr.bf16.mxu0 %v4177_v43 }
  0x36   : > { %3820 = vmatmul.mubr.msk.bf16.gmra.mrb[8].mxu0 %vm773_vm0, %v4167_v28 }
  0x37   : > { %848 = vmatprep.mubr.bf16.mxu0 %v6875_v0 }
  0x38   : > { %1071 = vperm.xlu1 %4120, %v4475_v21   ;;  %3914 = vmatpush3.bf16.msra.mxu0 %v4178_v44 }
  0x39   : > { %1083 = vperm.xlu0 %4131, %v4561_v42   ;;  %3915 = vmatprep.subr.bf16.mxu0 %v4179_v46 }
  0x3c   : > { %4121 = vset.pattern.permute.xlu1 %v4292_v22  ;;  %3916 = vmatpush3.bf16.msra.mxu0 %v4180_v47 }
  0x3d   : > { %879 = vperm.xlu1 %4121, %v4535_v36   ;;  %1091 = vperm.xlu0 %4131, %v4490_v25  }
  0x3e   : > { %3821 = vmatmul.mubr.msk.bf16.gmra.mrb[12].mxu0 %vm773_vm0, %v4168_v35  ;;  %3917 = vmatprep.subr.bf16.mxu0 %v4181_v54 }
  0x40   : > { %3918 = vmatpush3.bf16.msra.mxu0 %v4182_v55 }
  0x41   : > { %884 = vperm.xlu1 %4121, %v4543_v38   ;;  %4137 = vset.pattern.permute.xlu0 %v4293_v45 }
  0x42   : > { %1217 = vperm.xlu0 %4137, %v4535_v36   ;;  %3919 = vmatprep.subr.bf16.mxu0 %v4183_v56 }
  0x44   : > { %3920 = vmatpush3.bf16.msra.mxu0 %v4184_v57 }
  0x45   : > { %4122 = vset.pattern.permute.xlu1 %v4293_v45 }
  0x46   : > { %1209 = vperm.xlu1 %4122, %v4469_v20   ;;  %1229 = vperm.xlu0 %4137, %v4590_v49  }
  0x4a   : > { %1213 = vperm.xlu1 %4122, %v4475_v21   ;;  %1233 = vperm.xlu0 %4137, %v4490_v25  }
  0x4e   : > { %4123 = vset.pattern.permute.xlu1 %v6875_v0  ;;  %4141 = vset.pattern.permute.xlu0 %v6883_v50 }
  0x4f   : > { %948 = vperm.xlu1 %4123, %v926_v48   ;;  %1355 = vperm.xlu0 %4141, %v4475_v21  }
  0x53   : > { %1075 = vperm.xlu1 %4123, %v4535_v36   ;;  %1363 = vperm.xlu0 %4141, %v4543_v38  }
  0x57   : > { %4124 = vset.pattern.permute.xlu1 %v6883_v50  ;;  %1371 = vperm.xlu0 %4141, %v4590_v49  }
  0x58   : > { %1351 = vperm.xlu1 %4124, %v4469_v20  }
  0x5c   : > { %4125 = vset.pattern.permute.xlu1 %v4292_v22 }
  0x5d   : > { %889 = vperm.xlu1 %4125, %v4561_v42  }
  0x61   : > { %894 = vperm.xlu1 %4125, %v4590_v49  }
  0x65   : > { %4126 = vset.pattern.permute.xlu1 %v4293_v45 }
  0x66   : > { %1221 = vperm.xlu1 %4126, %v4543_v38  }
  0x6a   : > { %4127 = vset.pattern.permute.xlu1 %v6881_v51 }
  0x6b   : > { %1493 = vperm.xlu1 %4127, %v4469_v20  }
  0x6f   : > { %4128 = vset.pattern.permute.xlu1 %v6875_v0 }
  0x70   : > { %953 = vperm.xlu1 %4128, %v927_v52  }
  0x74   : > { %958 = vperm.xlu1 %4128, %v928_v53  }
  0x78   : > { %1087 = vperm.xlu1 %4128, %v4590_v49  }
  0x7c   : > { %4129 = vset.pattern.permute.xlu1 %v6883_v50 }
  0x7d   : > { %1359 = vperm.xlu1 %4129, %v4535_v36  }
  0x81   : > { %4130 = vset.pattern.permute.xlu1 %v6879_v58 }
  0x82   : > { %1635 = vperm.xlu1 %4130, %v4469_v20  }
  0x86   : > { %1639 = vperm.xlu1 %4130, %v4475_v21  }
  0x8a   : > { %4132 = vset.pattern.permute.xlu1 %v4292_v22 }
  0x8b   : > { %904 = vperm.xlu1 %4132, %v4636_v59  }
  0x8f   : > { %4133 = vset.pattern.permute.xlu1 %v4293_v45 }
  0x90   : > { %1225 = vperm.xlu1 %4133, %v4561_v42  }
  0x94   : > { %4134 = vset.pattern.permute.xlu1 %v6881_v51 }
  0x95   : > { %1505 = vperm.xlu1 %4134, %v4543_v38   ;;  %v726_v1 = vpop.permute.xlu1 %725 }
  0x96   : > { %v716_v8 = vpop.permute.xlu0 %715 }
  0x99   : > { %4135 = vset.pattern.permute.xlu1 %v6884_v60  ;;  %v731_v2 = vpop.permute.xlu1 %730 }
  0x9a   : > { %1777 = vperm.xlu1 %4135, %v4469_v20   ;;  %v721_v10 = vpop.permute.xlu0 %720 }
  0x9d   : > { %v741_v3 = vpop.permute.xlu1 %740 }
  0x9e   : > { %4136 = vset.pattern.permute.xlu1 %v6875_v0 }
  0x9f   : > { %963 = vperm.xlu1 %4136, %v929_v61   ;;  %v4683_v18 = vpop.permute.xlu0 %874 }
  0xa1   : > { %v4663_v4 = vpop.permute.xlu1 %750 }
  0xa3   : > { %968 = vperm.xlu1 %4136, %v930_v62   ;;  %v4701_v26 = vpop.permute.xlu0 %899 }
  0xa6   : > { %v4665_v5 = vpop.permute.xlu1 %869 }
  0xa7   : > { %1095 = vperm.xlu1 %4136, %v4636_v59  }
  0xa8   : > { %v736_v40 = vpop.permute.xlu0 %735 }
  0xab   : > { %4138 = vset.pattern.permute.xlu1 %v6883_v50  ;;  %v4667_v6 = vpop.permute.xlu1 %933 }
  0xac   : > { %1367 = vperm.xlu1 %4138, %v4561_v42   ;;  %v746_v57 = vpop.permute.xlu0 %745 }
  0xaf   : > { %v4669_v7 = vpop.permute.xlu1 %938 }
  0xb0   : > { %4139 = vset.pattern.permute.xlu1 %v6879_v58 }
  0xb1   : > { %1647 = vperm.xlu1 %4139, %v4543_v38  }
  0xb3   : > { %v4671_v9 = vpop.permute.xlu1 %1067 }
  0xb5   : > { %4140 = vset.pattern.permute.xlu1 %v6877_v63 }
  0xb6   : > { %1919 = vperm.xlu1 %4140, %v4469_v20  }
  0xb7   : > { %v4675_v14 = vpop.permute.xlu1 %1071 }
  0xb8   : > { %7059 = vst [vmem:[#allocation2_spill] sm:$0xff] %v4675_v14 }
  0xba   : > { %4142 = vset.pattern.permute.xlu1 %v4293_v45 }
  0xbb   : > { %1237 = vperm.xlu1 %4142, %v4636_v59  }
  0xbc   : > { %v4703_v27 = vpop.permute.xlu1 %879 }
  0xbf   : > { %4143 = vset.pattern.permute.xlu1 %v6881_v51 }
  0xc0   : > { %v4723_v39 = vpop.permute.xlu1 %884 }
  0xc5   : > { %v4745_v53 = vpop.permute.xlu1 %1209 }
  0xf9   : > { %v820_v11 = vpop.f32.mrb[0].mxu0 }
  0xfa   : > { %v4673_v12 = vadd.f32 %v820_v11, %v716_v8  ;;  %v822_v13 = vpop.f32.mrb[1].mxu0 }
  0xfb   : > { %v824_v15 = vpop.f32.mrb[2].mxu0  ;;  %v4685_v19 = vadd.f32 %v822_v13, %v716_v8 }
  0xfc   : > { %v4677_v16 = vadd.f32 %v824_v15, %v721_v10  ;;  %v826_v17 = vpop.f32.mrb[3].mxu0  ;;  %1130 = vrot.lane.b32.xlu0 %v4673_v12, %s6926_s30  ;;  %987 = vrot.lane.b32.xlu1 %v4673_v12, %s4300_s0 }
  0xfd   : > { %v4687_v22 = vadd.f32 %v826_v17, %v721_v10 }
  0xfe   : > { %v4699_v24 = vpack.c.bf16 %v4677_v16, %v4673_v12 }
  0xff   : > { %v4691_v23 = vpack.c.bf16 %v4687_v22, %v4685_v19 }
 0x100   : > { %1146 = vrot.lane.b32.xlu0 %v4685_v19, %s6926_s30  ;;  %1272 = vrot.lane.b32.xlu1 %v4673_v12, %s4301_s1  ;;  %7061 = vst [vmem:[#allocation4_spill] sm:$0xff] %v4699_v24 }
 0x101   : > { %7060 = vst [vmem:[#allocation3_spill] sm:$0xff] %v4691_v23  ;;  %2414 = vmatprep.mubr.bf16.mxu0 %v4691_v23  ;;  %v830_v28 = vpop.f32.mrb[4].mxu0 }
 0x102   : > { %2415 = vmatmul.mubr.bf16.vlgmr.msra.gmra.mrb[16].mxu0 %v4699_v24  ;;  %v832_v29 = vpop.f32.mrb[5].mxu0  ;;  %v4713_v32 = vadd.f32 %v830_v28, %v726_v1 }
 0x103   : > { %v4707_v30 = vadd.f32 %v832_v29, %v726_v1  ;;  %v834_v31 = vpop.f32.mrb[6].mxu0 }
 0x104   : > { %1430 = vrot.lane.b32.xlu0 %v4685_v19, %s4302_s5  ;;  %1414 = vrot.lane.b32.xlu1 %v4673_v12, %s4302_s5  ;;  %v4715_v33 = vadd.f32 %v834_v31, %v731_v2  ;;  %v836_v34 = vpop.f32.mrb[7].mxu0 }
 0x105   : > { %v4717_v35 = vadd.f32 %v836_v34, %v731_v2  ;;  %v4765_v2 = vpop.permute.xlu1 %1213 }
 0x106   : > { %v4721_v37 = vpack.c.bf16 %v4715_v33, %v4713_v32  ;;  %7071 = vst [vmem:[#allocation14_spill] sm:$0xff] %v4765_v2 }
 0x107   : > { %v4727_v41 = vpack.c.bf16 %v4717_v35, %v4707_v30 }
 0x108   : > { %7062 = vst [vmem:[#allocation5_spill] sm:$0xff] %v4721_v37  ;;  %1572 = vrot.lane.b32.xlu0 %v4685_v19, %s4303_s24  ;;  %1556 = vrot.lane.b32.xlu1 %v4673_v12, %s4303_s24 }
 0x109   : > { %7063 = vst [vmem:[#allocation6_spill] sm:$0xff] %v4727_v41  ;;  %v840_v43 = vpop.f32.mrb[8].mxu0  ;;  %2422 = vmatprep.mubr.bf16.mxu0 %v4727_v41  ;;  %v4791_v28 = vpop.permute.xlu1 %948 }
 0x10a   : > { %v4734_v44 = vadd.f32 %v840_v43, %v736_v40  ;;  %v842_v45 = vpop.f32.mrb[9].mxu0  ;;  %2423 = vmatmul.mubr.bf16.gmra.mrb[20].mxu0 %v4721_v37 }
 0x10b   : > { %v4737_v46 = vadd.f32 %v842_v45, %v736_v40  ;;  %v844_v47 = vpop.f32.mrb[10].mxu0 }
 0x10c   : > { %7064 = vst [vmem:[#allocation7_spill] sm:$0xff] %v4734_v44  ;;  %989 = vrot.lane.b32.xlu0 %v4677_v16, %s4300_s0  ;;  %1003 = vrot.lane.b32.xlu1 %v4685_v19, %s4300_s0  ;;  %v4743_v48 = vadd.f32 %v844_v47, %v741_v3  ;;  %v846_v52 = vpop.f32.mrb[11].mxu0 }
 0x10d   : > { %7065 = vst [vmem:[#allocation8_spill] sm:$0xff] %v4737_v46  ;;  %v4747_v54 = vadd.f32 %v846_v52, %v741_v3 }
 0x10e   : > { %7066 = vst [vmem:[#allocation9_spill] sm:$0xff] %v4743_v48  ;;  %v4751_v55 = vpack.c.bf16 %v4743_v48, %v4734_v44 }
 0x10f   : > { %7067 = vst [vmem:[#allocation10_spill] sm:$0xff] %v4747_v54  ;;  %v4755_v56 = vpack.c.bf16 %v4747_v54, %v4737_v46 }
 0x110   : > { %7068 = vst [vmem:[#allocation11_spill] sm:$0xff] %v4751_v55  ;;  %1274 = vrot.lane.b32.xlu0 %v4677_v16, %s4301_s1  ;;  %1288 = vrot.lane.b32.xlu1 %v4685_v19, %s4301_s1 }
 0x111   : > { %7069 = vst [vmem:[#allocation12_spill] sm:$0xff] %v4755_v56  ;;  %v850_v61 = vpop.f32.mrb[12].mxu0  ;;  %2430 = vmatprep.mubr.bf16.mxu0 %v4755_v56  ;;  %v4899_v56 = vpop.permute.xlu0 %943 }
 0x112   : > { %v852_v62 = vpop.f32.mrb[13].mxu0  ;;  %2431 = vmatmul.mubr.bf16.gmra.mrb[24].mxu0 %v4751_v55  ;;  %v4763_v1 = vadd.f32 %v850_v61, %v746_v57 }
 0x113   : > { %v854_v3 = vpop.f32.mrb[14].mxu0  ;;  %v4767_v8 = vadd.f32 %v852_v62, %v746_v57 }
 0x114   : > { %7070 = vst [vmem:[#allocation13_spill] sm:$0xff] %v4763_v1  ;;  %1005 = vrot.lane.b32.xlu0 %v4687_v22, %s4300_s0  ;;  %1132 = vrot.lane.b32.xlu1 %v4677_v16, %s6926_s30  ;;  %v4774_v10 = vadd.f32 %v854_v3, %v4663_v4  ;;  %v856_v11 = vpop.f32.mrb[15].mxu0 }
 0x115   : > { %7072 = vst [vmem:[#allocation15_spill] sm:$0xff] %v4767_v8  ;;  %v4777_v13 = vadd.f32 %v856_v11, %v4663_v4  ;;  %v4799_v4 = vpop.permute.xlu1 %1075  ;;  %v4903_v41 = vpop.permute.xlu0 %1079 }
 0x116   : > { %7073 = vst [vmem:[#allocation16_spill] sm:$0xff] %v4774_v10  ;;  %v4781_v15 = vpack.c.bf16 %v4774_v10, %v4763_v1  ;;  %7077 = vst [vmem:[#allocation20_spill] sm:$0xff] %v4799_v4 }
 0x117   : > { %7074 = vst [vmem:[#allocation17_spill] sm:$0xff] %v4777_v13  ;;  %v4785_v17 = vpack.c.bf16 %v4777_v13, %v4767_v8  ;;  %7095 = vst [vmem:[#allocation38_spill] sm:$0xff] %v4903_v41 }
 0x118   : > { %7075 = vst [vmem:[#allocation18_spill] sm:$0xff] %v4781_v15  ;;  %1290 = vrot.lane.b32.xlu0 %v4687_v22, %s4301_s1  ;;  %1416 = vrot.lane.b32.xlu1 %v4677_v16, %s4302_s5 }
 0x119   : > { %7076 = vst [vmem:[#allocation19_spill] sm:$0xff] %v4785_v17  ;;  %2438 = vmatprep.mubr.bf16.mxu0 %v4785_v17  ;;  %v4809_v29 = vpop.permute.xlu1 %1351  ;;  %v4907_v23 = vpop.permute.xlu0 %1083 }
 0x11a   : > { %2439 = vmatmul.mubr.bf16.gmra.mrb[28].mxu0 %v4781_v15  ;;  %v6897_v15 = vmov 0.0   ;;  %7096 = vst [vmem:[#allocation39_spill] sm:$0xff] %v4907_v23 }
 0x11b   : > { %4009 = vmatprep.subr.bf16.mxu0 %v6897_v15 }
 0x11c   : > { %991 = vrot.lane.b32.xlu0 %v4713_v32, %s4300_s0  ;;  %1558 = vrot.lane.b32.xlu1 %v4677_v16, %s4303_s24 }
 0x11d   : > { %v4815_v31 = vpop.permute.xlu1 %889 }
 0x120   : > { %1007 = vrot.lane.b32.xlu0 %v4707_v30, %s4300_s0  ;;  %1148 = vrot.lane.b32.xlu1 %v4687_v22, %s6926_s30 }
 0x121   : > { %v4825_v34 = vpop.permute.xlu1 %894 }
 0x124   : > { %1136 = vrot.lane.b32.xlu0 %v4715_v33, %s6926_s30  ;;  %1432 = vrot.lane.b32.xlu1 %v4687_v22, %s4302_s5 }
 0x125   : > { %v4831_v40 = vpop.permute.xlu1 %1221 }
 0x126   : > { %7078 = vst [vmem:[#allocation21_spill] sm:$0xff] %v4831_v40 }
 0x128   : > { %1278 = vrot.lane.b32.xlu0 %v4715_v33, %s4301_s1  ;;  %1574 = vrot.lane.b32.xlu1 %v4687_v22, %s4303_s24 }
 0x129   : > { %v4841_v43 = vpop.permute.xlu1 %1493 }
 0x12a   : > { %7079 = vst [vmem:[#allocation22_spill] sm:$0xff] %v4841_v43 }
 0x12c   : > { %1152 = vrot.lane.b32.xlu0 %v4717_v35, %s6926_s30  ;;  %1134 = vrot.lane.b32.xlu1 %v4713_v32, %s6926_s30 }
 0x12d   : > { %v4847_v45 = vpop.permute.xlu1 %953 }
 0x130   : > { %1294 = vrot.lane.b32.xlu0 %v4717_v35, %s4301_s1  ;;  %1276 = vrot.lane.b32.xlu1 %v4713_v32, %s4301_s1 }
 0x131   : > { %v4853_v47 = vpop.permute.xlu1 %958 }
 0x134   : > { %995 = vrot.lane.b32.xlu0 %v4734_v44, %s4300_s0  ;;  %1150 = vrot.lane.b32.xlu1 %v4707_v30, %s6926_s30 }
 0x135   : > { %v4857_v52 = vpop.permute.xlu1 %1087 }
 0x136   : > { %7080 = vst [vmem:[#allocation23_spill] sm:$0xff] %v4857_v52 }
 0x138   : > { %1011 = vrot.lane.b32.xlu0 %v4737_v46, %s4300_s0  ;;  %1292 = vrot.lane.b32.xlu1 %v4707_v30, %s4301_s1 }
 0x139   : > { %v4863_v57 = vpop.permute.xlu1 %1359 }
 0x13a   : > { %7081 = vst [vmem:[#allocation24_spill] sm:$0xff] %v4863_v57 }
 0x13c   : > { %993 = vrot.lane.b32.xlu1 %v4715_v33, %s4300_s0  ;;  %1154 = vrot.lane.b32.xlu0 %v4737_v46, %s6926_s30 }
 0x13d   : > { %v4867_v61 = vpop.permute.xlu1 %1635 }
 0x13e   : > { %7082 = vst [vmem:[#allocation25_spill] sm:$0xff] %v4867_v61  ;;  %v2640_v61 = vld [vmem:[%s7109_s2] sm:$0xff] }
 0x140   : > { %1009 = vrot.lane.b32.xlu1 %v4717_v35, %s4300_s0  ;;  %1420 = vrot.lane.b32.xlu0 %v4715_v33, %s4302_s5 }
 0x141   : > { %v4872_v62 = vpop.permute.xlu1 %1639 }
 0x142   : > { %7083 = vst [vmem:[#allocation26_spill] sm:$0xff] %v4872_v62 }
 0x144   : > { %1138 = vrot.lane.b32.xlu1 %v4734_v44, %s6926_s30 }
 0x145   : > { %v4876_v3 = vpop.permute.xlu1 %904 }
 0x146   : > { %7084 = vst [vmem:[#allocation27_spill] sm:$0xff] %v4876_v3 }
 0x148   : > { %997 = vrot.lane.b32.xlu1 %v4743_v48, %s4300_s0 }
 0x149   : > { %v4880_v11 = vpop.permute.xlu1 %1225 }
 0x14a   : > { %7085 = vst [vmem:[#allocation28_spill] sm:$0xff] %v4880_v11  ;;  %v7102_v11 = vmov 0.0  }
 0x14b   : > { %4011 = vmatprep.mubr.msk.bf16.mxu0 %vm4306_vm1, %v7102_v11 }
 0x14c   : > { %1140 = vrot.lane.b32.xlu1 %v4743_v48, %s6926_s30 }
 0x14d   : > { %v4882_v0 = vpop.permute.xlu1 %1505 }
 0x14e   : > { %7086 = vst [vmem:[#allocation29_spill] sm:$0xff] %v4882_v0 }
 0x150   : > { %1013 = vrot.lane.b32.xlu1 %v4747_v54, %s4300_s0 }
 0x151   : > { %v4884_v63 = vpop.permute.xlu1 %1777 }
 0x152   : > { %7087 = vst [vmem:[#allocation30_spill] sm:$0xff] %v4884_v63  ;;  %v4911_v63 = vpop.permute.xlu0 %1091 }
 0x153   : > { %7097 = vst [vmem:[#allocation40_spill] sm:$0xff] %v4911_v63 }
 0x154   : > { %1156 = vrot.lane.b32.xlu1 %v4747_v54, %s6926_s30  ;;  %s7133_s30 = smov 16  }
 0x155   : > { %v4886_v58 = vpop.permute.xlu1 %963 }
 0x156   : > { %7088 = vst [vmem:[#allocation31_spill] sm:$0xff] %v4886_v58  ;;  %v4915_v15 = vpop.permute.xlu0 %1217 }
 0x157   : > { %7098 = vst [vmem:[#allocation41_spill] sm:$0xff] %v4915_v15 }
 0x158   : > { %1418 = vrot.lane.b32.xlu1 %v4713_v32, %s4302_s5 }
 0x159   : > { %v4888_v51 = vpop.permute.xlu1 %968 }
 0x15a   : > { %7089 = vst [vmem:[#allocation32_spill] sm:$0xff] %v4888_v51 }
 0x15c   : > { %1434 = vrot.lane.b32.xlu1 %v4707_v30, %s4302_s5 }
 0x15d   : > { %v4890_v50 = vpop.permute.xlu1 %1095 }
 0x15e   : > { %7090 = vst [vmem:[#allocation33_spill] sm:$0xff] %v4890_v50 }
 0x160   : > { %1509 = vperm.xlu1 %4143, %v4561_v42  }
 0x161   : > { %v4892_v60 = vpop.permute.xlu1 %1367 }
 0x162   : > { %7091 = vst [vmem:[#allocation34_spill] sm:$0xff] %v4892_v60 }
 0x164   : > { %1698 = vrot.lane.b32.xlu1 %v4673_v12, %s4304_s6 }
 0x165   : > { %v4895_v17 = vpop.permute.xlu1 %1647 }
 0x166   : > { %7092 = vst [vmem:[#allocation35_spill] sm:$0xff] %v4895_v17 }
 0x168   : > { %1700 = vrot.lane.b32.xlu1 %v4677_v16, %s4304_s6 }
 0x169   : > { %v4897_v55 = vpop.permute.xlu1 %1919 }
 0x16a   : > { %7093 = vst [vmem:[#allocation36_spill] sm:$0xff] %v4897_v55  ;;  %v4919_v55 = vpop.permute.xlu0 %1229 }
 0x16b   : > { %7100 = vst [vmem:[#allocation43_spill] sm:$0xff] %v4919_v55 }
 0x16d   : > { %v4901_v37 = vpop.permute.xlu1 %1237 }
 0x16e   : > { %7094 = vst [vmem:[#allocation37_spill] sm:$0xff] %v4901_v37  ;;  %v4923_v37 = vpop.permute.xlu0 %1233 }
 0x16f   : > { %7101 = vst [vmem:[#allocation44_spill] sm:$0xff] %v4923_v37 }
 0x171   : > { %v4905_v24 = vpop.permute.xlu1 %987 }
 0x172   : > { %v4929_v57 = vpop.permute.xlu0 %1355 }
 0x173   : > { %7103 = vst [vmem:[#allocation45_spill] sm:$0xff] %v4929_v57  ;;  %v2641_v57 = vld [vmem:[%s7109_s2 + $0x8] sm:$0xff] }
 0x175   : > { %v4909_v50 = vpop.permute.xlu1 %1272 }
 0x176   : > { %v4933_v23 = vpop.permute.xlu0 %1363 }
 0x177   : > { %7105 = vst [vmem:[#allocation47_spill] sm:$0xff] %v4933_v23 }
 0x179   : > { %v4913_v60 = vpop.permute.xlu1 %1414 }
 0x17a   : > { %v4937_v41 = vpop.permute.xlu0 %1371 }
 0x17b   : > { %7107 = vst [vmem:[#allocation49_spill] sm:$0xff] %v4937_v41 }
 0x17d   : > { %v4917_v17 = vpop.permute.xlu1 %1556 }
 0x17e   : > { %7099 = vst [vmem:[#allocation42_spill] sm:$0xff] %v4917_v17  ;;  %v4947_v2 = vpop.permute.xlu0 %1130 }
 0x181   : > { %v4921_v0 = vpop.permute.xlu1 %1003 }
 0x185   : > { %v4927_v52 = vpop.permute.xlu1 %1288 }
 0x189   : > { %v4931_v63 = vpop.permute.xlu1 %1132 }
 0x18a   : > { %7104 = vst [vmem:[#allocation46_spill] sm:$0xff] %v4931_v63 }
 0x18d   : > { %v4935_v15 = vpop.permute.xlu1 %1416 }
 0x18e   : > { %7106 = vst [vmem:[#allocation48_spill] sm:$0xff] %v4935_v15 }
 0x191   : > { %v4939_v62 = vpop.permute.xlu1 %1558 }
 0x192   : > { %7108 = vst [vmem:[#allocation50_spill] sm:$0xff] %v4939_v62 }
 0x195   : > { %v4949_v14 = vpop.permute.xlu1 %1148 }
 0x196   : > { %7110 = vst [vmem:[#allocation51_spill] sm:$0xff] %v4949_v14 }
 0x1d5   : > { %v3921_v55 = vpop.f32.mrb[16].mxu0 }
 0x1d6   : > { %v3922_v40 = vpop.f32.mrb[17].mxu0 }
 0x1d7   : > { %v3923_v37 = vadd.f32 %v3922_v40, %v3921_v55  ;;  %v3924_v4 = vpop.f32.mrb[18].mxu0  ;;  %v2644_v40 = vld [vmem:[%s6853_s7] sm:$0xff] }
 0x1d8   : > { %v3925_v51 = vpop.f32.mrb[19].mxu0 }
 0x1d9   : > { %v3926_v23 = vadd.f32 %v3925_v51, %v3924_v4  ;;  %v2642_v15 = vadd.f32 %v3923_v37, %v2640_v61  ;;  %v2645_v51 = vld [vmem:[%s6853_s7 + $0x8] sm:$0xff]  ;;  %v4957_v37 = vpop.permute.xlu0 %1146  ;;  %v7112_v61 = vmov 6  }
 0x1db   : > { %v2643_v41 = vadd.f32 %v3926_v23, %v2641_v57 }
 0x1dd   : > { %v2664_v43 = vpack.c.bf16 %v2643_v41, %v2642_v15  ;;  %v3927_v62 = vpop.f32.mrb[20].mxu0  ;;  %v4959_v15 = vpop.permute.xlu1 %1432 }
 0x1de   : > { %v3928_v55 = vpop.f32.mrb[21].mxu0  ;;  %7111 = vst [vmem:[#allocation52_spill] sm:$0xff] %v4959_v15 }
 0x1df   : > { %2666 = vxpose.xlu0.c.b16.start.end [1/1] (short) (narrow) %v2664_v43, 16  ;;  %v2732_v58 = vrot.slane %v2664_v43, 4  ;;  %v3929_v3 = vadd.f32 %v3928_v55, %v3927_v62  ;;  %v3930_v17 = vpop.f32.mrb[22].mxu0  ;;  %v4966_v55 = vpop.permute.xlu0 %1430 }
 0x1e0   : > { %v3931_v63 = vpop.f32.mrb[23].mxu0 }
 0x1e1   : > { %2734 = vxpose.xlu1.c.b16.start.end [1/1] (short) (narrow) %v2732_v58, 16  ;;  %v2646_v23 = vadd.f32 %v3929_v3, %v2644_v40  ;;  %v3932_v41 = vadd.f32 %v3931_v63, %v3930_v17  ;;  %v4974_v3 = vpop.permute.xlu1 %1574 }
 0x1e2   : > { %7114 = vst [vmem:[#allocation54_spill] sm:$0xff] %v4974_v3 }
 0x1e3   : > { %v2647_v4 = vadd.f32 %v3932_v41, %v2645_v51  ;;  %v6934_v41 = vmov 8  }
 0x1e5   : > { %1716 = vrot.lane.b32.xlu1 %v4687_v22, %s4304_s6  ;;  %v4963_v43 = vpack.c.bf16 %v2647_v4, %v2646_v23  ;;  %v3933_v57 = vpop.f32.mrb[24].mxu0  ;;  %v4984_v23 = vpop.permute.xlu0 %1572 }
 0x1e6   : > { %4144 = vset.pattern.permute.xlu1 %v7112_v61  ;;  %v3934_v62 = vpop.f32.mrb[25].mxu0 }
 0x1e7   : > { %v4968_v14 = vadd.f32 %v3934_v62, %v3933_v57  ;;  %v3936_v58 = vpop.f32.mrb[26].mxu0  ;;  %v2688_v63 = vsel %vm2686_vm2, %v4963_v43, 0  ;;  %v4988_v62 = vpop.permute.xlu1 %1134 }
 0x1e8   : > { %1436 = vrot.lane.b32.xlu0 %v4717_v35, %s4302_s5  ;;  %v3937_v17 = vpop.f32.mrb[27].mxu0  ;;  %4010 = vmatpush3.bf16.msra.mxu0 %v2688_v63  ;;  %7116 = vst [vmem:[#allocation56_spill] sm:$0xff] %v4988_v62 }
 0x1e9   : > { %7113 = vst [vmem:[#allocation53_spill] sm:$0xff] %v4968_v14  ;;  %1789 = vperm.xlu1 %4144, %v4543_v38   ;;  %v4977_v40 = vadd.f32 %v3937_v17, %v3936_v58  ;;  %4015 = vmatprep.subr.bf16.mxu0 %v7102_v11  ;;  %v4998_v14 = vpop.permute.xlu0 %989 }
 0x1eb   : > { %7115 = vst [vmem:[#allocation55_spill] sm:$0xff] %v4977_v40 }
 0x1ec   : > { %1714 = vrot.lane.b32.xlu0 %v4685_v19, %s4304_s6 }
 0x1ed   : > { %4145 = vset.pattern.permute.xlu1 %v6934_v41  ;;  %v3939_v4 = vpop.f32.mrb[28].mxu0  ;;  %v7119_v41 = vmov 2  }
 0x1ee   : > { %2061 = vperm.xlu1 %4145, %v4469_v20   ;;  %v3940_v57 = vpop.f32.mrb[29].mxu0 }
 0x1ef   : > { %v4990_v58 = vadd.f32 %v3940_v57, %v3939_v4  ;;  %v3942_v63 = vpop.f32.mrb[30].mxu0  ;;  %v5005_v4 = vpop.permute.xlu1 %1276 }
 0x1f0   : > { %1015 = vrot.lane.b32.xlu0 %v4767_v8, %s4300_s0  ;;  %v3943_v17 = vpop.f32.mrb[31].mxu0  ;;  %7120 = vst [vmem:[#allocation59_spill] sm:$0xff] %v5005_v4  ;;  %v5011_v57 = vpop.permute.xlu0 %1274  ;;  %v7127_v4 = vmov 5  }
 0x1f1   : > { %7117 = vst [vmem:[#allocation57_spill] sm:$0xff] %v4990_v58  ;;  %v4994_v51 = vadd.f32 %v3943_v17, %v3942_v63  ;;  %7121 = vst [vmem:[#allocation60_spill] sm:$0xff] %v5011_v57  ;;  %v7123_v17 = vmov 3  }
 0x1f2   : > { %999 = vrot.lane.b32.xlu1 %v4763_v1, %s4300_s0 }
 0x1f3   : > { %7118 = vst [vmem:[#allocation58_spill] sm:$0xff] %v4994_v51  ;;  %4147 = vset.pattern.permute.xlu1 %v7119_v41  ;;  %v5015_v41 = vpop.permute.xlu1 %1150 }
 0x1f4   : > { %1280 = vrot.lane.b32.xlu0 %v4734_v44, %s4301_s1  ;;  %7122 = vst [vmem:[#allocation61_spill] sm:$0xff] %v5015_v41  ;;  %v5020_v63 = vpop.permute.xlu0 %1005 }
 0x1f6   : > { %1001 = vrot.lane.b32.xlu1 %v4774_v10, %s4300_s0 }
 0x1f7   : > { %v5023_v20 = vpop.permute.xlu1 %1292 }
 0x1f8   : > { %1296 = vrot.lane.b32.xlu0 %v4737_v46, %s4301_s1  ;;  %7124 = vst [vmem:[#allocation62_spill] sm:$0xff] %v5023_v20  ;;  %v5028_v58 = vpop.permute.xlu0 %1290 }
 0x1f9   : > { %7125 = vst [vmem:[#allocation63_spill] sm:$0xff] %v5028_v58 }
 0x1fa   : > { %1017 = vrot.lane.b32.xlu1 %v4777_v13, %s4300_s0  ;;  %s4309_s0 = smov 111  }
 0x1fb   : > { %v5032_v51 = vpop.permute.xlu1 %993 }
 0x1fc   : > { %1375 = vperm.xlu0 %4141, %v4490_v25   ;;  %7126 = vst [vmem:[#allocation64_spill] sm:$0xff] %v5032_v51  ;;  %v5037_v40 = vpop.permute.xlu0 %991  ;;  %v7131_v51 = vmov 7  }
 0x1fe   : > { %1282 = vrot.lane.b32.xlu1 %v4743_v48, %s4301_s1 }
 0x200   : > { %4146 = vset.pattern.permute.xlu0 %v7123_v17  ;;  %v5046_v20 = vpop.permute.xlu0 %1007 }
 0x201   : > { %1497 = vperm.xlu0 %4146, %v4475_v21   ;;  %v5040_v21 = vpop.permute.xlu1 %1009 }
 0x202   : > { %1298 = vrot.lane.b32.xlu1 %v4747_v54, %s4301_s1  ;;  %7128 = vst [vmem:[#allocation65_spill] sm:$0xff] %v5040_v21 }
 0x204   : > { %v5057_v41 = vpop.permute.xlu0 %1136 }
 0x205   : > { %1501 = vperm.xlu0 %4146, %v4535_v36   ;;  %v5051_v62 = vpop.permute.xlu1 %1138  ;;  %7130 = vst [vmem:[#allocation67_spill] sm:$0xff] %v5057_v41 }
 0x206   : > { %1379 = vperm.xlu1 %4147, %v4636_v59   ;;  %7129 = vst [vmem:[#allocation66_spill] sm:$0xff] %v5051_v62 }
 0x208   : > { %v5066_v62 = vpop.permute.xlu0 %1278 }
 0x209   : > { %1513 = vperm.xlu0 %4146, %v4590_v49   ;;  %v5060_v21 = vpop.permute.xlu1 %997  ;;  %7134 = vst [vmem:[#allocation69_spill] sm:$0xff] %v5066_v62 }
 0x20a   : > { %1560 = vrot.lane.b32.xlu1 %v4713_v32, %s4303_s24  ;;  %7132 = vst [vmem:[#allocation68_spill] sm:$0xff] %v5060_v21 }
 0x20b   : > { %4148 = vset.pattern.permute.xlu1 %v7127_v4 }
 0x20c   : > { %v5077_v21 = vpop.permute.xlu0 %1152 }
 0x20d   : > { %1562 = vrot.lane.b32.xlu0 %v4715_v33, %s4303_s24  ;;  %v5072_v15 = vpop.permute.xlu1 %1140  ;;  %7136 = vst [vmem:[#allocation71_spill] sm:$0xff] %v5077_v21 }
 0x20e   : > { %1576 = vrot.lane.b32.xlu1 %v4707_v30, %s4303_s24  ;;  %7135 = vst [vmem:[#allocation70_spill] sm:$0xff] %v5072_v15 }
 0x210   : > { %v5086_v62 = vpop.permute.xlu0 %1294 }
 0x211   : > { %1578 = vrot.lane.b32.xlu0 %v4717_v35, %s4303_s24  ;;  %v5079_v41 = vpop.permute.xlu1 %1013  ;;  %7138 = vst [vmem:[#allocation73_spill] sm:$0xff] %v5086_v62 }
 0x212   : > { %1651 = vperm.xlu1 %4148, %v4561_v42   ;;  %7137 = vst [vmem:[#allocation72_spill] sm:$0xff] %v5079_v41 }
 0x214   : > { %v5097_v15 = vpop.permute.xlu0 %995 }
 0x215   : > { %1856 = vrot.lane.b32.xlu0 %v4685_v19, %s4308_s23  ;;  %7140 = vst [vmem:[#allocation75_spill] sm:$0xff] %v5097_v15 }
 0x216   : > { %1840 = vrot.lane.b32.xlu1 %v4673_v12, %s4308_s23 }
 0x217   : > { %4149 = vset.pattern.permute.xlu1 %v7131_v51 }
 0x219   : > { %1144 = vrot.lane.b32.xlu0 %v4774_v10, %s7133_s30 }
 0x21a   : > { %1842 = vrot.lane.b32.xlu1 %v4677_v16, %s4308_s23 }
 0x21d   : > { %1160 = vrot.lane.b32.xlu0 %v4777_v13, %s7133_s30 }
 0x21e   : > { %1858 = vrot.lane.b32.xlu1 %v4687_v22, %s4308_s23 }
 0x221   : > { %1424 = vrot.lane.b32.xlu0 %v4743_v48, %s4302_s5 }
 0x222   : > { %1931 = vperm.xlu1 %4149, %v4543_v38   ;;  %v5091_v38 = vpop.permute.xlu1 %1156 }
 0x223   : > { %7139 = vst [vmem:[#allocation74_spill] sm:$0xff] %v5091_v38 }
 0x225   : > { %1440 = vrot.lane.b32.xlu0 %v4747_v54, %s4302_s5 }
 0x226   : > { %1142 = vrot.lane.b32.xlu1 %v4763_v1, %s7133_s30  ;;  %v5099_v41 = vpop.permute.xlu1 %1418 }
 0x227   : > { %4150 = vset.pattern.permute.xlu1 %v7123_v17  ;;  %7141 = vst [vmem:[#allocation76_spill] sm:$0xff] %v5099_v41  ;;  %v5104_v17 = vpop.permute.xlu0 %1011 }
 0x228   : > { %7142 = vst [vmem:[#allocation77_spill] sm:$0xff] %v5104_v17  ;;  %v907_v17 = vmul.f32 %v4665_v5, %v4673_v12 }
 0x229   : > { %1521 = vperm.xlu0 %4146, %v4636_v59  }
 0x22a   : > { %1158 = vrot.lane.b32.xlu1 %v4767_v8, %s7133_s30  ;;  %v5109_v38 = vpop.permute.xlu1 %1434 }
 0x22b   : > { %7143 = vst [vmem:[#allocation78_spill] sm:$0xff] %v5109_v38  ;;  %v5115_v41 = vpop.permute.xlu0 %1154 }
 0x22c   : > { %7144 = vst [vmem:[#allocation79_spill] sm:$0xff] %v5115_v41 }
 0x22d   : > { %4151 = vset.pattern.permute.xlu0 %v7127_v4 }
 0x22e   : > { %1643 = vperm.xlu0 %4151, %v4535_v36   ;;  %1422 = vrot.lane.b32.xlu1 %v4734_v44, %s4302_s5  ;;  %v5117_v62 = vpop.permute.xlu1 %1509 }
 0x22f   : > { %7145 = vst [vmem:[#allocation80_spill] sm:$0xff] %v5117_v62  ;;  %v2751_v62 = vrot.slane %v4963_v43, 4 }
 0x231   : > { %v2756_v15 = vsel %vm2686_vm2, %v2751_v62, 0  ;;  %v5164_v62 = vld [vmem:[%s6858_s12 + $0x8] sm:$0xff] }
 0x232   : > { %1655 = vperm.xlu0 %4151, %v4590_v49   ;;  %1438 = vrot.lane.b32.xlu1 %v4737_v46, %s4302_s5  ;;  %v5126_v38 = vpop.permute.xlu1 %1698 }
 0x233   : > { %7147 = vst [vmem:[#allocation82_spill] sm:$0xff] %v5126_v38 }
 0x236   : > { %1718 = vrot.lane.b32.xlu0 %v4707_v30, %s4304_s6  ;;  %1517 = vperm.xlu1 %4150, %v4490_v25   ;;  %v5124_v25 = vpop.permute.xlu0 %1420 }
 0x237   : > { %7146 = vst [vmem:[#allocation81_spill] sm:$0xff] %v5124_v25  ;;  %v5137_v25 = vpop.permute.xlu1 %1700 }
 0x238   : > { %7148 = vst [vmem:[#allocation83_spill] sm:$0xff] %v5137_v25 }
 0x23a   : > { %1984 = vrot.lane.b32.xlu0 %v4677_v16, %s4309_s0  ;;  %1702 = vrot.lane.b32.xlu1 %v4713_v32, %s4304_s6 }
 0x23b   : > { %4152 = vset.pattern.permute.xlu1 %v7112_v61 }
 0x23e   : > { %2000 = vrot.lane.b32.xlu0 %v4687_v22, %s4309_s0  ;;  %1704 = vrot.lane.b32.xlu1 %v4715_v33, %s4304_s6 }
 0x242   : > { %1300 = vrot.lane.b32.xlu0 %v4767_v8, %s4301_s1  ;;  %1720 = vrot.lane.b32.xlu1 %v4717_v35, %s4304_s6 }
 0x245   : > { %v2674_v41 = vpop.trf.xlu0 }
 0x246   : > { %1564 = vrot.lane.b32.xlu0 %v4734_v44, %s4303_s24  ;;  %4012 = vmatmul.mubr.msk.bf16.vlgmr.msra.gmra.mrb[32].mxu0 %vm2682_vm3, %v2674_v41  ;;  %v7149_v41 = vmov 8  }
 0x247   : > { %4016 = vmatpush3.bf16.msra.mxu0 %v2756_v15  ;;  %1797 = vperm.xlu1 %4152, %v4590_v49   ;;  %v2742_v43 = vpop.trf.xlu1  ;;  %v5151_v15 = vld [vmem:[%s6858_s12 + $0x30] sm:$0xff] }
 0x248   : > { %4017 = vmatprep.mubr.msk.bf16.mxu0 %vm4306_vm1, %v7102_v11  ;;  %4027 = vmatprep.subr.bf16.mxu0 %v7102_v11  ;;  %7150 = vst [vmem:[#allocation84_spill] sm:$0xff] %v5151_v15 }
 0x24a   : > { %1580 = vrot.lane.b32.xlu0 %v4737_v46, %s4303_s24 }
 0x24b   : > { %1982 = vrot.lane.b32.xlu1 %v4673_v12, %s4309_s0 }
 0x24c   : > { %4153 = vset.pattern.permute.xlu1 %v7149_v41 }
 0x24e   : > { %1659 = vperm.xlu0 %4151, %v5151_v15   ;;  %4018 = vmatmul.mubr.msk.bf16.vlgmr.msra.gmra.mrb[36].mxu0 %vm2682_vm3, %v2742_v43 }
 0x24f   : > { %1998 = vrot.lane.b32.xlu1 %v4685_v19, %s4309_s0  ;;  %4029 = vmatprep.mubr.msk.bf16.mxu0 %vm4306_vm1, %v7102_v11 }
 0x252   : > { %4154 = vset.pattern.permute.xlu0 %v7112_v61 }
 0x253   : > { %2069 = vperm.xlu1 %4153, %v4535_v36   ;;  %1781 = vperm.xlu0 %4154, %v5164_v62  }
 0x257   : > { %1284 = vrot.lane.b32.xlu1 %v4763_v1, %s4301_s1  ;;  %1785 = vperm.xlu0 %4154, %v4535_v36  }
 0x258   : > { %4155 = vset.pattern.permute.xlu1 %v7127_v4  ;;  %v5184_v4 = vpop.permute.xlu1 %1716 }
 0x259   : > { %7152 = vst [vmem:[#allocation86_spill] sm:$0xff] %v5184_v4 }
 0x25a   : > { %v5174_v43 = vpop.permute.xlu0 %1436 }
 0x25b   : > { %1286 = vrot.lane.b32.xlu1 %v4774_v10, %s4301_s1  ;;  %1793 = vperm.xlu0 %4154, %v4561_v42   ;;  %7151 = vst [vmem:[#allocation85_spill] sm:$0xff] %v5174_v43 }
 0x25e   : > { %v5186_v11 = vpop.permute.xlu0 %1714 }
 0x25f   : > { %1302 = vrot.lane.b32.xlu1 %v4777_v13, %s4301_s1  ;;  %1846 = vrot.lane.b32.xlu0 %v4715_v33, %s4308_s23  ;;  %7153 = vst [vmem:[#allocation87_spill] sm:$0xff] %v5186_v11  ;;  %s7398_s1 = sld [smem:[#allocation135_spill]] }
 0x262   : > { %v5194_v25 = vpop.permute.xlu0 %1015 }
 0x263   : > { %1566 = vrot.lane.b32.xlu1 %v4743_v48, %s4303_s24  ;;  %1862 = vrot.lane.b32.xlu0 %v4717_v35, %s4308_s23  ;;  %7155 = vst [vmem:[#allocation89_spill] sm:$0xff] %v5194_v25 }
 0x266   : > { %v5206_v11 = vpop.permute.xlu0 %1280 }
 0x267   : > { %1582 = vrot.lane.b32.xlu1 %v4747_v54, %s4303_s24  ;;  %1442 = vrot.lane.b32.xlu0 %v4767_v8, %s4302_s5  ;;  %7157 = vst [vmem:[#allocation91_spill] sm:$0xff] %v5206_v11 }
 0x268   : > { %v5192_v38 = vpop.permute.xlu1 %1789 }
 0x269   : > { %7154 = vst [vmem:[#allocation88_spill] sm:$0xff] %v5192_v38 }
 0x26b   : > { %1663 = vperm.xlu1 %4155, %v4636_v59   ;;  %1706 = vrot.lane.b32.xlu0 %v4734_v44, %s4304_s6 }
 0x26d   : > { %v5199_v43 = vpop.permute.xlu1 %2061 }
 0x26e   : > { %7156 = vst [vmem:[#allocation90_spill] sm:$0xff] %v5199_v43  ;;  %v5215_v43 = vpop.permute.xlu0 %1296 }
 0x26f   : > { %1844 = vrot.lane.b32.xlu1 %v4713_v32, %s4308_s23  ;;  %1722 = vrot.lane.b32.xlu0 %v4737_v46, %s4304_s6  ;;  %7160 = vst [vmem:[#allocation94_spill] sm:$0xff] %v5215_v43 }
 0x270   : > { %4156 = vset.pattern.permute.xlu1 %v7131_v51 }
 0x271   : > { %v5208_v38 = vpop.permute.xlu1 %999 }
 0x272   : > { %7158 = vst [vmem:[#allocation92_spill] sm:$0xff] %v5208_v38 }
 0x273   : > { %1860 = vrot.lane.b32.xlu1 %v4707_v30, %s4308_s23  ;;  %1801 = vperm.xlu0 %4154, %v5151_v15  }
 0x275   : > { %v5213_v25 = vpop.permute.xlu1 %1001 }
 0x276   : > { %7159 = vst [vmem:[#allocation93_spill] sm:$0xff] %v5213_v25 }
 0x277   : > { %1935 = vperm.xlu1 %4156, %v4561_v42   ;;  %4157 = vset.pattern.permute.xlu0 %v7131_v51 }
 0x278   : > { %1923 = vperm.xlu0 %4157, %v5164_v62  }
 0x279   : > { %v5220_v4 = vpop.permute.xlu1 %1017 }
 0x27a   : > { %7161 = vst [vmem:[#allocation95_spill] sm:$0xff] %v5220_v4 }
 0x27b   : > { %1426 = vrot.lane.b32.xlu1 %v4763_v1, %s4302_s5  ;;  %v5224_v38 = vpop.permute.xlu0 %1375 }
 0x27c   : > { %7162 = vst [vmem:[#allocation96_spill] sm:$0xff] %v5224_v38  ;;  %1927 = vperm.xlu0 %4157, %v4535_v36   ;;  %4158 = vset.pattern.permute.xlu1 %v7112_v61 }
 0x27d   : > { %v5228_v25 = vpop.permute.xlu1 %1282 }
 0x27e   : > { %7163 = vst [vmem:[#allocation97_spill] sm:$0xff] %v5228_v25 }
 0x27f   : > { %1428 = vrot.lane.b32.xlu1 %v4774_v10, %s4302_s5 }
 0x280   : > { %1939 = vperm.xlu0 %4157, %v4590_v49   ;;  %v5233_v11 = vpop.permute.xlu0 %1497 }
 0x281   : > { %7164 = vst [vmem:[#allocation98_spill] sm:$0xff] %v5233_v11  ;;  %v5235_v43 = vpop.permute.xlu1 %1298 }
 0x282   : > { %7165 = vst [vmem:[#allocation99_spill] sm:$0xff] %v5235_v43 }
 0x283   : > { %1444 = vrot.lane.b32.xlu1 %v4777_v13, %s4302_s5 }
 0x284   : > { %1988 = vrot.lane.b32.xlu0 %v4715_v33, %s4309_s0  ;;  %v5241_v36 = vpop.permute.xlu0 %1501 }
 0x285   : > { %7166 = vst [vmem:[#allocation100_spill] sm:$0xff] %v5241_v36  ;;  %v5243_v61 = vpop.permute.xlu1 %1379 }
 0x286   : > { %7167 = vst [vmem:[#allocation101_spill] sm:$0xff] %v5243_v61 }
 0x287   : > { %1708 = vrot.lane.b32.xlu1 %v4743_v48, %s4304_s6 }
 0x288   : > { %2004 = vrot.lane.b32.xlu0 %v4717_v35, %s4309_s0  ;;  %v5249_v38 = vpop.permute.xlu0 %1513 }
 0x289   : > { %7168 = vst [vmem:[#allocation102_spill] sm:$0xff] %v5249_v38  ;;  %v5251_v11 = vpop.permute.xlu1 %1560 }
 0x28a   : > { %7169 = vst [vmem:[#allocation103_spill] sm:$0xff] %v5251_v11 }
 0x28b   : > { %1724 = vrot.lane.b32.xlu1 %v4747_v54, %s4304_s6 }
 0x28c   : > { %1584 = vrot.lane.b32.xlu0 %v4767_v8, %s4303_s24  ;;  %v5257_v43 = vpop.permute.xlu0 %1562 }
 0x28d   : > { %7170 = vst [vmem:[#allocation104_spill] sm:$0xff] %v5257_v43  ;;  %v5259_v36 = vpop.permute.xlu1 %1576 }
 0x28e   : > { %7171 = vst [vmem:[#allocation105_spill] sm:$0xff] %v5259_v36 }
 0x28f   : > { %1805 = vperm.xlu1 %4158, %v4636_v59  }
 0x290   : > { %1848 = vrot.lane.b32.xlu0 %v4734_v44, %s4308_s23  ;;  %v5264_v61 = vpop.permute.xlu0 %1578 }
 0x291   : > { %7172 = vst [vmem:[#allocation106_spill] sm:$0xff] %v5264_v61  ;;  %v5266_v38 = vpop.permute.xlu1 %1651 }
 0x292   : > { %7173 = vst [vmem:[#allocation107_spill] sm:$0xff] %v5266_v38 }
 0x293   : > { %1986 = vrot.lane.b32.xlu1 %v4713_v32, %s4309_s0 }
 0x294   : > { %1864 = vrot.lane.b32.xlu0 %v4737_v46, %s4308_s23  ;;  %v5272_v11 = vpop.permute.xlu0 %1856  ;;  %4159 = vset.pattern.permute.xlu1 %v7149_v41 }
 0x295   : > { %7174 = vst [vmem:[#allocation108_spill] sm:$0xff] %v5272_v11  ;;  %v5275_v36 = vpop.permute.xlu1 %1840 }
 0x296   : > { %7175 = vst [vmem:[#allocation109_spill] sm:$0xff] %v5275_v36 }
 0x297   : > { %2002 = vrot.lane.b32.xlu1 %v4707_v30, %s4309_s0 }
 0x298   : > { %1943 = vperm.xlu0 %4157, %v5151_v15   ;;  %v5280_v43 = vpop.permute.xlu0 %1144 }
 0x299   : > { %7176 = vst [vmem:[#allocation110_spill] sm:$0xff] %v5280_v43  ;;  %v5282_v61 = vpop.permute.xlu1 %1842  ;;  %v1019_v43 = vlaneseq }
 0x29a   : > { %7177 = vst [vmem:[#allocation111_spill] sm:$0xff] %v5282_v61 }
 0x29b   : > { %2077 = vperm.xlu1 %4159, %v4561_v42   ;;  %v4281_v42 = vld [vmem:[%s6858_s12 + $0x18] sm:$0xff] }
 0x29c   : > { %4160 = vset.pattern.permute.xlu0 %v7149_v41  ;;  %v5286_v25 = vpop.permute.xlu0 %1160 }
 0x29d   : > { %7178 = vst [vmem:[#allocation112_spill] sm:$0xff] %v5286_v25  ;;  %2065 = vperm.xlu0 %4160, %v5164_v62   ;;  %v5289_v11 = vpop.permute.xlu1 %1858 }
 0x29e   : > { %7179 = vst [vmem:[#allocation113_spill] sm:$0xff] %v5289_v11  ;;  %v1041_v11 = vshrl.u32 %v1019_v43, 7 }
 0x29f   : > { %1568 = vrot.lane.b32.xlu1 %v4763_v1, %s4303_s24 }
 0x2a0   : > { %v5293_v36 = vpop.permute.xlu0 %1424  ;;  %4161 = vset.pattern.permute.xlu1 %v7131_v51  ;;  %v1038_v51 = vld [vmem:[%s7184_s29] ss:$8 sm:$0x3]  ;;  %v5319_v38 = vsub.s32 1, %v1041_v11 }
 0x2a1   : > { %7180 = vst [vmem:[#allocation114_spill] sm:$0xff] %v5293_v36  ;;  %2073 = vperm.xlu0 %4160, %v4281_v42   ;;  %v5299_v61 = vpop.permute.xlu1 %1931  ;;  %v5308_v36 = vand.u32 127, %v1019_v43 }
 0x2a2   : > { %7181 = vst [vmem:[#allocation115_spill] sm:$0xff] %v5299_v61  ;;  %v5317_v61 = vsub.s32 0, %v1041_v11 }
 0x2a3   : > { %1570 = vrot.lane.b32.xlu1 %v4774_v10, %s4303_s24  ;;  %vm1021_vm4 = vcmp.lt.s32.totalorder %v5308_v36, 17  ;;  %vm1162_vm5 = vcmp.lt.s32.totalorder %v5308_v36, 16  ;;  %vm1446_vm6 = vcmp.lt.s32.totalorder %v5308_v36, 1  ;;  %vm1304_vm7 = vcmp.lt.s32.totalorder %v5308_v36, 15 }
 0x2a4   : > { %v5303_v62 = vpop.permute.xlu0 %1440  ;;  %v5327_v43 = vrot.slane %v1038_v51, %v5317_v61  ;;  %v1022_v11 = vsel %vm1021_vm4, %v4905_v24, %v4921_v0  ;;  %vm1588_vm8 = vcmp.lt.s32.totalorder %v5308_v36, 127  ;;  %vm1730_vm9 = vcmp.lt.s32.totalorder %v5308_v36, 113 }
 0x2a5   : > { %7182 = vst [vmem:[#allocation116_spill] sm:$0xff] %v5303_v62  ;;  %2081 = vperm.xlu0 %4160, %v4590_v49   ;;  %v5306_v25 = vpop.permute.xlu1 %1142  ;;  %v5330_v62 = vrot.slane %v1038_v51, %v5319_v38  ;;  %v3824_v51 = vld [vmem:[%s7184_s29 + $0x3] ss:$8 sm:$0x3]  ;;  %vm1872_vm10 = vcmp.lt.s32.totalorder %v5308_v36, 112  ;;  %vm2014_vm11 = vcmp.lt.s32.totalorder %v5308_v36, 111 }
 0x2a6   : > { %7183 = vst [vmem:[#allocation117_spill] sm:$0xff] %v5306_v25  ;;  %v3822_v25 = vld [vmem:[%s7184_s29 + $0x1] ss:$8 sm:$0x3]  ;;  %v5379_v12 = vrot.slane %v3824_v51, %v5319_v38 }
 0x2a7   : > { %1586 = vrot.lane.b32.xlu1 %v4777_v13, %s4303_s24  ;;  %v1051_v3 = vmul.f32 %v5330_v62, %v1022_v11 }
 0x2a8   : > { %v5315_v42 = vpop.permute.xlu0 %1521 }
 0x2a9   : > { %7185 = vst [vmem:[#allocation118_spill] sm:$0xff] %v5315_v42  ;;  %1712 = vrot.lane.b32.xlu0 %v4774_v10, %s4304_s6  ;;  %v5324_v49 = vpop.permute.xlu1 %1158  ;;  %v1030_v42 = vsel %vm1021_vm4, %v4921_v0, %v4905_v24  ;;  %v3825_v0 = vld [vmem:[%s7184_s29 + $0x5] ss:$8 sm:$0x3]  ;;  %v908_v24 = vmul.f32 %v4665_v5, %v4685_v19  ;;  %v5374_v19 = vrot.slane %v3824_v51, %v5317_v61 }
 0x2aa   : > { %7186 = vst [vmem:[#allocation119_spill] sm:$0xff] %v5324_v49  ;;  %v1050_v21 = vmul.f32 %v5327_v43, %v1030_v42  ;;  %v909_v5 = vmul.f32 %v4683_v18, %v4677_v16  ;;  %v5382_v42 = vrot.slane %v3825_v0, %v5317_v61  ;;  %v5385_v11 = vrot.slane %v3825_v0, %v5319_v38 }
 0x2ab   : > { %1850 = vrot.lane.b32.xlu1 %v4743_v48, %s4308_s23  ;;  %v910_v16 = vmul.f32 %v4683_v18, %v4687_v22  ;;  %v1163_v51 = vsel %vm1162_vm5, %v4947_v2, %v4957_v37  ;;  %v1171_v0 = vsel %vm1162_vm5, %v4957_v37, %v4947_v2  ;;  %v972_v58 = vadd.f32 %v4667_v6, %v908_v24 }
 0x2ac   : > { %7189 = vst [vmem:[#allocation122_spill] sm:$0xff] %v5385_v11  ;;  %v1099_v18 = vmul.f32 %v4671_v9, %v1051_v3  ;;  %v911_v22 = vmul.f32 %v4703_v27, %v4713_v32  ;;  %v912_v11 = vmul.f32 %v4703_v27, %v4707_v30  ;;  %v1313_v27 = vsel %vm1304_vm7, %v4927_v52, %v4909_v50 }
 0x2ad   : > { %1728 = vrot.lane.b32.xlu0 %v4777_v13, %s4304_s6  ;;  %v5350_v49 = vpop.permute.xlu0 %1643  ;;  %v5352_v4 = vpop.permute.xlu1 %1422  ;;  %v915_v3 = vmul.f32 %v4815_v31, %v4734_v44  ;;  %v914_v24 = vmul.f32 %v4723_v39, %v4717_v35 }
 0x2ae   : > { %7187 = vst [vmem:[#allocation120_spill] sm:$0xff] %v5350_v49  ;;  %7188 = vst [vmem:[#allocation121_spill] sm:$0xff] %v5352_v4  ;;  %v5367_v49 = vrot.slane %v3822_v25, %v5317_v61  ;;  %v5370_v4 = vrot.slane %v3822_v25, %v5319_v38  ;;  %v3823_v25 = vld [vmem:[%s7184_s29 + $0x2] ss:$8 sm:$0x3] }
 0x2af   : > { %1866 = vrot.lane.b32.xlu1 %v4747_v54, %s4308_s23  ;;  %v5418_v2 = vrot.slane %v3823_v25, %v5317_v61  ;;  %v5421_v37 = vrot.slane %v3823_v25, %v5319_v38 }
 0x2b1   : > { %1992 = vrot.lane.b32.xlu0 %v4743_v48, %s4309_s0  ;;  %v5392_v15 = vpop.permute.xlu0 %1655  ;;  %v5394_v57 = vpop.permute.xlu1 %1438 }
 0x2b2   : > { %7190 = vst [vmem:[#allocation123_spill] sm:$0xff] %v5392_v15  ;;  %7191 = vst [vmem:[#allocation124_spill] sm:$0xff] %v5394_v57  ;;  %v971_v15 = vadd.f32 %v4667_v6, %v907_v17  ;;  %v1098_v57 = vmul.f32 %v4671_v9, %v1050_v21  ;;  %v1192_v6 = vmul.f32 %v5367_v49, %v1171_v0 }
 0x2b3   : > { %1947 = vperm.xlu1 %4161, %v4636_v59   ;;  %v1193_v9 = vmul.f32 %v5370_v4, %v1163_v51  ;;  %v1305_v59 = vsel %vm1304_vm7, %v4909_v50, %v4927_v52  ;;  %v916_v21 = vmul.f32 %v4815_v31, %v4737_v46  ;;  %v913_v17 = vmul.f32 %v4723_v39, %v4715_v33 }
 0x2b4   : > { %v5448_v50 = vadd.f32 %v4669_v7, %v909_v5  ;;  %v5451_v52 = vadd.f32 %v4669_v7, %v910_v16  ;;  %v1114_v25 = vadd.f32 %v1098_v57, %v971_v15  ;;  %v1115_v51 = vadd.f32 %v1099_v18, %v972_v58 }
 0x2b5   : > { %2008 = vrot.lane.b32.xlu0 %v4747_v54, %s4309_s0  ;;  %v5435_v30 = vpop.permute.xlu0 %1718  ;;  %v5437_v32 = vpop.permute.xlu1 %1517  ;;  %v5456_v0 = vadd.f32 %v4899_v56, %v911_v22  ;;  %v5459_v31 = vadd.f32 %v4899_v56, %v912_v11  ;;  %v1334_v33 = vmul.f32 %v5418_v2, %v1313_v27  ;;  %v1335_v35 = vmul.f32 %v5421_v37, %v1305_v59 }
 0x2b6   : > { %7192 = vst [vmem:[#allocation125_spill] sm:$0xff] %v5435_v30  ;;  %7193 = vst [vmem:[#allocation126_spill] sm:$0xff] %v5437_v32  ;;  %v1240_v7 = vmul.f32 %v4745_v53, %v1192_v6  ;;  %v1241_v39 = vmul.f32 %v4745_v53, %v1193_v9  ;;  %v917_v58 = vmul.f32 %v4825_v34, %v4743_v48  ;;  %v7246_v30 = vld [vmem:[#allocation38_spill] sm:$0xff] }
 0x2b7   : > { %1710 = vrot.lane.b32.xlu1 %v4763_v1, %s4304_s6  ;;  %v918_v57 = vmul.f32 %v4825_v34, %v4747_v54  ;;  %v5475_v5 = vadd.f32 %v4847_v45, %v915_v3  ;;  %v5478_v11 = vadd.f32 %v4847_v45, %v916_v21  ;;  %v5484_v53 = vadd.f32 %v4791_v28, %v914_v24  ;;  %v7205_v54 = vld [vmem:[#allocation22_spill] sm:$0xff] }
 0x2b8   : > { %4162 = vset.pattern.permute.xlu1 %v7149_v41  ;;  %v5481_v41 = vadd.f32 %v4791_v28, %v913_v17  ;;  %v1447_v34 = vsel %vm1446_vm6, %v4913_v60, %v4966_v55  ;;  %v1455_v16 = vsel %vm1446_vm6, %v4966_v55, %v4913_v60  ;;  %v1257_v18 = vadd.f32 %v1241_v39, %v1115_v51  ;;  %v7199_v17 = vld [vmem:[#allocation46_spill] sm:$0xff] }
 0x2b9   : > { %v5470_v15 = vpop.permute.xlu0 %1984  ;;  %v5472_v56 = vpop.permute.xlu1 %1702  ;;  %v1256_v22 = vadd.f32 %v1240_v7, %v1114_v25  ;;  %v1382_v45 = vmul.f32 %v4809_v29, %v1334_v33  ;;  %v1383_v28 = vmul.f32 %v4809_v29, %v1335_v35  ;;  %v1023_v6 = vsel %vm1021_vm4, %v4998_v14, %v5020_v63  ;;  %v7201_v7 = vld [vmem:[#allocation27_spill] sm:$0xff] }
 0x2ba   : > { %7194 = vst [vmem:[#allocation127_spill] sm:$0xff] %v5470_v15  ;;  %7195 = vst [vmem:[#allocation128_spill] sm:$0xff] %v5472_v56  ;;  %v1031_v9 = vsel %vm1021_vm4, %v5020_v63, %v4998_v14  ;;  %v919_v60 = vmul.f32 %v4701_v26, %v4763_v1  ;;  %v920_v55 = vmul.f32 %v4701_v26, %v4767_v8  ;;  %v7198_v63 = vld [vmem:[#allocation51_spill] sm:$0xff] }
 0x2bb   : > { %1726 = vrot.lane.b32.xlu1 %v4767_v8, %s4304_s6  ;;  %v5511_v59 = vadd.f32 %v4853_v47, %v917_v58  ;;  %v5514_v29 = vadd.f32 %v4853_v47, %v918_v57  ;;  %v1476_v21 = vmul.f32 %v5374_v19, %v1455_v16  ;;  %v1477_v14 = vmul.f32 %v5379_v12, %v1447_v34  ;;  %v7200_v47 = vld [vmem:[#allocation42_spill] sm:$0xff]  ;;  %s7381_s6 = sld [smem:[#allocation134_spill]] }
 0x2bc   : > { %v1164_v24 = vsel %vm1162_vm5, %v7199_v17, %v7198_v63  ;;  %v1172_v26 = vsel %vm1162_vm5, %v7198_v63, %v7199_v17  ;;  %v1589_v25 = vsel %vm1588_vm8, %v7200_v47, %v4984_v23  ;;  %v1597_v51 = vsel %vm1588_vm8, %v4984_v23, %v7200_v47  ;;  %v7204_v47 = vld [vmem:[#allocation122_spill] sm:$0xff] }
 0x2bd   : > { %v5516_v27 = vpop.permute.xlu0 %2000  ;;  %v5518_v3 = vpop.permute.xlu1 %1704  ;;  %v1052_v33 = vmul.f32 %v5327_v43, %v1031_v9  ;;  %v1053_v35 = vmul.f32 %v5330_v62, %v1023_v6  ;;  %v921_v39 = vmul.f32 %v7201_v7, %v4774_v10  ;;  %v922_v58 = vmul.f32 %v7201_v7, %v4777_v13  ;;  %v7213_v10 = vld [vmem:[#allocation25_spill] sm:$0xff] }
 0x2be   : > { %7196 = vst [vmem:[#allocation129_spill] sm:$0xff] %v5516_v27  ;;  %7197 = vst [vmem:[#allocation130_spill] sm:$0xff] %v5518_v3  ;;  %v1398_v57 = vadd.f32 %v1382_v45, %v1256_v22  ;;  %v1399_v34 = vadd.f32 %v1383_v28, %v1257_v18  ;;  %v1024_v23 = vsel %vm1021_vm4, %v5037_v40, %v5046_v20  ;;  %v7203_v22 = vld [vmem:[#allocation31_spill] sm:$0xff] }
 0x2bf   : > { %1990 = vrot.lane.b32.xlu1 %v4734_v44, %s4309_s0  ;;  %v1032_v16 = vsel %vm1021_vm4, %v5046_v20, %v5037_v40  ;;  %v1194_v6 = vmul.f32 %v5367_v49, %v1172_v26  ;;  %v1195_v9 = vmul.f32 %v5370_v4, %v1164_v24  ;;  %v5561_v18 = vadd.f32 %v7203_v22, %v919_v60  ;;  %v7206_v26 = vld [vmem:[#allocation2_spill] sm:$0xff]  ;;  %v7207_v60 = vld [vmem:[#allocation63_spill] sm:$0xff]  ;;  %v7208_v44 = vld [vmem:[#allocation60_spill] sm:$0xff] }
 0x2c0   : > { %v5564_v45 = vadd.f32 %v7203_v22, %v920_v55  ;;  %v1618_v28 = vmul.f32 %v5382_v42, %v1589_v25  ;;  %v1619_v7 = vmul.f32 %v7204_v47, %v1597_v51  ;;  %v1524_v40 = vmul.f32 %v7205_v54, %v1476_v21  ;;  %v7209_v51 = vld [vmem:[#allocation14_spill] sm:$0xff] }
 0x2c1   : > { %v5556_v63 = vpop.permute.xlu0 %1300  ;;  %v5558_v17 = vpop.permute.xlu1 %1720  ;;  %v1525_v20 = vmul.f32 %v7205_v54, %v1477_v14  ;;  %v1100_v24 = vmul.f32 %v7206_v26, %v1052_v33  ;;  %v1101_v48 = vmul.f32 %v7206_v26, %v1053_v35  ;;  %v1306_v55 = vsel %vm1304_vm7, %v7208_v44, %v7207_v60 }
 0x2c2   : > { %7202 = vst [vmem:[#allocation51_spill] sm:$0xff] %v5558_v17  ;;  %v1314_v25 = vsel %vm1304_vm7, %v7207_v60, %v7208_v44  ;;  %v1054_v21 = vmul.f32 %v5327_v43, %v1032_v16  ;;  %v1055_v54 = vmul.f32 %v5330_v62, %v1024_v23  ;;  %v1540_v14 = vadd.f32 %v1524_v40, %v1398_v57  ;;  %v7219_v60 = vld [vmem:[#allocation71_spill] sm:$0xff] }
 0x2c3   : > { %2006 = vrot.lane.b32.xlu1 %v4737_v46, %s4309_s0  ;;  %v1242_v33 = vmul.f32 %v7209_v51, %v1194_v6  ;;  %v1243_v35 = vmul.f32 %v7209_v51, %v1195_v9  ;;  %v1541_v26 = vadd.f32 %v1525_v20, %v1399_v34  ;;  %v7210_v46 = vld [vmem:[#allocation32_spill] sm:$0xff]  ;;  %v1666_v1 = vmul.f32 %v7213_v10, %v1618_v28  ;;  %v7218_v28 = vld [vmem:[#allocation50_spill] sm:$0xff] }
 0x2c4   : > { %v5587_v8 = vadd.f32 %v7210_v46, %v921_v39  ;;  %v5590_v13 = vadd.f32 %v7210_v46, %v922_v58  ;;  %v1667_v44 = vmul.f32 %v7213_v10, %v1619_v7  ;;  %v1116_v57 = vadd.f32 %v1100_v24, %v5448_v50  ;;  %v7215_v9 = vld [vmem:[#allocation84_spill] sm:$0xff]  ;;  %v7217_v58 = vld [vmem:[#allocation54_spill] sm:$0xff] }
 0x2c5   : > { %v1565_v22 = vpop.permute.xlu0 %1564  ;;  %v1117_v23 = vadd.f32 %v1101_v48, %v5451_v52  ;;  %v1336_v6 = vmul.f32 %v5418_v2, %v1314_v25  ;;  %v1337_v34 = vmul.f32 %v5421_v37, %v1306_v55  ;;  %v7216_v39 = vld [vmem:[#allocation20_spill] sm:$0xff]  ;;  %v1590_v10 = vsel %vm1588_vm8, %v7218_v28, %v7217_v58  ;;  %v7220_v55 = vld [vmem:[#allocation67_spill] sm:$0xff] }
 0x2c6   : > { %7211 = vst [vmem:[#allocation46_spill] sm:$0xff] %v5587_v8  ;;  %7212 = vst [vmem:[#allocation42_spill] sm:$0xff] %v5590_v13  ;;  %v5594_v16 = vpop.permute.xlu1 %1797  ;;  %v1102_v40 = vmul.f32 %v7216_v39, %v1054_v21  ;;  %v1103_v46 = vmul.f32 %v7216_v39, %v1055_v54  ;;  %v1598_v48 = vsel %vm1588_vm8, %v7217_v58, %v7218_v28  ;;  %v7254_v13 = vld [vmem:[#allocation24_spill] sm:$0xff]  ;;  %v7256_v8 = vld [vmem:[#allocation23_spill] sm:$0xff] }
 0x2c7   : > { %7214 = vst [vmem:[#allocation27_spill] sm:$0xff] %v5594_v16  ;;  %2085 = vperm.xlu1 %4162, %v7215_v9   ;;  %v1258_v50 = vadd.f32 %v1242_v33, %v1116_v57  ;;  %v1259_v52 = vadd.f32 %v1243_v35, %v1117_v23  ;;  %v5611_v20 = vadd.f32 %v1667_v44, %v1541_v26  ;;  %v7223_v33 = vld [vmem:[#allocation48_spill] sm:$0xff]  ;;  %v7224_v23 = vld [vmem:[#allocation45_spill] sm:$0xff] }
 0x2c8   : > { %v5613_v24 = vadd.f32 %v1666_v1, %v1540_v14  ;;  %v1166_v25 = vsel %vm1162_vm5, %v7220_v55, %v7219_v60  ;;  %v1174_v21 = vsel %vm1162_vm5, %v7219_v60, %v7220_v55  ;;  %v7222_v14 = vld [vmem:[#allocation52_spill] sm:$0xff]  ;;  %v1620_v44 = vmul.f32 %v5382_v42, %v1590_v10  ;;  %v7225_v60 = vld [vmem:[#allocation65_spill] sm:$0xff] }
 0x2c9   : > { %v1581_v7 = vpop.permute.xlu0 %1580  ;;  %v1448_v35 = vsel %vm1446_vm6, %v7223_v33, %v7222_v14  ;;  %v1456_v26 = vsel %vm1446_vm6, %v7222_v14, %v7223_v33  ;;  %v1621_v57 = vmul.f32 %v7204_v47, %v1598_v48  ;;  %v1384_v9 = vmul.f32 %v7224_v23, %v1336_v6  ;;  %v7226_v55 = vld [vmem:[#allocation64_spill] sm:$0xff]  ;;  %v7233_v33 = vld [vmem:[#allocation61_spill] sm:$0xff] }
 0x2ca   : > { %v5625_v54 = vsel %vm1588_vm8, %v1565_v22, %v1581_v7  ;;  %v5629_v51 = vsel %vm1588_vm8, %v1581_v7, %v1565_v22  ;;  %v5631_v1 = vpop.permute.xlu1 %1982  ;;  %v1385_v22 = vmul.f32 %v7224_v23, %v1337_v34  ;;  %v5646_v39 = vadd.f32 %v1102_v40, %v5456_v0  ;;  %v7234_v23 = vld [vmem:[#allocation56_spill] sm:$0xff]  ;;  %v7238_v16 = vld [vmem:[#allocation73_spill] sm:$0xff] }
 0x2cb   : > { %7221 = vst [vmem:[#allocation31_spill] sm:$0xff] %v5631_v1  ;;  %v5649_v58 = vadd.f32 %v1103_v46, %v5459_v31  ;;  %v1198_v28 = vmul.f32 %v5367_v49, %v1174_v21  ;;  %v1199_v7 = vmul.f32 %v5370_v4, %v1166_v25  ;;  %v1025_v10 = vsel %vm1021_vm4, %v7226_v55, %v7225_v60  ;;  %v7230_v25 = vld [vmem:[#allocation26_spill] sm:$0xff] }
 0x2cc   : > { %v1033_v6 = vsel %vm1021_vm4, %v7225_v60, %v7226_v55  ;;  %v5664_v0 = vmul.f32 %v5374_v19, %v1456_v26  ;;  %v5667_v31 = vmul.f32 %v5379_v12, %v1448_v35  ;;  %v5669_v40 = vadd.f32 %v1384_v9, %v1258_v50  ;;  %v7236_v35 = vld [vmem:[#allocation75_spill] sm:$0xff]  ;;  %v7237_v60 = vld [vmem:[#allocation21_spill] sm:$0xff]  ;;  %v7249_v1 = vld [vmem:[#allocation74_spill] sm:$0xff] }
 0x2cd   : > { %v5661_v34 = vpop.permute.xlu0 %1659  ;;  %v5671_v46 = vadd.f32 %v1385_v22, %v1259_v52  ;;  %v5676_v21 = vmul.f32 %v7230_v25, %v1620_v44  ;;  %v5679_v14 = vmul.f32 %v7230_v25, %v1621_v57  ;;  %v1165_v26 = vsel %vm1162_vm5, %v7234_v23, %v7233_v33  ;;  %v7235_v52 = vld [vmem:[#allocation77_spill] sm:$0xff] }
 0x2ce   : > { %7227 = vst [vmem:[#allocation122_spill] sm:$0xff] %v5661_v34  ;;  %v5673_v48 = vpop.permute.xlu1 %1998  ;;  %v1173_v50 = vsel %vm1162_vm5, %v7233_v33, %v7234_v23  ;;  %v1026_v9 = vsel %vm1021_vm4, %v7236_v35, %v7235_v52  ;;  %v1034_v44 = vsel %vm1021_vm4, %v7235_v52, %v7236_v35  ;;  %v1056_v57 = vmul.f32 %v5327_v43, %v1033_v6  ;;  %v7239_v33 = vld [vmem:[#allocation69_spill] sm:$0xff]  ;;  %v7240_v35 = vld [vmem:[#allocation62_spill] sm:$0xff] }
 0x2cf   : > { %7228 = vst [vmem:[#allocation22_spill] sm:$0xff] %v5671_v46  ;;  %7229 = vst [vmem:[#allocation2_spill] sm:$0xff] %v5673_v48  ;;  %v1057_v22 = vmul.f32 %v5330_v62, %v1025_v10  ;;  %v1246_v55 = vmul.f32 %v7237_v60, %v1198_v28  ;;  %v1247_v25 = vmul.f32 %v7237_v60, %v1199_v7  ;;  %v7241_v10 = vld [vmem:[#allocation59_spill] sm:$0xff]  ;;  %v7252_v48 = vld [vmem:[#allocation41_spill] sm:$0xff] }
 0x2d0   : > { %7231 = vst [vmem:[#allocation63_spill] sm:$0xff] %v5676_v21  ;;  %7232 = vst [vmem:[#allocation60_spill] sm:$0xff] %v5679_v14  ;;  %v1308_v23 = vsel %vm1304_vm7, %v7239_v33, %v7238_v16  ;;  %v1316_v34 = vsel %vm1304_vm7, %v7238_v16, %v7239_v33  ;;  %v1196_v52 = vmul.f32 %v5367_v49, %v1173_v50  ;;  %v7244_v33 = vld [vmem:[#allocation72_spill] sm:$0xff] }
 0x2d1   : > { %v1197_v6 = vmul.f32 %v5370_v4, %v1165_v26  ;;  %v1307_v28 = vsel %vm1304_vm7, %v7241_v10, %v7240_v35  ;;  %v1315_v7 = vsel %vm1304_vm7, %v7240_v35, %v7241_v10  ;;  %v1058_v16 = vmul.f32 %v5327_v43, %v1034_v44  ;;  %v7245_v26 = vld [vmem:[#allocation68_spill] sm:$0xff] }
 0x2d2   : > { %v5719_v60 = vpop.permute.xlu1 %2069  ;;  %v5721_v15 = vpop.permute.xlu0 %1781  ;;  %v1059_v50 = vmul.f32 %v5330_v62, %v1026_v9  ;;  %v1027_v27 = vsel %vm1021_vm4, %v7245_v26, %v7244_v33  ;;  %v1035_v56 = vsel %vm1021_vm4, %v7244_v33, %v7245_v26  ;;  %v1104_v35 = vmul.f32 %v7246_v30, %v1056_v57  ;;  %v7250_v33 = vld [vmem:[#allocation70_spill] sm:$0xff] }
 0x2d3   : > { %7242 = vst [vmem:[#allocation14_spill] sm:$0xff] %v5719_v60  ;;  %7243 = vst [vmem:[#allocation32_spill] sm:$0xff] %v5721_v15  ;;  %v1105_v10 = vmul.f32 %v7246_v30, %v1057_v22  ;;  %v7247_v60 = vld [vmem:[#allocation79_spill] sm:$0xff]  ;;  %v7248_v15 = vld [vmem:[#allocation66_spill] sm:$0xff]  ;;  %v1338_v3 = vmul.f32 %v5418_v2, %v1315_v7  ;;  %v1339_v17 = vmul.f32 %v5421_v37, %v1307_v28 }
 0x2d4   : > { %v1167_v44 = vsel %vm1162_vm5, %v7248_v15, %v7247_v60  ;;  %v1175_v9 = vsel %vm1162_vm5, %v7247_v60, %v7248_v15  ;;  %v1168_v57 = vsel %vm1162_vm5, %v7250_v33, %v7249_v1  ;;  %v1176_v30 = vsel %vm1162_vm5, %v7249_v1, %v7250_v33  ;;  %v7253_v33 = vld [vmem:[#allocation39_spill] sm:$0xff] }
 0x2d5   : > { %v1340_v22 = vmul.f32 %v5418_v2, %v1316_v34  ;;  %v1341_v26 = vmul.f32 %v5421_v37, %v1308_v23  ;;  %v1060_v15 = vmul.f32 %v5327_v43, %v1035_v56  ;;  %v1061_v7 = vmul.f32 %v5330_v62, %v1027_v27 }
 0x2d6   : > { %v5757_v60 = vpop.permute.xlu1 %1284  ;;  %v5759_v28 = vpop.permute.xlu0 %1785  ;;  %v1244_v14 = vmul.f32 %v7252_v48, %v1196_v52  ;;  %v1245_v32 = vmul.f32 %v7252_v48, %v1197_v6  ;;  %v1200_v21 = vmul.f32 %v5367_v49, %v1175_v9  ;;  %v1201_v1 = vmul.f32 %v5370_v4, %v1167_v44  ;;  %v7255_v6 = vld [vmem:[#allocation47_spill] sm:$0xff] }
 0x2d7   : > { %7251 = vst [vmem:[#allocation25_spill] sm:$0xff] %v5759_v28  ;;  %v1120_v34 = vadd.f32 %v1104_v35, %v5481_v41  ;;  %v1121_v23 = vadd.f32 %v1105_v10, %v5484_v53  ;;  %v1202_v56 = vmul.f32 %v5367_v49, %v1176_v30  ;;  %v1203_v27 = vmul.f32 %v5370_v4, %v1168_v57  ;;  %v7258_v57 = vld [vmem:[#allocation28_spill] sm:$0xff] }
 0x2d8   : > { %v1106_v46 = vmul.f32 %v7253_v33, %v1058_v16  ;;  %v1107_v28 = vmul.f32 %v7253_v33, %v1059_v50  ;;  %v1386_v52 = vmul.f32 %v7254_v13, %v1338_v3  ;;  %v1387_v48 = vmul.f32 %v7254_v13, %v1339_v17 }
 0x2d9   : > { %v1388_v9 = vmul.f32 %v7255_v6, %v1340_v22  ;;  %v1389_v44 = vmul.f32 %v7255_v6, %v1341_v26  ;;  %v1108_v41 = vmul.f32 %v7256_v8, %v1060_v15  ;;  %v1109_v53 = vmul.f32 %v7256_v8, %v1061_v7  ;;  %v7259_v22 = vld [vmem:[#allocation43_spill] sm:$0xff] }
 0x2da   : > { %v5777_v35 = vpop.permute.xlu1 %1286  ;;  %v5779_v10 = vpop.permute.xlu0 %1793  ;;  %v1260_v16 = vadd.f32 %v1244_v14, %v5646_v39  ;;  %v1261_v50 = vadd.f32 %v1245_v32, %v5649_v58  ;;  %v1248_v3 = vmul.f32 %v7258_v57, %v1200_v21  ;;  %v1249_v13 = vmul.f32 %v7258_v57, %v1201_v1  ;;  %v7260_v58 = vld [vmem:[#allocation78_spill] sm:$0xff]  ;;  %v7261_v21 = vld [vmem:[#allocation76_spill] sm:$0xff] }
 0x2db   : > { %7257 = vst [vmem:[#allocation84_spill] sm:$0xff] %v5777_v35  ;;  %v1262_v17 = vadd.f32 %v1246_v55, %v1120_v34  ;;  %v1263_v30 = vadd.f32 %v1247_v25, %v1121_v23  ;;  %v1250_v26 = vmul.f32 %v7259_v22, %v1202_v56  ;;  %v1251_v15 = vmul.f32 %v7259_v22, %v1203_v27  ;;  %v7264_v25 = vld [vmem:[#allocation85_spill] sm:$0xff]  ;;  %v7268_v57 = vld [vmem:[#allocation94_spill] sm:$0xff] }
 0x2dc   : > { %v1122_v8 = vadd.f32 %v1106_v46, %v5475_v5  ;;  %v1123_v7 = vadd.f32 %v1107_v28, %v5478_v11  ;;  %v5789_v33 = vadd.f32 %v1386_v52, %v1260_v16  ;;  %v5791_v6 = vadd.f32 %v1387_v48, %v1261_v50  ;;  %v3826_v11 = vld [vmem:[%s7184_s29 + $0x6] ss:$8 sm:$0x3]  ;;  %v7265_v28 = vld [vmem:[#allocation81_spill] sm:$0xff] }
 0x2dd   : > { %v1124_v32 = vadd.f32 %v1108_v41, %v5511_v59  ;;  %v1125_v39 = vadd.f32 %v1109_v53, %v5514_v29  ;;  %v1449_v14 = vsel %vm1446_vm6, %v7261_v21, %v7260_v58  ;;  %v1457_v5 = vsel %vm1446_vm6, %v7260_v58, %v7261_v21  ;;  %v3827_v48 = vld [vmem:[%s7184_s29 + $0x7] ss:$8 sm:$0x3]  ;;  %v3828_v41 = vld [vmem:[%s7184_s29 + $0x10] ss:$8 sm:$0x3] }
 0x2de   : > { %v5806_v46 = vpop.permute.xlu1 %1302  ;;  %v5808_v55 = vpop.permute.xlu0 %1846  ;;  %v5810_v59 = vadd.f32 %v1248_v3, %v1122_v8  ;;  %v5812_v29 = vadd.f32 %v1249_v13, %v1123_v7  ;;  %v1450_v1 = vsel %vm1446_vm6, %v7265_v28, %v7264_v25  ;;  %v1458_v34 = vsel %vm1446_vm6, %v7264_v25, %v7265_v28  ;;  %v7269_v3 = vld [vmem:[#allocation91_spill] sm:$0xff] }
 0x2df   : > { %7262 = vst [vmem:[#allocation20_spill] sm:$0xff] %v5806_v46  ;;  %7263 = vst [vmem:[#allocation54_spill] sm:$0xff] %v5808_v55  ;;  %v5822_v23 = vadd.f32 %v1250_v26, %v1124_v32  ;;  %v5824_v56 = vadd.f32 %v1251_v15, %v1125_v39  ;;  %v1404_v27 = vadd.f32 %v1388_v9, %v1262_v17  ;;  %v7272_v32 = vld [vmem:[#allocation86_spill] sm:$0xff]  ;;  %v7273_v39 = vld [vmem:[#allocation83_spill] sm:$0xff] }
 0x2e0   : > { %v1405_v52 = vadd.f32 %v1389_v44, %v1263_v30  ;;  %v5833_v53 = vmul.f32 %v5374_v19, %v1457_v5  ;;  %v5836_v16 = vmul.f32 %v5379_v12, %v1449_v14  ;;  %v5840_v50 = vrot.slane %v3826_v11, %v5317_v61  ;;  %v7274_v14 = vld [vmem:[#allocation87_spill] sm:$0xff]  ;;  %v7275_v5 = vld [vmem:[#allocation82_spill] sm:$0xff] }
 0x2e1   : > { %7266 = vst [vmem:[#allocation50_spill] sm:$0xff] %v5824_v56  ;;  %v1482_v9 = vmul.f32 %v5374_v19, %v1458_v34  ;;  %v1483_v44 = vmul.f32 %v5379_v12, %v1450_v1  ;;  %v1309_v13 = vsel %vm1304_vm7, %v7269_v3, %v7268_v57  ;;  %v1317_v17 = vsel %vm1304_vm7, %v7268_v57, %v7269_v3  ;;  %v7277_v1 = vld [vmem:[#allocation124_spill] sm:$0xff]  ;;  %v7278_v34 = vld [vmem:[#allocation121_spill] sm:$0xff]  ;;  %v7286_v46 = vld [vmem:[#allocation34_spill] sm:$0xff] }
 0x2e2   : > { %7267 = vst [vmem:[#allocation71_spill] sm:$0xff] %v5840_v50  ;;  %v1567_v30 = vpop.permute.xlu1 %1566  ;;  %v5852_v22 = vpop.permute.xlu0 %1862  ;;  %v5855_v26 = vrot.slane %v3826_v11, %v5319_v38  ;;  %v5858_v15 = vrot.slane %v3827_v48, %v5317_v61  ;;  %v5861_v8 = vrot.slane %v3827_v48, %v5319_v38  ;;  %v5864_v7 = vrot.slane %v3828_v41, %v5317_v61  ;;  %v7279_v3 = vld [vmem:[#allocation29_spill] sm:$0xff] }
 0x2e3   : > { %7270 = vst [vmem:[#allocation67_spill] sm:$0xff] %v5852_v22  ;;  %v1732_v58 = vsel %vm1730_vm9, %v7273_v39, %v7272_v32  ;;  %v1740_v21 = vsel %vm1730_vm9, %v7272_v32, %v7273_v39  ;;  %v1731_v11 = vsel %vm1730_vm9, %v7275_v5, %v7274_v14  ;;  %v5879_v25 = vrot.slane %v3828_v41, %v5319_v38  ;;  %v7280_v41 = vld [vmem:[#allocation92_spill] sm:$0xff] }
 0x2e4   : > { %7271 = vst [vmem:[#allocation52_spill] sm:$0xff] %v5855_v26  ;;  %v1342_v61 = vmul.f32 %v5418_v2, %v1317_v17  ;;  %v1343_v28 = vmul.f32 %v5421_v37, %v1309_v13  ;;  %v1451_v48 = vsel %vm1446_vm6, %v7278_v34, %v7277_v1  ;;  %v1459_v57 = vsel %vm1446_vm6, %v7277_v1, %v7278_v34  ;;  %v7281_v13 = vld [vmem:[#allocation89_spill] sm:$0xff] }
 0x2e5   : > { %7276 = vst [vmem:[#allocation48_spill] sm:$0xff] %v5879_v25  ;;  %v1530_v32 = vmul.f32 %v7279_v3, %v1482_v9  ;;  %v1531_v39 = vmul.f32 %v7279_v3, %v1483_v44  ;;  %v1739_v38 = vsel %vm1730_vm9, %v7274_v14, %v7275_v5  ;;  %v1036_v17 = vsel %vm1021_vm4, %v7281_v13, %v7280_v41  ;;  %v7282_v1 = vld [vmem:[#allocation93_spill] sm:$0xff]  ;;  %v7283_v44 = vld [vmem:[#allocation95_spill] sm:$0xff] }
 0x2e6   : > { %v1583_v56 = vpop.permute.xlu1 %1582  ;;  %v5901_v55 = vpop.permute.xlu0 %1442  ;;  %v1028_v9 = vsel %vm1021_vm4, %v7280_v41, %v7281_v13  ;;  %v1037_v34 = vsel %vm1021_vm4, %v7283_v44, %v7282_v1  ;;  %v1760_v3 = vmul.f32 %v5840_v50, %v1731_v11  ;;  %v1029_v41 = vsel %vm1021_vm4, %v7282_v1, %v7283_v44 }
 0x2e7   : > { %v5913_v14 = vsel %vm1588_vm8, %v1567_v30, %v1583_v56  ;;  %v5917_v5 = vsel %vm1588_vm8, %v1583_v56, %v1567_v30  ;;  %v1484_v13 = vmul.f32 %v5374_v19, %v1459_v57  ;;  %v1485_v22 = vmul.f32 %v5379_v12, %v1451_v48 }
 0x2e8   : > { %7284 = vst [vmem:[#allocation45_spill] sm:$0xff] %v5913_v14  ;;  %7285 = vst [vmem:[#allocation65_spill] sm:$0xff] %v5917_v5  ;;  %v1761_v35 = vmul.f32 %v5855_v26, %v1739_v38  ;;  %v1390_v25 = vmul.f32 %v7286_v46, %v1342_v61  ;;  %v1391_v14 = vmul.f32 %v7286_v46, %v1343_v28 }
 0x2e9   : > { %v1062_v56 = vmul.f32 %v5327_v43, %v1036_v17  ;;  %v1063_v30 = vmul.f32 %v5330_v62, %v1028_v9  ;;  %v1064_v11 = vmul.f32 %v5327_v43, %v1037_v34  ;;  %v1626_v5 = vmul.f32 %v5382_v42, %v5625_v54  ;;  %v7289_v17 = vld [vmem:[#allocation30_spill] sm:$0xff]  ;;  %v7290_v9 = vld [vmem:[#allocation80_spill] sm:$0xff] }
 0x2ea   : > { %v1627_v57 = vmul.f32 %v7204_v47, %v5629_v51  ;;  %v5936_v1 = vpop.permute.xlu1 %1663  ;;  %v1707_v48 = vpop.permute.xlu0 %1706  ;;  %v5938_v38 = vadd.f32 %v1530_v32, %v1404_v27  ;;  %v1065_v61 = vmul.f32 %v5330_v62, %v1029_v41  ;;  %v5942_v46 = vmul.f32 %v5840_v50, %v1732_v58  ;;  %v7291_v32 = vld [vmem:[#allocation40_spill] sm:$0xff] }
 0x2eb   : > { %7287 = vst [vmem:[#allocation64_spill] sm:$0xff] %v5936_v1  ;;  %v5945_v28 = vmul.f32 %v5855_v26, %v1740_v21  ;;  %v5947_v43 = vadd.f32 %v1531_v39, %v1405_v52  ;;  %v1808_v54 = vmul.f32 %v7289_v17, %v1760_v3  ;;  %v1532_v44 = vmul.f32 %v7290_v9, %v1484_v13  ;;  %v7292_v21 = vld [vmem:[#allocation33_spill] sm:$0xff]  ;;  %v7293_v52 = vld [vmem:[#allocation107_spill] sm:$0xff] }
 0x2ec   : > { %v1533_v51 = vmul.f32 %v7290_v9, %v1485_v22  ;;  %v1809_v34 = vmul.f32 %v7289_v17, %v1761_v35  ;;  %v1406_v27 = vadd.f32 %v1390_v25, %v5810_v59  ;;  %v1407_v62 = vadd.f32 %v1391_v14, %v5812_v29  ;;  %v7294_v35 = vld [vmem:[#allocation97_spill] sm:$0xff]  ;;  %v7295_v17 = vld [vmem:[#allocation99_spill] sm:$0xff] }
 0x2ed   : > { %7288 = vst [vmem:[#allocation26_spill] sm:$0xff] %v5945_v28  ;;  %v1110_v58 = vmul.f32 %v7291_v32, %v1062_v56  ;;  %v1111_v41 = vmul.f32 %v7291_v32, %v1063_v30  ;;  %v1112_v1 = vmul.f32 %v7292_v21, %v1064_v11  ;;  %v1674_v39 = vmul.f32 %v7293_v52, %v1626_v5  ;;  %v7296_v11 = vld [vmem:[#allocation98_spill] sm:$0xff]  ;;  %v7297_v9 = vld [vmem:[#allocation119_spill] sm:$0xff]  ;;  %v7298_v32 = vld [vmem:[#allocation117_spill] sm:$0xff] }
 0x2ee   : > { %v1675_v3 = vmul.f32 %v7293_v52, %v1627_v57  ;;  %v5960_v28 = vpop.permute.xlu1 %1844  ;;  %v1723_v13 = vpop.permute.xlu0 %1722  ;;  %v1113_v22 = vmul.f32 %v7292_v21, %v1065_v61  ;;  %v1318_v59 = vsel %vm1304_vm7, %v7295_v17, %v7294_v35  ;;  %v1548_v14 = vadd.f32 %v1532_v44, %v1406_v27 }
 0x2ef   : > { %v1735_v29 = vsel %vm1730_vm9, %v1707_v48, %v1723_v13  ;;  %v1743_v25 = vsel %vm1730_vm9, %v1723_v13, %v1707_v48  ;;  %v1549_v5 = vadd.f32 %v1533_v51, %v1407_v62  ;;  %v1526_v57 = vmul.f32 %v7296_v11, %v5664_v0 }
 0x2f0   : > { %v1768_v56 = vmul.f32 %v5840_v50, %v1735_v29  ;;  %v1769_v30 = vmul.f32 %v5855_v26, %v1743_v25  ;;  %v1310_v61 = vsel %vm1304_vm7, %v7294_v35, %v7295_v17  ;;  %v1169_v21 = vsel %vm1162_vm5, %v7298_v32, %v7297_v9 }
 0x2f1   : > { %v1177_v48 = vsel %vm1162_vm5, %v7297_v9, %v7298_v32  ;;  %v1690_v44 = vadd.f32 %v1674_v39, %v1548_v14  ;;  %v1691_v51 = vadd.f32 %v1675_v3, %v1549_v5  ;;  %v1527_v13 = vmul.f32 %v7296_v11, %v5667_v31  ;;  %v7300_v9 = vld [vmem:[#allocation46_spill] sm:$0xff] }
 0x2f2   : > { %v1816_v27 = vmul.f32 %v5779_v10, %v1768_v56  ;;  %v1817_v0 = vmul.f32 %v5779_v10, %v1769_v30  ;;  %v5990_v62 = vpop.permute.xlu1 %1860  ;;  %v5992_v52 = vpop.permute.xlu0 %1801  ;;  %v1344_v35 = vmul.f32 %v5418_v2, %v1318_v59  ;;  %v1311_v17 = vsel %vm1304_vm7, %v5757_v60, %v5556_v63 }
 0x2f3   : > { %7299 = vst [vmem:[#allocation61_spill] sm:$0xff] %v5992_v52  ;;  %v1319_v39 = vsel %vm1304_vm7, %v5556_v63, %v5757_v60  ;;  %v1204_v10 = vmul.f32 %v5367_v49, %v1177_v48  ;;  %v1205_v3 = vmul.f32 %v5370_v4, %v1169_v21  ;;  %v1542_v31 = vadd.f32 %v1526_v57, %v5669_v40  ;;  %v7301_v57 = vld [vmem:[#allocation42_spill] sm:$0xff] }
 0x2f4   : > { %v6007_v29 = vadd.f32 %v1816_v27, %v1690_v44  ;;  %v6009_v25 = vadd.f32 %v1817_v0, %v1691_v51  ;;  %v1345_v59 = vmul.f32 %v5421_v37, %v1310_v61  ;;  %v6014_v14 = vadd.f32 %v1809_v34, %v5611_v20  ;;  %v7302_v20 = vld [vmem:[#allocation22_spill] sm:$0xff]  ;;  %v7308_v44 = vld [vmem:[#allocation100_spill] sm:$0xff]  ;;  %v7309_v0 = vld [vmem:[#allocation63_spill] sm:$0xff] }
 0x2f5   : > { %v6017_v5 = vadd.f32 %v1808_v54, %v5613_v24  ;;  %v1126_v63 = vadd.f32 %v1110_v58, %v5561_v18  ;;  %v1127_v60 = vadd.f32 %v1111_v41, %v5564_v45  ;;  %v1346_v56 = vmul.f32 %v5418_v2, %v1319_v39  ;;  %v7303_v24 = vld [vmem:[#allocation49_spill] sm:$0xff]  ;;  %v7304_v18 = vld [vmem:[#allocation106_spill] sm:$0xff]  ;;  %v7305_v45 = vld [vmem:[#allocation104_spill] sm:$0xff] }
 0x2f6   : > { %v1347_v30 = vmul.f32 %v5421_v37, %v1311_v17  ;;  %v6023_v11 = vpop.permute.xlu1 %1935  ;;  %v6026_v40 = vadd.f32 %v1112_v1, %v7300_v9  ;;  %v6029_v61 = vadd.f32 %v1113_v22, %v7301_v57  ;;  %v1543_v34 = vadd.f32 %v1527_v13, %v7302_v20  ;;  %v7306_v41 = vld [vmem:[#allocation44_spill] sm:$0xff]  ;;  %v7311_v17 = vld [vmem:[#allocation109_spill] sm:$0xff] }
 0x2f7   : > { %v1392_v54 = vmul.f32 %v7303_v24, %v1344_v35  ;;  %v6033_v32 = vpop.permute.xlu0 %1923  ;;  %v1592_v58 = vsel %vm1588_vm8, %v7305_v45, %v7304_v18  ;;  %v1600_v1 = vsel %vm1588_vm8, %v7304_v18, %v7305_v45  ;;  %v1252_v21 = vmul.f32 %v7306_v41, %v1204_v10  ;;  %v7310_v35 = vld [vmem:[#allocation108_spill] sm:$0xff] }
 0x2f8   : > { %v1253_v22 = vmul.f32 %v7306_v41, %v1205_v3  ;;  %v6046_v48 = vmul.f32 %v7303_v24, %v1345_v59  ;;  %v1528_v51 = vmul.f32 %v7308_v44, %v5833_v53  ;;  %v1529_v27 = vmul.f32 %v7308_v44, %v5836_v16  ;;  %v7312_v3 = vld [vmem:[#allocation96_spill] sm:$0xff]  ;;  %v7314_v44 = vld [vmem:[#allocation110_spill] sm:$0xff] }
 0x2f9   : > { %v6053_v13 = vadd.f32 %v7309_v0, %v1542_v31  ;;  %v1873_v39 = vsel %vm1872_vm10, %v7311_v17, %v7310_v35  ;;  %v1881_v10 = vsel %vm1872_vm10, %v7310_v35, %v7311_v17  ;;  %v1394_v53 = vmul.f32 %v7312_v3, %v1346_v56  ;;  %v7313_v41 = vld [vmem:[#allocation112_spill] sm:$0xff] }
 0x2fa   : > { %7307 = vst [vmem:[#allocation56_spill] sm:$0xff] %v6046_v48  ;;  %v1395_v59 = vmul.f32 %v7312_v3, %v1347_v30  ;;  %v1427_v16 = vpop.permute.xlu1 %1426  ;;  %v1624_v31 = vmul.f32 %v5382_v42, %v1592_v58  ;;  %v1625_v9 = vmul.f32 %v7204_v47, %v1600_v1  ;;  %v1268_v18 = vadd.f32 %v1252_v21, %v1126_v63  ;;  %v7315_v21 = vld [vmem:[#allocation126_spill] sm:$0xff] }
 0x2fb   : > { %v1453_v57 = vsel %vm1446_vm6, %v1427_v16, %v5901_v55  ;;  %v1461_v20 = vsel %vm1446_vm6, %v5901_v55, %v1427_v16  ;;  %v6074_v24 = vpop.permute.xlu0 %1927  ;;  %v1269_v45 = vadd.f32 %v1253_v22, %v1127_v60  ;;  %v1902_v58 = vmul.f32 %v5858_v15, %v1873_v39  ;;  %v7317_v16 = vld [vmem:[#allocation60_spill] sm:$0xff] }
 0x2fc   : > { %v1488_v56 = vmul.f32 %v5374_v19, %v1461_v20  ;;  %v1489_v30 = vmul.f32 %v5379_v12, %v1453_v57  ;;  %v1903_v1 = vmul.f32 %v5861_v8, %v1881_v10  ;;  %v1170_v0 = vsel %vm1162_vm5, %v7314_v44, %v7313_v41 }
 0x2fd   : > { %v1178_v55 = vsel %vm1162_vm5, %v7313_v41, %v7314_v44  ;;  %v1410_v63 = vadd.f32 %v1394_v53, %v1268_v18  ;;  %v1411_v60 = vadd.f32 %v1395_v59, %v1269_v45  ;;  %v6091_v39 = vadd.f32 %v1392_v54, %v5822_v23  ;;  %v7319_v53 = vld [vmem:[#allocation105_spill] sm:$0xff]  ;;  %v7320_v59 = vld [vmem:[#allocation103_spill] sm:$0xff]  ;;  %v7324_v41 = vld [vmem:[#allocation116_spill] sm:$0xff] }
 0x2fe   : > { %v1536_v22 = vmul.f32 %v7315_v21, %v1488_v56  ;;  %v1537_v35 = vmul.f32 %v7315_v21, %v1489_v30  ;;  %v1429_v17 = vpop.permute.xlu1 %1428  ;;  %v6094_v10 = vadd.f32 %v1528_v51, %v5789_v33  ;;  %v6097_v3 = vadd.f32 %v1529_v27, %v5791_v6  ;;  %v7322_v6 = vld [vmem:[#allocation35_spill] sm:$0xff]  ;;  %v7323_v56 = vld [vmem:[#allocation36_spill] sm:$0xff]  ;;  %v7325_v44 = vld [vmem:[#allocation114_spill] sm:$0xff] }
 0x2ff   : > { %7316 = vst [vmem:[#allocation77_spill] sm:$0xff] %v6091_v39  ;;  %v6100_v57 = vadd.f32 %v7317_v16, %v1543_v34  ;;  %v6102_v20 = vpop.permute.xlu0 %1939  ;;  %v1591_v18 = vsel %vm1588_vm8, %v7320_v59, %v7319_v53  ;;  %v1599_v23 = vsel %vm1588_vm8, %v7319_v53, %v7320_v59  ;;  %v1672_v51 = vmul.f32 %v7322_v6, %v1624_v31  ;;  %v7328_v16 = vld [vmem:[#allocation113_spill] sm:$0xff]  ;;  %v7329_v53 = vld [vmem:[#allocation111_spill] sm:$0xff] }
 0x300   : > { %7318 = vst [vmem:[#allocation75_spill] sm:$0xff] %v6102_v20  ;;  %v6112_v33 = vadd.f32 %v1536_v22, %v1410_v63  ;;  %v6114_v54 = vadd.f32 %v1537_v35, %v1411_v60  ;;  %v1673_v34 = vmul.f32 %v7322_v6, %v1625_v9  ;;  %v1206_v27 = vmul.f32 %v5367_v49, %v1178_v55  ;;  %v7326_v9 = vld [vmem:[#allocation2_spill] sm:$0xff]  ;;  %v7327_v22 = vld [vmem:[#allocation31_spill] sm:$0xff] }
 0x301   : > { %v1207_v45 = vmul.f32 %v5370_v4, %v1170_v0  ;;  %v1950_v30 = vmul.f32 %v7323_v56, %v1902_v58  ;;  %v1452_v21 = vsel %vm1446_vm6, %v7325_v44, %v7324_v41  ;;  %v1460_v63 = vsel %vm1446_vm6, %v7324_v41, %v7325_v44  ;;  %v7331_v44 = vld [vmem:[#allocation51_spill] sm:$0xff] }
 0x302   : > { %7321 = vst [vmem:[#allocation21_spill] sm:$0xff] %v6114_v54  ;;  %v1445_v60 = vpop.permute.xlu1 %1444  ;;  %v1951_v31 = vmul.f32 %v7323_v56, %v1903_v1  ;;  %v2015_v4 = vsel %vm2014_vm11, %v7327_v22, %v7326_v9  ;;  %v2023_v49 = vsel %vm2014_vm11, %v7326_v9, %v7327_v22  ;;  %v1622_v1 = vmul.f32 %v5382_v42, %v1591_v18  ;;  %v7330_v56 = vld [vmem:[#allocation37_spill] sm:$0xff] }
 0x303   : > { %v6140_v58 = vsel %vm1446_vm6, %v1429_v17, %v1445_v60  ;;  %v6144_v0 = vsel %vm1446_vm6, %v1445_v60, %v1429_v17  ;;  %v6146_v55 = vpop.permute.xlu0 %1988  ;;  %v1623_v35 = vmul.f32 %v7204_v47, %v1599_v23  ;;  %v1874_v59 = vsel %vm1872_vm10, %v7329_v53, %v7328_v16  ;;  %v7332_v60 = vld [vmem:[#allocation130_spill] sm:$0xff] }
 0x304   : > { %v1882_v6 = vsel %vm1872_vm10, %v7328_v16, %v7329_v53  ;;  %v1254_v41 = vmul.f32 %v7330_v56, %v1206_v27  ;;  %v1255_v17 = vmul.f32 %v7330_v56, %v1207_v45  ;;  %v1734_v18 = vsel %vm1730_vm9, %v7332_v60, %v7331_v44  ;;  %v7333_v53 = vld [vmem:[#allocation48_spill] sm:$0xff] }
 0x305   : > { %v1742_v23 = vsel %vm1730_vm9, %v7331_v44, %v7332_v60  ;;  %v1486_v9 = vmul.f32 %v5374_v19, %v1460_v63  ;;  %v1487_v22 = vmul.f32 %v5379_v12, %v1452_v21  ;;  %v2044_v16 = vmul.f32 %v5864_v7, %v2015_v4  ;;  %v7335_v60 = vld [vmem:[#allocation125_spill] sm:$0xff]  ;;  %v7336_v63 = vld [vmem:[#allocation128_spill] sm:$0xff] }
 0x306   : > { %v2045_v27 = vmul.f32 %v7333_v53, %v2023_v49  ;;  %v6172_v52 = vpop.permute.xlu1 %1708  ;;  %v1688_v45 = vadd.f32 %v1672_v51, %v5938_v38  ;;  %v1689_v56 = vadd.f32 %v1673_v34, %v5947_v43  ;;  %v1967_v39 = vadd.f32 %v1951_v31, %v6014_v14 }
 0x307   : > { %7334 = vst [vmem:[#allocation73_spill] sm:$0xff] %v6172_v52  ;;  %v6176_v20 = vpop.permute.xlu0 %2004  ;;  %v1966_v44 = vadd.f32 %v1950_v30, %v6017_v5  ;;  %v1733_v21 = vsel %vm1730_vm9, %v7336_v63, %v7335_v60  ;;  %v1741_v4 = vsel %vm1730_vm9, %v7335_v60, %v7336_v63  ;;  %v1766_v38 = vmul.f32 %v5840_v50, %v1734_v18  ;;  %v7338_v30 = vld [vmem:[#allocation102_spill] sm:$0xff] }
 0x308   : > { %v1767_v43 = vmul.f32 %v5855_v26, %v1742_v23  ;;  %v6191_v51 = vadd.f32 %v1254_v41, %v6026_v40  ;;  %v6194_v14 = vadd.f32 %v1255_v17, %v6029_v61  ;;  %v1904_v5 = vmul.f32 %v5858_v15, %v1874_v59  ;;  %v7342_v18 = vld [vmem:[#allocation90_spill] sm:$0xff]  ;;  %v7343_v41 = vld [vmem:[#allocation120_spill] sm:$0xff] }
 0x309   : > { %v1905_v34 = vmul.f32 %v5861_v8, %v1882_v6  ;;  %v6199_v31 = vmul.f32 %v7338_v30, %v1486_v9  ;;  %v6202_v49 = vmul.f32 %v7338_v30, %v1487_v22  ;;  %v2093_v23 = vmul.f32 %v7342_v18, %v2045_v27  ;;  %v7344_v9 = vld [vmem:[#allocation129_spill] sm:$0xff]  ;;  %v7346_v27 = vld [vmem:[#allocation88_spill] sm:$0xff] }
 0x30a   : > { %7337 = vst [vmem:[#allocation69_spill] sm:$0xff] %v6194_v14  ;;  %v6204_v60 = vpop.permute.xlu1 %1724  ;;  %v2092_v40 = vmul.f32 %v7342_v18, %v2044_v16  ;;  %v1670_v63 = vmul.f32 %v7343_v41, %v1622_v1  ;;  %v1671_v61 = vmul.f32 %v7343_v41, %v1623_v35  ;;  %v1764_v59 = vmul.f32 %v5840_v50, %v1733_v21  ;;  %v7347_v21 = vld [vmem:[#allocation32_spill] sm:$0xff] }
 0x30b   : > { %7339 = vst [vmem:[#allocation62_spill] sm:$0xff] %v6199_v31  ;;  %7340 = vst [vmem:[#allocation59_spill] sm:$0xff] %v6202_v49  ;;  %v1765_v6 = vmul.f32 %v5855_v26, %v1741_v4  ;;  %v6212_v17 = vpop.permute.xlu0 %1584  ;;  %v7345_v31 = vld [vmem:[#allocation127_spill] sm:$0xff]  ;;  %v1814_v1 = vmul.f32 %v7346_v27, %v1766_v38  ;;  %v1815_v35 = vmul.f32 %v7346_v27, %v1767_v43  ;;  %v7348_v4 = vld [vmem:[#allocation26_spill] sm:$0xff] }
 0x30c   : > { %7341 = vst [vmem:[#allocation72_spill] sm:$0xff] %v6204_v60  ;;  %v2016_v22 = vsel %vm2014_vm11, %v7345_v31, %v7344_v9  ;;  %v2024_v16 = vsel %vm2014_vm11, %v7344_v9, %v7345_v31  ;;  %v1810_v30 = vmul.f32 %v7347_v21, %v5942_v46  ;;  %v1811_v18 = vmul.f32 %v7347_v21, %v7348_v4  ;;  %v7349_v41 = vld [vmem:[#allocation20_spill] sm:$0xff]  ;;  %v7351_v9 = vld [vmem:[#allocation67_spill] sm:$0xff]  ;;  %v7352_v38 = vld [vmem:[#allocation54_spill] sm:$0xff] }
 0x30d   : > { %v7350_v49 = vld [vmem:[#allocation84_spill] sm:$0xff]  ;;  %v1876_v43 = vsel %vm1872_vm10, %v7352_v38, %v7351_v9  ;;  %v1884_v46 = vsel %vm1872_vm10, %v7351_v9, %v7352_v38  ;;  %v6246_v21 = vadd.f32 %v2093_v23, %v1967_v39  ;;  %v6248_v4 = vadd.f32 %v2092_v40, %v1966_v44 }
 0x30e   : > { %v1312_v26 = vsel %vm1304_vm7, %v7350_v49, %v7349_v41  ;;  %v1320_v31 = vsel %vm1304_vm7, %v7349_v41, %v7350_v49  ;;  %v6244_v27 = vpop.permute.xlu1 %1805  ;;  %v1686_v50 = vadd.f32 %v1670_v63, %v6094_v10  ;;  %v1687_v49 = vadd.f32 %v1671_v61, %v6097_v3  ;;  %v7353_v41 = vld [vmem:[#allocation25_spill] sm:$0xff] }
 0x30f   : > { %v1812_v48 = vmul.f32 %v7353_v41, %v1764_v59  ;;  %v1813_v14 = vmul.f32 %v7353_v41, %v1765_v6  ;;  %v1849_v52 = vpop.permute.xlu0 %1848  ;;  %v1348_v60 = vmul.f32 %v5418_v2, %v1320_v31  ;;  %v1349_v54 = vmul.f32 %v5421_v37, %v1312_v26  ;;  %v7356_v41 = vld [vmem:[#allocation45_spill] sm:$0xff] }
 0x310   : > { %v6257_v9 = vmul.f32 %v5864_v7, %v2016_v22  ;;  %v6260_v39 = vmul.f32 %v7333_v53, %v2024_v16  ;;  %v1908_v44 = vmul.f32 %v5858_v15, %v1876_v43  ;;  %v1909_v10 = vmul.f32 %v5861_v8, %v1884_v46 }
 0x311   : > { %v1830_v3 = vadd.f32 %v1814_v1, %v1688_v45  ;;  %v1831_v23 = vadd.f32 %v1815_v35, %v1689_v56  ;;  %v1826_v40 = vadd.f32 %v1810_v30, %v6053_v13  ;;  %v1827_v63 = vadd.f32 %v1811_v18, %v6100_v57  ;;  %v7354_v56 = vld [vmem:[#allocation101_spill] sm:$0xff] }
 0x312   : > { %v1987_v2 = vpop.permute.xlu1 %1986  ;;  %v2125_v37 = vmax.f32 %v6246_v21, 0.0  ;;  %v2124_v26 = vmax.f32 %v6248_v4, 0.0  ;;  %v1828_v61 = vadd.f32 %v1812_v48, %v1686_v50  ;;  %v1829_v59 = vadd.f32 %v1813_v14, %v1687_v49  ;;  %v7355_v14 = vld [vmem:[#allocation115_spill] sm:$0xff] }
 0x313   : > { %v1875_v6 = vsel %vm1872_vm10, %v5960_v28, %v5990_v62  ;;  %v1883_v45 = vsel %vm1872_vm10, %v5990_v62, %v5960_v28  ;;  %v1865_v13 = vpop.permute.xlu0 %1864  ;;  %v1396_v57 = vmul.f32 %v7354_v56, %v1348_v60  ;;  %v6278_v22 = vmul.f32 %v7354_v56, %v1349_v54 }
 0x314   : > { %v1877_v50 = vsel %vm1872_vm10, %v1849_v52, %v1865_v13  ;;  %v1885_v48 = vsel %vm1872_vm10, %v1865_v13, %v1849_v52  ;;  %v1956_v16 = vmul.f32 %v7355_v14, %v1908_v44  ;;  %v1957_v1 = vmul.f32 %v7355_v14, %v1909_v10 }
 0x315   : > { %v1910_v35 = vmul.f32 %v5858_v15, %v1877_v50  ;;  %v1911_v28 = vmul.f32 %v5861_v8, %v1885_v48  ;;  %v1906_v62 = vmul.f32 %v5858_v15, %v1875_v6  ;;  %v1907_v60 = vmul.f32 %v5861_v8, %v1883_v45  ;;  %v7357_v6 = vld [vmem:[#allocation65_spill] sm:$0xff] }
 0x316   : > { %v1952_v54 = vmul.f32 %v6033_v32, %v1904_v5  ;;  %v1953_v30 = vmul.f32 %v6033_v32, %v1905_v34  ;;  %v2003_v18 = vpop.permute.xlu1 %2002  ;;  %v6301_v49 = vadd.f32 %v1396_v57, %v6191_v51  ;;  %v6305_v5 = vmul.f32 %v5382_v42, %v7356_v41 }
 0x317   : > { %v1958_v31 = vmul.f32 %v6023_v11, %v1910_v35  ;;  %v1959_v52 = vmul.f32 %v6023_v11, %v1911_v28  ;;  %v2017_v38 = vsel %vm2014_vm11, %v1987_v2, %v2003_v18  ;;  %v2025_v43 = vsel %vm2014_vm11, %v2003_v18, %v1987_v2  ;;  %v6298_v46 = vpop.permute.xlu0 %1943  ;;  %v7358_v28 = vld [vmem:[#allocation14_spill] sm:$0xff] }
 0x318   : > { %v2048_v32 = vmul.f32 %v5864_v7, %v2017_v38  ;;  %v2049_v34 = vmul.f32 %v7333_v53, %v2025_v43  ;;  %v1954_v11 = vmul.f32 %v6074_v24, %v1906_v62  ;;  %v1955_v44 = vmul.f32 %v6074_v24, %v1907_v60 }
 0x319   : > { %v6312_v10 = vadd.f32 %v1958_v31, %v6007_v29  ;;  %v6315_v2 = vadd.f32 %v1959_v52, %v6009_v25  ;;  %v2724_v51 = vpop.f32.mrb[32].mxu0  ;;  %v6319_v45 = vmul.f32 %v7204_v47, %v7357_v6  ;;  %v1972_v50 = vadd.f32 %v1956_v16, %v1830_v3 }
 0x31a   : > { %v6321_v13 = vmul.f32 0.35355338, %v2724_v51  ;;  %v6323_v56 = vpop.permute.xlu1 %2077  ;;  %v4013_v57 = vpop.f32.mrb[33].mxu0  ;;  %v1973_v48 = vadd.f32 %v1957_v1, %v1831_v23  ;;  %v1968_v14 = vadd.f32 %v1952_v54, %v1826_v40  ;;  %v1969_v24 = vadd.f32 %v1953_v30, %v1827_v63 }
 0x31b   : > { %v2018_v29 = vsel %vm2014_vm11, %v6146_v55, %v6176_v20  ;;  %v2026_v25 = vsel %vm2014_vm11, %v6176_v20, %v6146_v55  ;;  %v2727_v35 = vpop.f32.mrb[34].mxu0  ;;  %v2096_v62 = vmul.f32 %v7358_v28, %v2048_v32  ;;  %v2097_v60 = vmul.f32 %v7358_v28, %v2049_v34  ;;  %v7359_v57 = vld [vmem:[#allocation122_spill] sm:$0xff] }
 0x31c   : > { %v6335_v18 = vmul.f32 0.35355338, %v2727_v35  ;;  %v4014_v3 = vpop.f32.mrb[35].mxu0  ;;  %v2066_v23 = vpop.permute.xlu0 %2065  ;;  %v2804_v40 = vsel %vm2803_vm12, %v6321_v13, -inf  ;;  %v1970_v63 = vadd.f32 %v1954_v11, %v1828_v61  ;;  %v1971_v16 = vadd.f32 %v1955_v44, %v1829_v59 }
 0x31d   : > { %v2094_v1 = vmul.f32 %v2066_v23, %v6257_v9  ;;  %v2095_v54 = vmul.f32 %v2066_v23, %v6260_v39  ;;  %2805 = vmax.xlane.f32.xlu0 %v2804_v40  ;;  %v1490_v20 = vmul.f32 %v5374_v19, %v6144_v0  ;;  %v2050_v55 = vmul.f32 %v5864_v7, %v2018_v29 }
 0x31e   : > { %v2051_v30 = vmul.f32 %v7333_v53, %v2026_v25  ;;  %v1569_v31 = vpop.permute.xlu1 %1568  ;;  %v2807_v52 = vsel %vm2803_vm12, %v6335_v18, -inf  ;;  %v2113_v43 = vadd.f32 %v2097_v60, %v1971_v16  ;;  %v2112_v41 = vadd.f32 %v2096_v62, %v1970_v63  ;;  %v7361_v16 = vld [vmem:[#allocation118_spill] sm:$0xff] }
 0x31f   : > { %v2110_v38 = vadd.f32 %v2094_v1, %v1968_v14  ;;  %v1595_v61 = vsel %vm1588_vm8, %v1569_v31, %v6212_v17  ;;  %v1603_v9 = vsel %vm1588_vm8, %v6212_v17, %v1569_v31  ;;  %2808 = vmax.xlane.f32.xlu1 %v2807_v52  ;;  %v2111_v39 = vadd.f32 %v2095_v54, %v1969_v24  ;;  %v7362_v54 = vld [vmem:[#allocation72_spill] sm:$0xff] }
 0x320   : > { %v1630_v19 = vmul.f32 %v5382_v42, %v1595_v61  ;;  %v1631_v0 = vmul.f32 %v7204_v47, %v1603_v9  ;;  %v2074_v59 = vpop.permute.xlu0 %2073  ;;  %v1491_v6 = vmul.f32 %v5379_v12, %v6140_v58  ;;  %v7360_v12 = vld [vmem:[#allocation21_spill] sm:$0xff]  ;;  %v2129_v4 = vmax.f32 %v2113_v43, 0.0 }
 0x321   : > { %v2098_v32 = vmul.f32 %v2074_v59, %v2050_v55  ;;  %v2099_v34 = vmul.f32 %v2074_v59, %v2051_v30  ;;  %v2792_v11 = vpop.f32.mrb[36].mxu0  ;;  %v2127_v44 = vmax.f32 %v2111_v39, 0.0  ;;  %v2126_v51 = vmax.f32 %v2110_v38, 0.0  ;;  %v7363_v55 = vld [vmem:[#allocation73_spill] sm:$0xff] }
 0x322   : > { %v1678_v14 = vmul.f32 %v7359_v57, %v1630_v19  ;;  %v1679_v17 = vmul.f32 %v7359_v57, %v1631_v0  ;;  %v6359_v24 = vmul.f32 0.35355338, %v2792_v11  ;;  %v1571_v29 = vpop.permute.xlu1 %1570  ;;  %v4019_v25 = vpop.f32.mrb[37].mxu0  ;;  %v1539_v1 = vmul.f32 %v7361_v16, %v1491_v6  ;;  %v7364_v39 = vld [vmem:[#allocation69_spill] sm:$0xff]  ;;  %v7368_v6 = vld [vmem:[#allocation52_spill] sm:$0xff] }
 0x323   : > { %v2114_v35 = vadd.f32 %v2098_v32, %v1972_v50  ;;  %v2115_v28 = vadd.f32 %v2099_v34, %v1973_v48  ;;  %v2141_v62 = vpack.c.bf16 %v2127_v44, %v2125_v37  ;;  %v2795_v60 = vpop.f32.mrb[38].mxu0  ;;  %v2140_v3 = vpack.c.bf16 %v2126_v51, %v2124_v26  ;;  %v7365_v32 = vld [vmem:[#allocation50_spill] sm:$0xff]  ;;  %v7366_v34 = vld [vmem:[#allocation56_spill] sm:$0xff]  ;;  %v7367_v44 = vld [vmem:[#allocation71_spill] sm:$0xff] }
 0x324   : > { %v6366_v23 = vadd.f32 %v1678_v14, %v6112_v33  ;;  %v6369_v58 = vadd.f32 %v1679_v17, %v7360_v12  ;;  %v6371_v40 = vpop.permute.xlu0 %2081  ;;  %v2810_v63 = vsel %vm2803_vm12, %v6359_v24, -inf  ;;  %v6375_v50 = vmul.f32 0.35355338, %v2795_v60  ;;  %v4020_v48 = vpop.f32.mrb[39].mxu0  ;;  %v7369_v17 = vld [vmem:[#allocation64_spill] sm:$0xff]  ;;  %v7370_v25 = vld [vmem:[#allocation123_spill] sm:$0xff] }
 0x325   : > { %v2130_v21 = vmax.f32 %v2114_v35, 0.0  ;;  %v2131_v37 = vmax.f32 %v2115_v28, 0.0  ;;  %2811 = vmax.xlane.f32.xlu0 %v2810_v63  ;;  %2193 = vmatprep.subr.bf16.mxu1 %v2141_v62  ;;  %v2128_v26 = vmax.f32 %v2112_v41, 0.0  ;;  %v1538_v33 = vmul.f32 %v7361_v16, %v1490_v20  ;;  %v7371_v62 = vld [vmem:[#allocation77_spill] sm:$0xff]  ;;  %v7372_v60 = vld [vmem:[#allocation62_spill] sm:$0xff]  ;;  %v7373_v12 = vld [vmem:[#allocation59_spill] sm:$0xff] }
 0x326   : > { %v1736_v30 = vsel %vm1730_vm9, %v7363_v55, %v7362_v54  ;;  %v1744_v31 = vsel %vm1730_vm9, %v7362_v54, %v7363_v55  ;;  %v1587_v52 = vpop.permute.xlu1 %1586  ;;  %2194 = vmatpush1.bf16.msra.mxu1 %v2140_v3  ;;  %v1413_v19 = vadd.f32 %v6278_v22, %v7364_v39  ;;  %v2813_v41 = vsel %vm2803_vm12, %v6375_v50, -inf }
 0x327   : > { %v1596_v38 = vsel %vm1588_vm8, %v1571_v29, %v1587_v52  ;;  %v1604_v20 = vsel %vm1588_vm8, %v1587_v52, %v1571_v29  ;;  %v2143_v61 = vpack.c.bf16 %v2131_v37, %v2129_v4  ;;  %v2142_v9 = vpack.c.bf16 %v2130_v21, %v2128_v26  ;;  %v7374_v37 = vld [vmem:[#allocation27_spill] sm:$0xff] }
 0x328   : > { %v1632_v0 = vmul.f32 %v5382_v42, %v1596_v38  ;;  %v1633_v59 = vmul.f32 %v7204_v47, %v1604_v20  ;;  %v1713_v43 = vpop.permute.xlu0 %1712  ;;  %v1409_v11 = vadd.f32 %v7366_v34, %v7365_v32  ;;  %v1770_v51 = vmul.f32 %v7367_v44, %v1736_v30 }
 0x329   : > { %v1771_v57 = vmul.f32 %v7368_v6, %v1744_v31  ;;  %2814 = vmax.xlane.f32.xlu0 %v2813_v41  ;;  %2195 = vmatprep.subr.bf16.mxu1 %v2143_v61  ;;  %v1554_v14 = vadd.f32 %v1538_v33, %v6301_v49  ;;  %v1555_v22 = vadd.f32 %v1539_v1, %v1413_v19 }
 0x32a   : > { %v1680_v42 = vmul.f32 %v7369_v17, %v1632_v0  ;;  %v1681_v47 = vmul.f32 %v7369_v17, %v1633_v59  ;;  %v1851_v29 = vpop.permute.xlu1 %1850  ;;  %2196 = vmatpush1.bf16.msra.mxu1 %v2142_v9  ;;  %v1676_v35 = vmul.f32 %v7370_v25, %v6305_v5  ;;  %v1677_v28 = vmul.f32 %v7370_v25, %v6319_v45  ;;  %v7375_v9 = vld [vmem:[#allocation13_spill] sm:$0xff] }
 0x32b   : > { %v1550_v3 = vadd.f32 %v7372_v60, %v7371_v62  ;;  %v1551_v63 = vadd.f32 %v7373_v12, %v1409_v11  ;;  %v1818_v4 = vmul.f32 %v7374_v37, %v1770_v51  ;;  %v1819_v26 = vmul.f32 %v7374_v37, %v1771_v57  ;;  %v7377_v57 = vld [vmem:[#allocation16_spill] sm:$0xff]  ;;  %v7378_v17 = vld [vmem:[#allocation17_spill] sm:$0xff] }
 0x32c   : > { %v1696_v48 = vadd.f32 %v1680_v42, %v1554_v14  ;;  %v1697_v49 = vadd.f32 %v1681_v47, %v1555_v22  ;;  %v1729_v21 = vpop.permute.xlu0 %1728  ;;  %v7379_v12 = vld [vmem:[#allocation61_spill] sm:$0xff] }
 0x32d   : > { %v1738_v16 = vsel %vm1730_vm9, %v1713_v43, %v1729_v21  ;;  %v1746_v5 = vsel %vm1730_vm9, %v1729_v21, %v1713_v43  ;;  %v1692_v54 = vadd.f32 %v1676_v35, %v1550_v3  ;;  %v1693_v55 = vadd.f32 %v1677_v28, %v1551_v63  ;;  %v7376_v43 = vld [vmem:[#allocation75_spill] sm:$0xff]  ;;  %v4282_v21 = vld [vmem:[%s6858_s12 + $0x38] sm:$0xff] }
 0x32e   : > { %v1774_v45 = vmul.f32 %v7367_v44, %v1738_v16  ;;  %v1775_v33 = vmul.f32 %v7368_v6, %v1746_v5  ;;  %v1867_v1 = vpop.permute.xlu1 %1866 }
 0x32f   : > { %v1878_v30 = vsel %vm1872_vm10, %v1851_v29, %v1867_v1  ;;  %v1886_v31 = vsel %vm1872_vm10, %v1867_v1, %v1851_v29  ;;  %v1834_v39 = vadd.f32 %v1818_v4, %v1692_v54  ;;  %v1835_v19 = vadd.f32 %v1819_v26, %v1693_v55 }
 0x330   : > { %v1822_v52 = vmul.f32 %v6244_v27, %v1774_v45  ;;  %v1823_v38 = vmul.f32 %v6244_v27, %v1775_v33  ;;  %v1912_v20 = vmul.f32 %v5858_v15, %v1878_v30  ;;  %v1913_v61 = vmul.f32 %v5861_v8, %v1886_v31  ;;  %1852 = vrot.lane.b32.xlu1 %v7375_v9, %s4308_s23  ;;  %v1993_v34 = vpop.permute.xlu0 %1992 }
 0x332   : > { %v6429_v0 = vadd.f32 %v1822_v52, %v1696_v48  ;;  %v6431_v59 = vadd.f32 %v1823_v38, %v1697_v49  ;;  %v1960_v41 = vmul.f32 %v7376_v43, %v1912_v20  ;;  %v1961_v32 = vmul.f32 %v7376_v43, %v1913_v61  ;;  %v6435_v11 = vpop.permute.xlu1 %1947 }
 0x334   : > { %v1976_v27 = vadd.f32 %v1960_v41, %v1834_v39  ;;  %v1977_v51 = vadd.f32 %v1961_v32, %v1835_v19  ;;  %1854 = vrot.lane.b32.xlu1 %v7377_v57, %s4308_s23  ;;  %v2009_v22 = vpop.permute.xlu0 %2008 }
 0x335   : > { %v2020_v47 = vsel %vm2014_vm11, %v1993_v34, %v2009_v22  ;;  %v2028_v29 = vsel %vm2014_vm11, %v2009_v22, %v1993_v34 }
 0x336   : > { %v1711_v14 = vpop.permute.xlu1 %1710  ;;  %v2054_v60 = vmul.f32 %v5864_v7, %v2020_v47  ;;  %v2055_v3 = vmul.f32 %v7333_v53, %v2028_v29 }
 0x338   : > { %1870 = vrot.lane.b32.xlu1 %v7378_v17, %s4308_s23  ;;  %v2102_v37 = vmul.f32 %v6371_v40, %v2054_v60  ;;  %v2103_v4 = vmul.f32 %v6371_v40, %v2055_v3 }
 0x33a   : > { %v1727_v42 = vpop.permute.xlu1 %1726  ;;  %v2119_v54 = vadd.f32 %v2103_v4, %v1977_v51  ;;  %v2118_v40 = vadd.f32 %v2102_v37, %v1976_v27 }
 0x33b   : > { %v1737_v25 = vsel %vm1730_vm9, %v1711_v14, %v1727_v42  ;;  %v1745_v35 = vsel %vm1730_vm9, %v1727_v42, %v1711_v14 }
 0x33c   : > { %v1772_v28 = vmul.f32 %v7367_v44, %v1737_v25  ;;  %v1773_v62 = vmul.f32 %v7368_v6, %v1745_v35  ;;  %1996 = vrot.lane.b32.xlu1 %v7377_v57, %s4309_s0  ;;  %v2135_v52 = vmax.f32 %v2119_v54, 0.0  ;;  %v2134_v20 = vmax.f32 %v2118_v40, 0.0 }
 0x33e   : > { %v1820_v63 = vmul.f32 %v7379_v12, %v1772_v28  ;;  %v1821_v48 = vmul.f32 %v7379_v12, %v1773_v62  ;;  %v1991_v49 = vpop.permute.xlu1 %1990 }
 0x33f   : > { %2089 = vperm.xlu0 %4160, %v4282_v21  }
 0x340   : > { %v6461_v44 = vadd.f32 %v1820_v63, %v6366_v23  ;;  %v6464_v6 = vadd.f32 %v1821_v48, %v6369_v58  ;;  %2012 = vrot.lane.b32.xlu1 %v7378_v17, %s4309_s0  ;;  %v7380_v23 = vld [vmem:[#allocation15_spill] sm:$0xff] }
 0x342   : > { %v2007_v26 = vpop.permute.xlu1 %2006 }
 0x343   : > { %v2019_v16 = vsel %vm2014_vm11, %v1991_v49, %v2007_v26  ;;  %v2027_v5 = vsel %vm2014_vm11, %v2007_v26, %v1991_v49  ;;  %1868 = vrot.lane.b32.xlu0 %v7380_v23, %s4308_s23 }
 0x344   : > { %v2052_v58 = vmul.f32 %v5864_v7, %v2019_v16  ;;  %v2053_v45 = vmul.f32 %v7333_v53, %v2027_v5 }
 0x346   : > { %v2100_v33 = vmul.f32 %v6323_v56, %v2052_v58  ;;  %v2101_v1 = vmul.f32 %v6323_v56, %v2053_v45  ;;  %v6486_v56 = vpop.permute.xlu1 %2085 }
 0x347   : > { %1994 = vrot.lane.b32.xlu0 %v7375_v9, %s4309_s0 }
 0x348   : > { %v2117_v55 = vadd.f32 %v2101_v1, %v6315_v2  ;;  %v2116_v30 = vadd.f32 %v2100_v33, %v6312_v10 }
 0x34a   : > { %v2133_v31 = vmax.f32 %v2117_v55, 0.0  ;;  %v2132_v38 = vmax.f32 %v2116_v30, 0.0 }
 0x34b   : > { %2010 = vrot.lane.b32.xlu0 %v7380_v23, %s4309_s0  ;;  %s7404_s0 = sshll.u32 %s7406_s28, 6 }
 0x34c   : > { %v2145_v61 = vpack.c.bf16 %v2135_v52, %v2133_v31  ;;  %v2144_v39 = vpack.c.bf16 %v2134_v20, %v2132_v38  ;;  %s6826_s30 = scalar_lea.vmem %s6868_s22, %s7404_s0 }
 0x34e   : > { %2197 = vmatprep.subr.bf16.mxu1 %v2145_v61 }
 0x34f   : > { %2198 = vmatpush1.bf16.msra.mxu1 %v2144_v39 }
 0x3aa   : > { %v2806_v19 = vpop.xlane.xlu0 %2805 }
 0x3ab   : > { %v2816_v43 = vsub.f32 %v6321_v13, %v2806_v19 }
 0x3ac   : > { %v2809_v41 = vpop.xlane.xlu1 %2808 }
 0x3ad   : > { %v2820_v2 = vmul.f32 1.442695, %v2816_v43  ;;  %v2817_v10 = vsub.f32 %v6335_v18, %v2809_v41 }
 0x3af   : > { %4215 = vpow2.f32 %v2820_v2  ;;  %v2822_v32 = vmul.f32 1.442695, %v2817_v10 }
 0x3b0   : > { %v1853_v34 = vpop.permute.xlu1 %1852 }
 0x3b1   : > { %4217 = vpow2.f32 %v2822_v32 }
 0x3b2   : > { %v2812_v27 = vpop.xlane.xlu0 %2811 }
 0x3b3   : > { %v2818_v51 = vsub.f32 %v6359_v24, %v2812_v27 }
 0x3b4   : > { %v1855_v14 = vpop.permute.xlu1 %1854 }
 0x3b5   : > { %v2824_v22 = vmul.f32 1.442695, %v2818_v51 }
 0x3b6   : > { %v2815_v42 = vpop.xlane.xlu0 %2814 }
 0x3b7   : > { %4219 = vpow2.f32 %v2824_v22  ;;  %v2819_v47 = vsub.f32 %v6375_v50, %v2815_v42  ;;  %v4189_v42 = vld [vmem:[%s7381_s6 + $0x8] sm:$0xff]  }
 0x3b8   : > { %v1871_v29 = vpop.permute.xlu1 %1870 }
 0x3b9   : > { %v6492_v25 = vpop.eup %4215  ;;  %v2826_v13 = vmul.f32 1.442695, %v2819_v47  ;;  %v1880_v50 = vsel %vm1872_vm10, %v1855_v14, %v1871_v29  ;;  %v1888_v60 = vsel %vm1872_vm10, %v1871_v29, %v1855_v14  ;;  %v7382_v47 = vmov 0   ;;  %v4191_v29 = vld [vmem:[%s7381_s6 + $0x50] sm:$0xff]  }
 0x3ba   : > { %v2828_v18 = vsel %vm2803_vm12, %v6492_v25, 0.0  ;;  %v1916_v37 = vmul.f32 %v5858_v15, %v1880_v50  ;;  %v1917_v4 = vmul.f32 %v5861_v8, %v1888_v60  ;;  %v4195_v50 = vld [vmem:[%s7381_s6 + $0x60] sm:$0xff]  }
 0x3bb   : > { %v6496_v35 = vpop.eup %4217  ;;  %4221 = vpow2.f32 %v2826_v13  ;;  %2829 = vadd.xlane.f32.xlu0 %v2828_v18  ;;  %v4190_v13 = vld [vmem:[%s6860_s14 + $0x8] sm:$0xff]   ;;  %v4192_v18 = vld [vmem:[%s7381_s6 + $0x10] sm:$0xff]   ;;  %v4196_v60 = vld [vmem:[%s7381_s6 + $0x20] sm:$0xff]  }
 0x3bc   : > { %v1997_v28 = vpop.permute.xlu1 %1996  ;;  %v2831_v24 = vsel %vm2803_vm12, %v6496_v35, 0.0  ;;  %v1964_v55 = vmul.f32 %v6435_v11, %v1916_v37  ;;  %v1965_v30 = vmul.f32 %v6435_v11, %v1917_v4  ;;  %v4202_v37 = vld [vmem:[%s7381_s6 + $0x38] sm:$0xff]   ;;  %v7384_v4 = vmov 0.0  }
 0x3bd   : > { %2832 = vadd.xlane.f32.xlu1 %v2831_v24  ;;  %v7383_v24 = vld [vmem:[#allocation3_spill] sm:$0xff] }
 0x3be   : > { %v2090_v62 = vpop.permute.xlu0 %2089 }
 0x3c0   : > { %v2013_v3 = vpop.permute.xlu1 %2012 }
 0x3c1   : > { %v6504_v12 = vpop.eup %4219  ;;  %v2022_v63 = vsel %vm2014_vm11, %v1997_v28, %v2013_v3  ;;  %v2030_v48 = vsel %vm2014_vm11, %v2013_v3, %v1997_v28  ;;  %v4193_v28 = vld [vmem:[%s7381_s6 + $0x58] sm:$0xff]   ;;  %v4197_v3 = vld [vmem:[%s7381_s6 + $0x68] sm:$0xff]  }
 0x3c2   : > { %v1869_v49 = vpop.permute.xlu0 %1868  ;;  %v2834_v21 = vsel %vm2803_vm12, %v6504_v12, 0.0  ;;  %v2058_v58 = vmul.f32 %v5864_v7, %v2022_v63  ;;  %v2059_v45 = vmul.f32 %v7333_v53, %v2030_v48  ;;  %v4198_v63 = vld [vmem:[%s7381_s6 + $0x28] sm:$0xff]   ;;  %v4199_v48 = vld [vmem:[%s7381_s6 + $0x70] sm:$0xff]  }
 0x3c3   : > { %v1879_v26 = vsel %vm1872_vm10, %v1853_v34, %v1869_v49  ;;  %v1887_v16 = vsel %vm1872_vm10, %v1869_v49, %v1853_v34  ;;  %2835 = vadd.xlane.f32.xlu0 %v2834_v21  ;;  %v4200_v49 = vld [vmem:[%s7381_s6 + $0x30] sm:$0xff]   ;;  %v4201_v21 = vld [vmem:[%s7381_s6 + $0x78] sm:$0xff]  }
 0x3c4   : > { %v1914_v33 = vmul.f32 %v5858_v15, %v1879_v26  ;;  %v1915_v1 = vmul.f32 %v5861_v8, %v1887_v16  ;;  %v2106_v31 = vmul.f32 %v2090_v62, %v2058_v58  ;;  %v2107_v52 = vmul.f32 %v2090_v62, %v2059_v45  ;;  %v4194_v62 = vld [vmem:[%s7381_s6 + $0x18] sm:$0xff]   ;;  %v7385_v26 = vld [vmem:[#allocation4_spill] sm:$0xff]  ;;  %v7386_v16 = vld [vmem:[#allocation6_spill] sm:$0xff] }
 0x3c5   : > { %v6518_v5 = vpop.eup %4221  ;;  %v1980_v15 = vadd.f32 %v1964_v55, %v6429_v0  ;;  %v1981_v8 = vadd.f32 %v1965_v30, %v6431_v59  ;;  %v7387_v58 = vld [vmem:[#allocation5_spill] sm:$0xff]  ;;  %v7388_v45 = vld [vmem:[#allocation12_spill] sm:$0xff] }
 0x3c6   : > { %v1995_v54 = vpop.permute.xlu0 %1994  ;;  %v2837_v40 = vsel %vm2803_vm12, %v6518_v5, 0.0  ;;  %v1962_v38 = vmul.f32 %v6298_v46, %v1914_v33  ;;  %v1963_v20 = vmul.f32 %v6298_v46, %v1915_v1  ;;  %v7389_v33 = vld [vmem:[#allocation11_spill] sm:$0xff] }
 0x3c7   : > { %2838 = vadd.xlane.f32.xlu0 %v2837_v40  ;;  %v2123_v41 = vadd.f32 %v2107_v52, %v1981_v8  ;;  %v2122_v2 = vadd.f32 %v2106_v31, %v1980_v15  ;;  %v7390_v1 = vld [vmem:[#allocation19_spill] sm:$0xff] }
 0x3c8   : > { %v1978_v10 = vadd.f32 %v1962_v38, %v6461_v44  ;;  %v1979_v46 = vadd.f32 %v1963_v20, %v6464_v6  ;;  %v4185_v44 = vld [vmem:[%s6860_s14] sm:$0xff]  }
 0x3c9   : > { %v2139_v51 = vmax.f32 %v2123_v41, 0.0  ;;  %v2138_v14 = vmax.f32 %v2122_v2, 0.0  ;;  %v4187_v6 = vld [vmem:[%s7381_s6] sm:$0xff]   ;;  %v7392_v41 = vld [vmem:[#allocation55_spill] sm:$0xff]  ;;  %v7393_v2 = vld [vmem:[#allocation53_spill] sm:$0xff] }
 0x3ca   : > { %v2011_v61 = vpop.permute.xlu0 %2010 }
 0x3cb   : > { %v2021_v39 = vsel %vm2014_vm11, %v1995_v54, %v2011_v61  ;;  %v2029_v19 = vsel %vm2014_vm11, %v2011_v61, %v1995_v54  ;;  %v7391_v54 = vld [vmem:[#allocation18_spill] sm:$0xff] }
 0x3cc   : > { %v2056_v11 = vmul.f32 %v5864_v7, %v2021_v39  ;;  %v2057_v43 = vmul.f32 %v7333_v53, %v2029_v19  ;;  %v4186_v53 = vld [vmem:[%s7381_s6 + $0x40] sm:$0xff]  }
 0x3ce   : > { %v2104_v0 = vmul.f32 %v6486_v56, %v2056_v11  ;;  %v2105_v59 = vmul.f32 %v6486_v56, %v2057_v43  ;;  %v4188_v56 = vld [vmem:[%s7381_s6 + $0x48] sm:$0xff]  }
 0x3d0   : > { %v2121_v32 = vadd.f32 %v2105_v59, %v1979_v46  ;;  %v2120_v34 = vadd.f32 %v2104_v0, %v1978_v10  ;;  %v7394_v10 = vpack.c.bf16 %v7392_v41, %v7393_v2  ;;  %v7396_v0 = vld [vmem:[#allocation57_spill] sm:$0xff] }
 0x3d2   : > { %v2137_v27 = vmax.f32 %v2121_v32, 0.0  ;;  %v2136_v36 = vmax.f32 %v2120_v34, 0.0 }
 0x3d4   : > { %v2147_v22 = vpack.c.bf16 %v2139_v51, %v2137_v27  ;;  %v2146_v7 = vpack.c.bf16 %v2138_v14, %v2136_v36 }
 0x3d6   : > { %2199 = vmatprep.subr.bf16.mxu1 %v2147_v22  ;;  %v4203_v22 = vld [vmem:[%s6862_s16] sm:$0xff]  }
 0x3d7   : > { %2200 = vmatpush1.bf16.msra.mxu1 %v2146_v7 }
 0x3d8   : > { %3945 = vmatprep.subr.bf16.mxu1 %v4186_v53 }
 0x3da   : > { %3831 = vmatmul.mubr.msk.bf16.vlgmr.msra.gmra.mrb[0].mxu1 %vm2186_vm13, %v4185_v44 }
 0x3db   : > { %3946 = vmatpush3.bf16.msra.mxu1 %v4187_v6  ;;  %2235 = vmatprep.mubr.bf16.mxu1 %v7382_v47 }
 0x3dc   : > { %3947 = vmatprep.subr.bf16.mxu1 %v4188_v56  ;;  %v2648_v56 = vld [vmem:[%s6854_s8] sm:$0xff] }
 0x3df   : > { %3948 = vmatpush3.bf16.msra.mxu1 %v4189_v42 }
 0x3e0   : > { %3949 = vmatprep.subr.bf16.mxu1 %v4191_v29  ;;  %v2649_v29 = vld [vmem:[%s6854_s8 + $0x8] sm:$0xff] }
 0x3e2   : > { %3832 = vmatmul.mubr.msk.bf16.gmra.mrb[4].mxu1 %vm2186_vm13, %v4190_v13 }
 0x3e3   : > { %3950 = vmatpush3.bf16.msra.mxu1 %v4192_v18  ;;  %2607 = vmatprep.mubr.bf16.mxu1 %v7383_v24 }
 0x3e4   : > { %3951 = vmatprep.subr.bf16.mxu1 %v4193_v28 }
 0x3e7   : > { %3952 = vmatpush3.bf16.msra.mxu1 %v4194_v62 }
 0x3e8   : > { %3953 = vmatprep.subr.bf16.mxu1 %v4195_v50 }
 0x3eb   : > { %3954 = vmatpush3.bf16.msra.mxu1 %v4196_v60 }
 0x3ec   : > { %3955 = vmatprep.subr.bf16.mxu1 %v4197_v3 }
 0x3ef   : > { %3956 = vmatpush3.bf16.msra.mxu1 %v4198_v63 }
 0x3f0   : > { %3957 = vmatprep.subr.bf16.mxu1 %v4199_v48  ;;  %v2652_v48 = vld [vmem:[%s6855_s9] sm:$0xff] }
 0x3f3   : > { %3958 = vmatpush3.bf16.msra.mxu1 %v4200_v49 }
 0x3f4   : > { %3959 = vmatprep.subr.bf16.mxu1 %v4201_v21  ;;  %v2653_v21 = vld [vmem:[%s6855_s9 + $0x8] sm:$0xff] }
 0x3f7   : > { %3960 = vmatpush3.bf16.msra.mxu1 %v4202_v37 }
 0x3f8   : > { %4021 = vmatprep.subr.bf16.mxu1 %v7384_v4 }
 0x3fa   : > { %2608 = vmatmul.mubr.bf16.vlgmr.msra.gmra.mrb[8].mxu1 %v7385_v26 }
 0x3fb   : > { %2615 = vmatprep.mubr.bf16.mxu1 %v7386_v16 }
 0x402   : > { %2616 = vmatmul.mubr.bf16.gmra.mrb[12].mxu1 %v7387_v58 }
 0x403   : > { %2623 = vmatprep.mubr.bf16.mxu1 %v7388_v45 }
 0x40a   : > { %2624 = vmatmul.mubr.bf16.gmra.mrb[16].mxu1 %v7389_v33 }
 0x40b   : > { %2631 = vmatprep.mubr.bf16.mxu1 %v7390_v1 }
 0x412   : > { %2632 = vmatmul.mubr.bf16.gmra.mrb[20].mxu1 %v7391_v54 }
 0x413   : > { %4023 = vmatprep.mubr.msk.bf16.mxu1 %vm4306_vm1, %v7384_v4 }
 0x448   : > { %v2830_v40 = vpop.xlane.xlu0 %2829 }
 0x449   : > { %4223 = vrcp.f32 %v2830_v40 }
 0x44a   : > { %v2833_v55 = vpop.xlane.xlu1 %2832 }
 0x44b   : > { %4225 = vrcp.f32 %v2833_v55 }
 0x450   : > { %v2836_v30 = vpop.xlane.xlu0 %2835 }
 0x451   : > { %4227 = vrcp.f32 %v2836_v30 }
 0x453   : > { %v4224_v31 = vpop.eup %4223 }
 0x454   : > { %v2839_v52 = vpop.xlane.xlu0 %2838  ;;  %v2841_v20 = vmul.f32 %v4224_v31, %v6492_v25 }
 0x455   : > { %v4226_v38 = vpop.eup %4225  ;;  %4229 = vrcp.f32 %v2839_v52 }
 0x456   : > { %v2843_v61 = vmul.f32 %v4226_v38, %v6496_v35  ;;  %v7395_v35 = vld [vmem:[#allocation58_spill] sm:$0xff] }
 0x457   : > { %v7397_v59 = vpack.c.bf16 %v7395_v35, %v7396_v0 }
 0x458   : > { %v2848_v15 = vpack.c.bf16 %v2843_v61, %v2841_v20 }
 0x45a   : > { %v2856_v8 = vsel %vm2803_vm12, %v2848_v15, 0 }
 0x45b   : > { %4022 = vmatpush3.bf16.xpose.msra.mxu1 %v2856_v8  ;;  %v4228_v39 = vpop.eup %4227 }
 0x45c   : > { %v2845_v11 = vmul.f32 %v4228_v39, %v6504_v12 }
 0x45f   : > { %v4230_v19 = vpop.eup %4229 }
 0x460   : > { %v2847_v43 = vmul.f32 %v4230_v19, %v6518_v5 }
 0x462   : > { %4024 = vmatmul.mubr.msk.bf16.vlgmr.msra.gmra.mrb[24].mxu1 %vm2803_vm12, %v7394_v10  ;;  %v2849_v46 = vpack.c.bf16 %v2847_v43, %v2845_v11 }
 0x463   : > { %4037 = vmatprep.mubr.msk.bf16.mxu1 %vm773_vm0, %v4203_v22 }
 0x464   : > { %v2903_v25 = vsel %vm2803_vm12, %v2849_v46, 0 }
 0x465   : > { %4028 = vmatpush3.bf16.xpose.msra.mxu0 %v2903_v25 }
 0x466   : > { %4041 = vmatprep.subr.bf16.mxu0 %v7384_v4 }
 0x46c   : > { %4030 = vmatmul.mubr.msk.bf16.vlgmr.msra.gmra.mrb[40].mxu0 %vm2803_vm12, %v7397_v59 }
 0x46d   : > { %4043 = vmatprep.mubr.msk.bf16.mxu0 %vm4306_vm1, %v7384_v4 }
 0x4ad   : > { %v6625_v12 = vpop.f32.mrb[0].mxu1 }
 0x4ae   : > { %v6627_v5 = vpop.f32.mrb[1].mxu1 }
 0x4af   : > { %v6629_v32 = vpop.f32.mrb[2].mxu1 }
 0x4b0   : > { %v6631_v34 = vpop.f32.mrb[3].mxu1 }
 0x4b5   : > { %v6633_v27 = vpop.f32.mrb[4].mxu1 }
 0x4b6   : > { %v6635_v51 = vpop.f32.mrb[5].mxu1 }
 0x4b7   : > { %v6637_v36 = vpop.f32.mrb[6].mxu1 }
 0x4b8   : > { %v6639_v14 = vpop.f32.mrb[7].mxu1 }
 0x4cd   : > { %v3961_v7 = vpop.f32.mrb[8].mxu1 }
 0x4ce   : > { %v3962_v53 = vpop.f32.mrb[9].mxu1 }
 0x4cf   : > { %v3963_v44 = vadd.f32 %v3962_v53, %v3961_v7  ;;  %v3964_v6 = vpop.f32.mrb[10].mxu1 }
 0x4d0   : > { %v3965_v42 = vpop.f32.mrb[11].mxu1 }
 0x4d1   : > { %v3966_v13 = vadd.f32 %v3965_v42, %v3964_v6  ;;  %v2650_v18 = vadd.f32 %v3963_v44, %v2648_v56  ;;  %v4204_v6 = vld [vmem:[%s6862_s16 + $0x8] sm:$0xff]  }
 0x4d3   : > { %v2651_v28 = vadd.f32 %v3966_v13, %v2649_v29 }
 0x4d5   : > { %v3045_v24 = vpack.c.bf16 %v2651_v28, %v2650_v18  ;;  %v3967_v62 = vpop.f32.mrb[12].mxu1 }
 0x4d6   : > { %v3968_v50 = vpop.f32.mrb[13].mxu1 }
 0x4d7   : > { %v3111_v60 = vrot.slane %v3045_v24, 4  ;;  %v3969_v3 = vadd.f32 %v3968_v50, %v3967_v62  ;;  %v3970_v63 = vpop.f32.mrb[14].mxu1  ;;  %3047 = vxpose.xlu1.c.b16.start.end [1/1] (short) (narrow) %v3045_v24, 16 }
 0x4d8   : > { %v3971_v49 = vpop.f32.mrb[15].mxu1 }
 0x4d9   : > { %v3972_v37 = vadd.f32 %v3971_v49, %v3970_v63  ;;  %3113 = vxpose.xlu0.c.b16.start.end [1/1] (short) (narrow) %v3111_v60, 16  ;;  %v2654_v26 = vadd.f32 %v3969_v3, %v2652_v48 }
 0x4db   : > { %v2655_v16 = vadd.f32 %v3972_v37, %v2653_v21  ;;  %4163 = vset.pattern.permute.xlu1 %v7382_v47 }
 0x4dd   : > { %v3046_v58 = vpack.c.bf16 %v2655_v16, %v2654_v26  ;;  %v3973_v45 = vpop.f32.mrb[16].mxu1 }
 0x4de   : > { %v3974_v33 = vpop.f32.mrb[17].mxu1 }
 0x4df   : > { %v6658_v1 = vadd.f32 %v3974_v33, %v3973_v45  ;;  %v3976_v54 = vpop.f32.mrb[18].mxu1  ;;  %v3067_v40 = vsel %vm2686_vm2, %v3046_v58, 0  ;;  %v3130_v56 = vrot.slane %v3046_v58, 4 }
 0x4e0   : > { %v3977_v55 = vpop.f32.mrb[19].mxu1  ;;  %4042 = vmatpush3.bf16.msra.mxu0 %v3067_v40 }
 0x4e1   : > { %v6661_v30 = vadd.f32 %v3977_v55, %v3976_v54  ;;  %4053 = vmatprep.subr.bf16.mxu0 %v7384_v4  ;;  %v3135_v42 = vsel %vm2686_vm2, %v3130_v56, 0  ;;  %v2661_v56 = vld [vmem:[%s6863_s17 + $0x8] sm:$0xff] }
 0x4e2   : > { %4164 = vset.pattern.permute.xlu0 %v7382_v47 }
 0x4e3   : > { %v3228_v31 = vpack.c.bf16 %v6661_v30, %v6658_v1 }
 0x4e5   : > { %v3979_v52 = vpop.f32.mrb[20].mxu1 }
 0x4e6   : > { %v3980_v38 = vpop.f32.mrb[21].mxu1 }
 0x4e7   : > { %v6667_v20 = vadd.f32 %v3980_v38, %v3979_v52  ;;  %v3982_v61 = vpop.f32.mrb[22].mxu1 }
 0x4e8   : > { %v3983_v15 = vpop.f32.mrb[23].mxu1 }
 0x4e9   : > { %v6669_v8 = vadd.f32 %v3983_v15, %v3982_v61 }
 0x4eb   : > { %v3229_v39 = vpack.c.bf16 %v6669_v8, %v6667_v20 }
 0x535   : > { %v2892_v19 = vpop.f32.mrb[24].mxu1 }
 0x536   : > { %v4025_v11 = vpop.f32.mrb[25].mxu1  ;;  %v2946_v41 = vmax.f32 %v2892_v19, 0.0 }
 0x537   : > { %v2895_v43 = vpop.f32.mrb[26].mxu1 }
 0x538   : > { %v2947_v2 = vmax.f32 %v2895_v43, 0.0  ;;  %v4026_v10 = vpop.f32.mrb[27].mxu1 }
 0x53a   : > { %v2950_v46 = vpack.c.bf16 %v2947_v2, %v2946_v41 }
 0x53c   : > { %4033 = vmatprep.subr.bf16.mxu1 %v2950_v46 }
 0x53d   : > { %4034 = vmatpush3.bf16.msra.mxu1 %v2950_v46  ;;  %v3055_v25 = vpop.trf.xlu1 }
 0x53e   : > { %4044 = vmatmul.mubr.msk.bf16.vlgmr.msra.gmra.mrb[44].mxu0 %vm2682_vm3, %v3055_v25 }
 0x53f   : > { %v2939_v35 = vpop.f32.mrb[40].mxu0  ;;  %4055 = vmatprep.mubr.msk.bf16.mxu0 %vm4306_vm1, %v7384_v4  ;;  %v3121_v29 = vpop.trf.xlu0 }
 0x540   : > { %v4031_v0 = vpop.f32.mrb[41].mxu0  ;;  %v2948_v22 = vmax.f32 %v2939_v35, 0.0 }
 0x541   : > { %v2942_v59 = vpop.f32.mrb[42].mxu0 }
 0x542   : > { %v2949_v7 = vmax.f32 %v2942_v59, 0.0  ;;  %v4032_v53 = vpop.f32.mrb[43].mxu0 }
 0x544   : > { %v2951_v44 = vpack.c.bf16 %v2949_v7, %v2948_v22 }
 0x546   : > { %4035 = vmatprep.subr.bf16.mxu1 %v2951_v44 }
 0x547   : > { %4036 = vmatpush3.bf16.msra.mxu1 %v2951_v44  ;;  %v2660_v44 = vld [vmem:[%s6863_s17] sm:$0xff] }
 0x548   : > { %4047 = vmatprep.subr.bf16.mxu1 %v7384_v4 }
 0x54a   : > { %4038 = vmatmul.mubr.msk.bf16.vlgmr.msra.gmra.mrb[28].mxu1 %vm773_vm0, %v4204_v6  ;;  %v2662_v6 = vld [vmem:[%s6863_s17 + $0x10] sm:$0xff] }
 0x54b   : > { %4048 = vmatpush3.bf16.msra.mxu1 %v3135_v42  ;;  %4049 = vmatprep.mubr.msk.bf16.mxu1 %vm4306_vm1, %v7384_v4  ;;  %v2663_v42 = vld [vmem:[%s6863_s17 + $0x18] sm:$0xff] }
 0x54c   : > { %4059 = vmatprep.subr.bf16.mxu1 %v7384_v4 }
 0x552   : > { %4050 = vmatmul.mubr.msk.bf16.vlgmr.msra.gmra.mrb[32].mxu1 %vm2682_vm3, %v3121_v29  ;;  %v3594_v29 = vld [vmem:[%s6867_s21 + $0x8] sm:$0xff] }
 0x553   : > { %4061 = vmatprep.mubr.msk.bf16.mxu1 %vm4306_vm1, %v7384_v4 }
 0x611   : > { %v3103_v13 = vpop.f32.mrb[44].mxu0 }
 0x612   : > { %v3178_v18 = vmul.f32 0.35355338, %v3103_v13  ;;  %v4045_v28 = vpop.f32.mrb[45].mxu0  ;;  %v3041_v13 = vld [vmem:[%s6865_s19] sm:$0xff] }
 0x613   : > { %v3106_v24 = vpop.f32.mrb[46].mxu0  ;;  %v3042_v28 = vld [vmem:[%s6865_s19 + $0x8] sm:$0xff] }
 0x614   : > { %v3179_v62 = vmul.f32 0.35355338, %v3106_v24  ;;  %v3182_v50 = vsel %vm2803_vm12, %v3178_v18, -inf  ;;  %v4046_v60 = vpop.f32.mrb[47].mxu0  ;;  %v2153_v24 = vld [vmem:[%s6861_s15 + $0x8] sm:$0xff] }
 0x615   : > { %3183 = vmax.xlane.f32.xlu1 %v3182_v50  ;;  %v2155_v50 = vld [vmem:[%s6861_s15 + $0x18] sm:$0xff] }
 0x616   : > { %v3185_v3 = vsel %vm2803_vm12, %v3179_v62, -inf  ;;  %v3044_v60 = vld [vmem:[%s6865_s19 + $0x18] sm:$0xff] }
 0x617   : > { %3186 = vmax.xlane.f32.xlu0 %v3185_v3  ;;  %v3593_v3 = vld [vmem:[%s6867_s21] sm:$0xff] }
 0x61d   : > { %v6690_v63 = vpop.f32.mrb[28].mxu1 }
 0x61e   : > { %v6692_v48 = vpop.f32.mrb[29].mxu1 }
 0x61f   : > { %v6694_v49 = vpop.f32.mrb[30].mxu1 }
 0x620   : > { %v6696_v21 = vpop.f32.mrb[31].mxu1 }
 0x625   : > { %v3171_v4 = vpop.f32.mrb[32].mxu1 }
 0x626   : > { %v3180_v37 = vmul.f32 0.35355338, %v3171_v4  ;;  %v4051_v26 = vpop.f32.mrb[33].mxu1  ;;  %v3595_v4 = vld [vmem:[%s6867_s21 + $0x10] sm:$0xff] }
 0x627   : > { %v3174_v16 = vpop.f32.mrb[34].mxu1  ;;  %v2154_v26 = vld [vmem:[%s6861_s15 + $0x10] sm:$0xff] }
 0x628   : > { %v3181_v58 = vmul.f32 0.35355338, %v3174_v16  ;;  %v3188_v45 = vsel %vm2803_vm12, %v3180_v37, -inf  ;;  %v4052_v33 = vpop.f32.mrb[35].mxu1 }
 0x629   : > { %3189 = vmax.xlane.f32.xlu1 %v3188_v45 }
 0x62a   : > { %v3191_v54 = vsel %vm2803_vm12, %v3181_v58, -inf }
 0x62b   : > { %3192 = vmax.xlane.f32.xlu0 %v3191_v54 }
 0x6a2   : > { %v3184_v40 = vpop.xlane.xlu1 %3183 }
 0x6a3   : > { %v3194_v55 = vsub.f32 %v3178_v18, %v3184_v40  ;;  %v3596_v18 = vld [vmem:[%s6867_s21 + $0x18] sm:$0xff] }
 0x6a4   : > { %v3187_v52 = vpop.xlane.xlu0 %3186 }
 0x6a5   : > { %v3198_v38 = vmul.f32 1.442695, %v3194_v55  ;;  %v3195_v61 = vsub.f32 %v3179_v62, %v3187_v52  ;;  %v3043_v62 = vld [vmem:[%s6865_s19 + $0x10] sm:$0xff] }
 0x6a7   : > { %4231 = vpow2.f32 %v3198_v38  ;;  %v3200_v15 = vmul.f32 1.442695, %v3195_v61 }
 0x6a9   : > { %4233 = vpow2.f32 %v3200_v15 }
 0x6b1   : > { %v4232_v19 = vpop.eup %4231 }
 0x6b2   : > { %v3206_v11 = vsel %vm2803_vm12, %v4232_v19, 0.0 }
 0x6b3   : > { %v4234_v43 = vpop.eup %4233  ;;  %3207 = vadd.xlane.f32.xlu1 %v3206_v11 }
 0x6b4   : > { %v3209_v41 = vsel %vm2803_vm12, %v4234_v43, 0.0 }
 0x6b5   : > { %3210 = vadd.xlane.f32.xlu0 %v3209_v41 }
 0x6b6   : > { %v3190_v2 = vpop.xlane.xlu1 %3189 }
 0x6b7   : > { %v3196_v10 = vsub.f32 %v3180_v37, %v3190_v2  ;;  %v2152_v37 = vld [vmem:[%s6861_s15] sm:$0xff] }
 0x6b8   : > { %v3193_v46 = vpop.xlane.xlu0 %3192 }
 0x6b9   : > { %v3202_v25 = vmul.f32 1.442695, %v3196_v10  ;;  %v3197_v35 = vsub.f32 %v3181_v58, %v3193_v46 }
 0x6bb   : > { %4235 = vpow2.f32 %v3202_v25  ;;  %v3204_v0 = vmul.f32 1.442695, %v3197_v35 }
 0x6bd   : > { %4237 = vpow2.f32 %v3204_v0 }
 0x6c5   : > { %v6702_v59 = vpop.eup %4235 }
 0x6c6   : > { %v3212_v22 = vsel %vm2803_vm12, %v6702_v59, 0.0 }
 0x6c7   : > { %v6706_v7 = vpop.eup %4237  ;;  %3213 = vadd.xlane.f32.xlu1 %v3212_v22 }
 0x6c8   : > { %v3215_v53 = vsel %vm2803_vm12, %v6706_v7, 0.0 }
 0x6c9   : > { %3216 = vadd.xlane.f32.xlu0 %v3215_v53  ;;  %v4207_v53 = vld [vmem:[%s7398_s1 + $0x4] ss:$8 sps:$4 sm:$0xff]  }
 0x6d8   : > { %2954 = vperm.xlu1 %4163, %v2660_v44  }
 0x6dc   : > { %2964 = vperm.xlu1 %4163, %v2662_v6  }
 0x6df   : > { %2959 = vperm.xlu0 %4164, %v2661_v56  }
 0x6e0   : > { %2969 = vperm.xlu1 %4163, %v2663_v42  }
 0x6e3   : > { %3604 = vperm.xlu0 %4164, %v3594_v29  }
 0x6e4   : > { %3332 = vperm.xlu1 %4163, %v3041_v13  }
 0x6e7   : > { %3614 = vperm.xlu0 %4164, %v3596_v18  }
 0x6e8   : > { %3337 = vperm.xlu1 %4163, %v3042_v28  }
 0x6eb   : > { %2163 = vperm.xlu0 %4164, %v2153_v24   ;;  %v4209_v24 = vld [vmem:[%s6864_s18 + $0x8] sm:$0xff]  }
 0x6ec   : > { %3342 = vperm.xlu1 %4163, %v3043_v62   ;;  %v4212_v62 = vld [vmem:[%s7399_s26 + $0x4] ss:$8 sps:$4 sm:$0xff]  }
 0x6ef   : > { %2173 = vperm.xlu0 %4164, %v2155_v50   ;;  %v4210_v50 = vld [vmem:[%s7399_s26] ss:$8 sps:$4 sm:$0xff]  }
 0x6f0   : > { %3347 = vperm.xlu1 %4163, %v3044_v60  }
 0x6f4   : > { %3599 = vperm.xlu1 %4163, %v3593_v3  }
 0x6f8   : > { %3609 = vperm.xlu1 %4163, %v3595_v4  }
 0x6fc   : > { %2158 = vperm.xlu1 %4163, %v2152_v37  }
 0x700   : > { %2168 = vperm.xlu1 %4163, %v2154_v26  }
 0x740   : > { %v3208_v16 = vpop.xlane.xlu1 %3207 }
 0x741   : > { %4239 = vrcp.f32 %v3208_v16 }
 0x742   : > { %v3211_v58 = vpop.xlane.xlu0 %3210 }
 0x743   : > { %4241 = vrcp.f32 %v3211_v58 }
 0x74b   : > { %v4240_v45 = vpop.eup %4239 }
 0x74c   : > { %v3219_v54 = vmul.f32 %v4240_v45, %v4232_v19 }
 0x74d   : > { %v4242_v33 = vpop.eup %4241 }
 0x74e   : > { %v3221_v40 = vmul.f32 %v4242_v33, %v4234_v43 }
 0x750   : > { %v3226_v55 = vpack.c.bf16 %v3221_v40, %v3219_v54 }
 0x752   : > { %v3234_v52 = vsel %vm2803_vm12, %v3226_v55, 0 }
 0x753   : > { %4054 = vmatpush3.bf16.xpose.msra.mxu0 %v3234_v52 }
 0x754   : > { %v3214_v38 = vpop.xlane.xlu1 %3213 }
 0x755   : > { %4243 = vrcp.f32 %v3214_v38 }
 0x756   : > { %v3217_v61 = vpop.xlane.xlu0 %3216 }
 0x757   : > { %4245 = vrcp.f32 %v3217_v61 }
 0x758   : > { %v2955_v15 = vpop.permute.xlu1 %2954 }
 0x759   : > { %v3023_v19 = vadd.f32 %v6692_v48, %v2955_v15  ;;  %v7400_v15 = vld [vmem:[#allocation7_spill] sm:$0xff] }
 0x75a   : > { %4056 = vmatmul.mubr.msk.bf16.vlgmr.msra.gmra.mrb[48].mxu0 %vm2803_vm12, %v3228_v31 }
 0x75c   : > { %v2965_v11 = vpop.permute.xlu1 %2964 }
 0x75d   : > { %v3031_v25 = vadd.f32 %v6690_v63, %v2965_v11  ;;  %v4205_v63 = vld [vmem:[%s7398_s1] ss:$8 sps:$4 sm:$0xff]  }
 0x75e   : > { %v2960_v41 = vpop.permute.xlu0 %2959 }
 0x75f   : > { %v4244_v2 = vpop.eup %4243  ;;  %v3026_v43 = vadd.f32 %v6696_v21, %v2960_v41 }
 0x760   : > { %v2970_v10 = vpop.permute.xlu1 %2969  ;;  %v3223_v22 = vmul.f32 %v4244_v2, %v6702_v59  ;;  %v7401_v2 = vld [vmem:[#allocation8_spill] sm:$0xff] }
 0x761   : > { %v4246_v46 = vpop.eup %4245  ;;  %v3415_v35 = vpack.c.bf16 %v3026_v43, %v3023_v19  ;;  %v3034_v0 = vadd.f32 %v6694_v49, %v2970_v10  ;;  %v4208_v49 = vld [vmem:[%s6864_s18] sm:$0xff]   ;;  %v7402_v10 = vld [vmem:[#allocation9_spill] sm:$0xff] }
 0x762   : > { %v3225_v1 = vmul.f32 %v4246_v46, %v6706_v7  ;;  %4069 = vmatprep.mubr.msk.bf16.mxu0 %vm773_vm0, %v4208_v49 }
 0x763   : > { %v3416_v30 = vpack.c.bf16 %v3034_v0, %v3031_v25 }
 0x764   : > { %v3227_v31 = vpack.c.bf16 %v3225_v1, %v3223_v22  ;;  %v3333_v60 = vpop.permute.xlu1 %3332 }
 0x766   : > { %v3281_v48 = vsel %vm2803_vm12, %v3227_v31, 0 }
 0x767   : > { %4060 = vmatpush3.bf16.xpose.msra.mxu1 %v3281_v48 }
 0x768   : > { %3435 = vmatprep.subr.bf16.mxu1 %v4207_v53  ;;  %v3338_v3 = vpop.permute.xlu1 %3337 }
 0x76c   : > { %v3343_v4 = vpop.permute.xlu1 %3342 }
 0x76e   : > { %4062 = vmatmul.mubr.msk.bf16.vlgmr.msra.gmra.mrb[36].mxu1 %vm2803_vm12, %v3229_v39 }
 0x76f   : > { %3436 = vmatpush1.bf16.msra.mxu1 %v4205_v63  ;;  %3467 = vmatprep.mubr.bf16.mxu1 %v7382_v47 }
 0x770   : > { %3508 = vmatprep.subr.bf16.mxu1 %v4212_v62  ;;  %v3348_v16 = vpop.permute.xlu1 %3347 }
 0x776   : > { %3883 = vmatmul.mubr.msk.bf16.vlgmr.msra.gmra.mrb[40].mxu1 %vm2803_vm12, %v3415_v35  ;;  %v7403_v35 = vld [vmem:[#allocation10_spill] sm:$0xff] }
 0x777   : > { %3477 = vmatprep.mubr.bf16.mxu1 %v7382_v47  ;;  %3509 = vmatpush1.bf16.msra.mxu1 %v4210_v50 }
 0x77e   : > { %3884 = vmatmul.mubr.msk.bf16.gmra.mrb[44].mxu1 %vm2803_vm12, %v3416_v30 }
 0x77f   : > { %3540 = vmatprep.mubr.bf16.mxu1 %v7382_v47 }
 0x82d   : > { %v3270_v20 = vpop.f32.mrb[48].mxu0 }
 0x82e   : > { %v4057_v8 = vpop.f32.mrb[49].mxu0  ;;  %v3324_v21 = vmax.f32 %v3270_v20, 0.0 }
 0x82f   : > { %v3273_v39 = vpop.f32.mrb[50].mxu0 }
 0x830   : > { %v3325_v59 = vmax.f32 %v3273_v39, 0.0  ;;  %v4058_v7 = vpop.f32.mrb[51].mxu0 }
 0x832   : > { %v3328_v44 = vpack.c.bf16 %v3325_v59, %v3324_v21 }
 0x834   : > { %4065 = vmatprep.subr.bf16.mxu0 %v3328_v44 }
 0x835   : > { %4066 = vmatpush3.bf16.msra.mxu0 %v3328_v44 }
 0x841   : > { %v3317_v6 = vpop.f32.mrb[36].mxu1 }
 0x842   : > { %v4063_v56 = vpop.f32.mrb[37].mxu1  ;;  %v3326_v29 = vmax.f32 %v3317_v6, 0.0 }
 0x843   : > { %v3320_v42 = vpop.f32.mrb[38].mxu1 }
 0x844   : > { %v3327_v13 = vmax.f32 %v3320_v42, 0.0  ;;  %v4064_v18 = vpop.f32.mrb[39].mxu1 }
 0x846   : > { %v3329_v28 = vpack.c.bf16 %v3327_v13, %v3326_v29 }
 0x848   : > { %4067 = vmatprep.subr.bf16.mxu0 %v3329_v28 }
 0x849   : > { %4068 = vmatpush3.bf16.msra.mxu0 %v3329_v28 }
 0x84c   : > { %4070 = vmatmul.mubr.msk.bf16.vlgmr.msra.gmra.mrb[52].mxu0 %vm773_vm0, %v4209_v24  ;;  %v3605_v24 = vpop.permute.xlu0 %3604 }
 0x84d   : > { %3665 = vmatprep.mubr.bf16.mxu0 %v7382_v47 }
 0x91f   : > { %v4071_v37 = vpop.f32.mrb[52].mxu0 }
 0x920   : > { %v3400_v26 = vpop.f32.mrb[53].mxu0  ;;  %v3409_v45 = vadd.f32 %v4071_v37, %v3343_v4 }
 0x921   : > { %v4072_v58 = vpop.f32.mrb[54].mxu0  ;;  %v3401_v40 = vadd.f32 %v3400_v26, %v3333_v60 }
 0x922   : > { %v3412_v33 = vadd.f32 %v4072_v58, %v3348_v16  ;;  %v3403_v54 = vpop.f32.mrb[55].mxu0 }
 0x923   : > { %v3404_v55 = vadd.f32 %v3403_v54, %v3338_v3 }
 0x924   : > { %v3489_v52 = vpack.c.bf16 %v3412_v33, %v3409_v45 }
 0x925   : > { %v3488_v38 = vpack.c.bf16 %v3404_v55, %v3401_v40  ;;  %v3615_v40 = vpop.permute.xlu0 %3614 }
 0x927   : > { %3887 = vmatmul.mubr.msk.bf16.vlgmr.msra.gmra.mrb[40].mxu1 %vm2803_vm12, %v3488_v38 }
 0x928   : > { %3550 = vmatprep.mubr.bf16.mxu1 %v7382_v47 }
 0x92f   : > { %3888 = vmatmul.mubr.msk.bf16.gmra.mrb[44].mxu1 %vm2803_vm12, %v3489_v52 }
 0x9fa   : > { %v3542_v61 = vpop.f32.mrb[40].mxu1 }
 0x9fb   : > { %v4073_v11 = vadd.f32 %v3542_v61, %v7400_v15  ;;  %v3544_v41 = vpop.f32.mrb[41].mxu1 }
 0x9fc   : > { %v4074_v19 = vadd.f32 %v3544_v41, %v7401_v2  ;;  %v3546_v43 = vpop.f32.mrb[42].mxu1 }
 0x9fd   : > { %v4075_v46 = vadd.f32 %v3546_v43, %v7402_v10  ;;  %v3548_v25 = vpop.f32.mrb[43].mxu1  ;;  %v3577_v22 = vmax.f32 %v4073_v11, 0.0 }
 0x9fe   : > { %v4076_v0 = vadd.f32 %v3548_v25, %v7403_v35  ;;  %v3578_v30 = vmax.f32 %v4074_v19, 0.0 }
 0x9ff   : > { %v3579_v1 = vmax.f32 %v4075_v46, 0.0 }
 0xa00   : > { %v3580_v31 = vmax.f32 %v4076_v0, 0.0 }
 0xa01   : > { %v3585_v53 = vpack.c.bf16 %v3579_v1, %v3577_v22 }
 0xa02   : > { %v3586_v48 = vpack.c.bf16 %v3580_v31, %v3578_v30  ;;  %v3552_v63 = vpop.f32.mrb[44].mxu1 }
 0xa03   : > { %v4077_v49 = vadd.f32 %v3552_v63, %v7375_v9  ;;  %v3554_v20 = vpop.f32.mrb[45].mxu1  ;;  %v4213_v9 = vld [vmem:[%s6866_s20] sm:$0xff]  }
 0xa04   : > { %v4078_v8 = vadd.f32 %v3554_v20, %v7380_v23  ;;  %v3556_v39 = vpop.f32.mrb[46].mxu1  ;;  %3633 = vmatprep.subr.bf16.mxu0 %v3586_v48 }
 0xa05   : > { %v4079_v21 = vadd.f32 %v3556_v39, %v7377_v57  ;;  %v3558_v59 = vpop.f32.mrb[47].mxu1  ;;  %3634 = vmatpush1.bf16.msra.mxu0 %v3585_v53  ;;  %v3581_v44 = vmax.f32 %v4077_v49, 0.0  ;;  %v4214_v57 = vld [vmem:[%s6866_s20 + $0x8] sm:$0xff]  }
 0xa06   : > { %v4080_v7 = vadd.f32 %v3558_v59, %v7378_v17  ;;  %v3582_v56 = vmax.f32 %v4078_v8, 0.0  ;;  %v3600_v17 = vpop.permute.xlu1 %3599  ;;  %v2164_v8 = vpop.permute.xlu0 %2163 }
 0xa07   : > { %v3583_v6 = vmax.f32 %v4079_v21, 0.0 }
 0xa08   : > { %v3584_v42 = vmax.f32 %v4080_v7, 0.0 }
 0xa09   : > { %v3587_v29 = vpack.c.bf16 %v3583_v6, %v3581_v44 }
 0xa0a   : > { %v3588_v13 = vpack.c.bf16 %v3584_v42, %v3582_v56  ;;  %v3610_v58 = vpop.permute.xlu1 %3609  ;;  %v2232_v56 = vadd.f32 %v6629_v32, %v2164_v8 }
 0xa0c   : > { %3635 = vmatprep.subr.bf16.mxu0 %v3588_v13 }
 0xa0d   : > { %3636 = vmatpush1.bf16.msra.mxu0 %v3587_v29  ;;  %v2234_v29 = vadd.f32 %v6631_v34, %v2164_v8 }
 0xa0e   : > { %v2159_v53 = vpop.permute.xlu1 %2158 }
 0xa0f   : > { %v2228_v21 = vadd.f32 %v6625_v12, %v2159_v53  ;;  %v2230_v44 = vadd.f32 %v6627_v5, %v2159_v53  ;;  %v2174_v5 = vpop.permute.xlu0 %2173 }
 0xa10   : > { %3891 = vmatmul.mubr.msk.bf16.vlgmr.msra.gmra.mrb[56].mxu0 %vm773_vm0, %v4213_v9 }
 0xa11   : > { %3675 = vmatprep.mubr.bf16.mxu0 %v7382_v47 }
 0xa18   : > { %3892 = vmatmul.mubr.msk.bf16.gmra.mrb[60].mxu0 %vm773_vm0, %v4214_v57 }
 0xae3   : > { %v3667_v23 = vpop.f32.mrb[56].mxu0 }
 0xae4   : > { %v3668_v18 = vadd.f32 %v3667_v23, %v3600_v17  ;;  %v3669_v28 = vpop.f32.mrb[57].mxu0 }
 0xae5   : > { %v3670_v62 = vadd.f32 %v3669_v28, %v3600_v17  ;;  %v3671_v50 = vpop.f32.mrb[58].mxu0  ;;  %v2169_v17 = vpop.permute.xlu1 %2168 }
 0xae6   : > { %v3893_v60 = vmul.f32 -1.442695, %v3668_v18  ;;  %v3672_v3 = vadd.f32 %v3671_v50, %v3605_v24  ;;  %v3673_v4 = vpop.f32.mrb[59].mxu0  ;;  %v2238_v32 = vadd.f32 %v6633_v27, %v2169_v17  ;;  %v2240_v28 = vadd.f32 %v6635_v51, %v2169_v17 }
 0xae7   : > { %v3894_v37 = vmul.f32 -1.442695, %v3670_v62  ;;  %v3674_v26 = vadd.f32 %v3673_v4, %v3605_v24  ;;  %v2242_v24 = vadd.f32 %v6637_v36, %v2174_v5 }
 0xae8   : > { %4247 = vpow2.f32 %v3893_v60  ;;  %v3895_v47 = vmul.f32 -1.442695, %v3672_v3  ;;  %v2244_v60 = vadd.f32 %v6639_v14, %v2174_v5 }
 0xae9   : > { %4249 = vpow2.f32 %v3894_v37  ;;  %v3896_v16 = vmul.f32 -1.442695, %v3674_v26 }
 0xaea   : > { %4251 = vpow2.f32 %v3895_v47 }
 0xaeb   : > { %4253 = vpow2.f32 %v3896_v16  ;;  %v3677_v45 = vpop.f32.mrb[60].mxu0 }
 0xaec   : > { %v3678_v33 = vadd.f32 %v3677_v45, %v3610_v58  ;;  %v3679_v54 = vpop.f32.mrb[61].mxu0 }
 0xaed   : > { %v3680_v55 = vadd.f32 %v3679_v54, %v3610_v58  ;;  %v3681_v52 = vpop.f32.mrb[62].mxu0 }
 0xaee   : > { %v3897_v38 = vmul.f32 -1.442695, %v3678_v33  ;;  %v3682_v61 = vadd.f32 %v3681_v52, %v3615_v40  ;;  %v3683_v15 = vpop.f32.mrb[63].mxu0 }
 0xaef   : > { %v3898_v11 = vmul.f32 -1.442695, %v3680_v55  ;;  %v3684_v41 = vadd.f32 %v3683_v15, %v3615_v40 }
 0xaf0   : > { %4255 = vpow2.f32 %v3897_v38  ;;  %v3899_v2 = vmul.f32 -1.442695, %v3682_v61 }
 0xaf1   : > { %4257 = vpow2.f32 %v3898_v11  ;;  %v3900_v19 = vmul.f32 -1.442695, %v3684_v41 }
 0xaf2   : > { %v4248_v43 = vpop.eup %4247  ;;  %4259 = vpow2.f32 %v3899_v2 }
 0xaf3   : > { %v4250_v10 = vpop.eup %4249  ;;  %v3710_v46 = vadd.f32 1.0, %v4248_v43  ;;  %4261 = vpow2.f32 %v3900_v19 }
 0xaf4   : > { %v4252_v25 = vpop.eup %4251  ;;  %v3711_v35 = vadd.f32 1.0, %v4250_v10 }
 0xaf5   : > { %v4254_v0 = vpop.eup %4253  ;;  %4263 = vrcp.f32 %v3710_v46  ;;  %v3712_v22 = vadd.f32 1.0, %v4252_v25 }
 0xaf6   : > { %4265 = vrcp.f32 %v3711_v35  ;;  %v3713_v1 = vadd.f32 1.0, %v4254_v0 }
 0xaf7   : > { %4267 = vrcp.f32 %v3712_v22 }
 0xaf8   : > { %4269 = vrcp.f32 %v3713_v1 }
 0xafa   : > { %v4256_v30 = vpop.eup %4255 }
 0xafb   : > { %v4258_v31 = vpop.eup %4257  ;;  %v3714_v48 = vadd.f32 1.0, %v4256_v30 }
 0xafc   : > { %v4260_v63 = vpop.eup %4259  ;;  %v3715_v49 = vadd.f32 1.0, %v4258_v31 }
 0xafd   : > { %v4262_v20 = vpop.eup %4261  ;;  %4271 = vrcp.f32 %v3714_v48  ;;  %v3716_v39 = vadd.f32 1.0, %v4260_v63 }
 0xafe   : > { %4273 = vrcp.f32 %v3715_v49  ;;  %v3717_v59 = vadd.f32 1.0, %v4262_v20 }
 0xaff   : > { %v4264_v7 = vpop.eup %4263  ;;  %4275 = vrcp.f32 %v3716_v39 }
 0xb00   : > { %v4266_v6 = vpop.eup %4265  ;;  %v3734_v12 = vmul.f32 %v4264_v7, %v2228_v21  ;;  %4277 = vrcp.f32 %v3717_v59 }
 0xb01   : > { %v4268_v42 = vpop.eup %4267  ;;  %v3735_v13 = vmul.f32 %v4266_v6, %v2230_v44 }
 0xb02   : > { %v4270_v9 = vpop.eup %4269  ;;  %3742 = vst [vmem:[%s6826_s30] sm:$0xff] %v3734_v12  ;;  %v3736_v57 = vmul.f32 %v4268_v42, %v2232_v56 }
 0xb03   : > { %3743 = vst [vmem:[%s6826_s30 + $0x8] sm:$0xff] %v3735_v13  ;;  %v3737_v23 = vmul.f32 %v4270_v9, %v2234_v29 }
 0xb04   : > { %3744 = vst [vmem:[%s6826_s30 + $0x10] sm:$0xff] %v3736_v57 }
 0xb05   : > { %3745 = vst [vmem:[%s6826_s30 + $0x18] sm:$0xff] %v3737_v23 }
 0xb07   : > { %v4272_v18 = vpop.eup %4271 }
 0xb08   : > { %v4274_v34 = vpop.eup %4273  ;;  %v3738_v62 = vmul.f32 %v4272_v18, %v2238_v32 }
 0xb09   : > { %v4276_v50 = vpop.eup %4275  ;;  %v3739_v3 = vmul.f32 %v4274_v34, %v2240_v28 }
 0xb0a   : > { %v4278_v4 = vpop.eup %4277  ;;  %3746 = vst [vmem:[%s6826_s30 + $0x20] sm:$0xff] %v3738_v62  ;;  %v3740_v37 = vmul.f32 %v4276_v50, %v2242_v24 }
 0xb0b   : > { %3747 = vst [vmem:[%s6826_s30 + $0x28] sm:$0xff] %v3739_v3  ;;  %v3741_v26 = vmul.f32 %v4278_v4, %v2244_v60 }
 0xb0c   : > { %3748 = vst [vmem:[%s6826_s30 + $0x30] sm:$0xff] %v3740_v37 }
 0xb0d   : > { %3749 = vst [vmem:[%s6826_s30 + $0x38] sm:$0xff] %v3741_v26 }
 0xb0e PF: > { %s32_s3 = sadd.s32 1, %s4289_s3  }
 0xb0f   : > { %p29_p4 = scmp.ge.s32.totalorder %s32_s3, 4  }
 0xb11   :  { %31 = sbr.rel (!%p29_p4) target bundleno = 8 (0x8), region = 145 }

</bundles_post_ra>
